<compile_context>
chip_gen: v5e
topology: v5e:2x2
jax: 0.10.0
libtpu: 0.0.40
codegen_flags: <defaults>
</compile_context>

<pallas_src>
import math

import jax
import jax.numpy as jnp
from jax.experimental import pallas as pl
from jax.experimental.pallas import tpu as pltpu

# ----------------------------- small config ---------------------------------
# (reference uses d_model=512, n_heads=8, n_layers=6 — scaled down here)
D_MODEL = 32
D_FF = D_MODEL * 4
N_HEADS = 4
D_K = D_MODEL // N_HEADS
D_V = D_MODEL // N_HEADS
N_LAYERS = 2
TRG_VOCAB = 50
MAXLEN = 64
LN_EPS = 1e-5          # torch nn.LayerNorm default
NEG_INF = -1e9         # matches masked_fill_(-1000000000.0)


# --------------------------- in-kernel helpers -------------------------------
def _layer_norm(y):
    mean = jnp.mean(y, axis=-1, keepdims=True)
    var = jnp.mean(jnp.square(y - mean), axis=-1, keepdims=True)
    return (y - mean) * jax.lax.rsqrt(var + LN_EPS)


def _split_heads(x2, batch, seqlen, hd):
    """(batch*seqlen, H*hd) -> (H*batch, seqlen, hd).

    Heads are stacked into the single LEADING batch dim so every downstream
    einsum stays in the supported one-leading-batch-dim form.  Only lane
    slices + leading-dim stack/reshape (minor dim untouched) are used.
    """
    xh = jnp.stack([x2[:, h * hd:(h + 1) * hd] for h in range(N_HEADS)], axis=0)
    return xh.reshape(N_HEADS * batch, seqlen, hd)


def _mha(q_hb, k_hb, v_hb, mask_add, wo, batch, lq, lk, scale):
    """Head-batched attention.

    q_hb/k_hb/v_hb: (H*B, L, hd).  mask_add: (H*B, lq, lk) additive mask.
    Returns ((B*lq, D) projected output, (B*lq, H*lk) lane-packed probs).
    """
    s = jnp.einsum('bqd,bkd->bqk', q_hb, k_hb,
                   preferred_element_type=jnp.float32) * scale + mask_add
    s = s - jnp.max(s, axis=-1, keepdims=True)
    e = jnp.exp(s)
    p = e / jnp.sum(e, axis=-1, keepdims=True)      # exact softmax (probs returned)
    ctx = jnp.einsum('bqk,bkd->bqd', p, v_hb,
                     preferred_element_type=jnp.float32)       # (H*B, lq, dv)
    # single fat output projection: (B*lq, H*dv) @ (H*dv, D)
    ctx = ctx.reshape(N_HEADS, batch * lq, D_V)
    ctx_cat = jnp.concatenate([ctx[h] for h in range(N_HEADS)], axis=-1)
    out2d = jnp.dot(ctx_cat, wo, preferred_element_type=jnp.float32)
    # lane-dense packing of the probabilities: rows = (b, q), lanes = (h, k)
    p4 = p.reshape(N_HEADS, batch, lq, lk)
    p_cat = jnp.concatenate(
        [p4[h].reshape(batch * lq, lk) for h in range(N_HEADS)], axis=-1)
    return out2d, p_cat


# ------------------------------ fused kernel ---------------------------------
def _decoder_kernel(x_ref, enc_ref, pe_ref, smask_ref, emask_ref,
                    w_sa_qkv_ref, w_sa_o_ref,
                    w_ea_q_ref, w_ea_kv_ref, w_ea_o_ref,
                    w_ff1_ref, w_ff2_ref, ln_g_ref, ln_b_ref,
                    out_ref, attn_ref):
    B, Ld, D = x_ref.shape
    Le = enc_ref.shape[1]
    scale = 1.0 / math.sqrt(D_K)

    # positional-encoding add (dropout == identity in eval mode)
    x2d = (x_ref[...] + pe_ref[...][None, :, :]).reshape(B * Ld, D)
    enc2d = enc_ref[...].reshape(B * Le, D)

    # additive masks, broadcast over heads ONCE (hoisted out of all loops).
    # NOTE: additive masking matches torch masked_fill(-1e9)+softmax except for
    # fully-masked rows (not present here / not meaningful either way).
    smask = jnp.broadcast_to(smask_ref[...][None], (N_HEADS, B, Ld, Ld)
                             ).reshape(N_HEADS * B, Ld, Ld)
    emask = jnp.broadcast_to(emask_ref[...][None], (N_HEADS, B, Ld, Le)
                             ).reshape(N_HEADS * B, Ld, Le)

    # layer-invariant encoder K/V projection: ONE fused matmul for all layers
    kv_all = jnp.dot(enc2d, w_ea_kv_ref[...], preferred_element_type=jnp.float32)
    enc_k, enc_v = [], []
    for li in range(N_LAYERS):
        base = li * 2 * D
        enc_k.append(_split_heads(kv_all[:, base:base + D], B, Le, D_K))
        enc_v.append(_split_heads(kv_all[:, base + D:base + 2 * D], B, Le, D_V))

    sa_chunks, ea_chunks = [], []
    for li in range(N_LAYERS):
        # ---------------- masked self-attention (fused QKV) ----------------
        res = x2d
        qkv = jnp.dot(x2d, w_sa_qkv_ref[li], preferred_element_type=jnp.float32)
        q_hb = _split_heads(qkv[:, :D], B, Ld, D_K)
        k_hb = _split_heads(qkv[:, D:2 * D], B, Ld, D_K)
        v_hb = _split_heads(qkv[:, 2 * D:], B, Ld, D_V)
        attn_out, p_cat = _mha(q_hb, k_hb, v_hb, smask, w_sa_o_ref[li],
                               B, Ld, Ld, scale)
        sa_chunks.append(p_cat)
        x2d = _layer_norm(attn_out + res)

        # ---------------- encoder-decoder attention ----------------
        res = x2d
        q = jnp.dot(x2d, w_ea_q_ref[li], preferred_element_type=jnp.float32)
        q_hb = _split_heads(q, B, Ld, D_K)
        attn_out, p_cat = _mha(q_hb, enc_k[li], enc_v[li], emask,
                               w_ea_o_ref[li], B, Ld, Le, scale)
        ea_chunks.append(p_cat)
        x2d = _layer_norm(attn_out + res)

        # ---------------- feed-forward + residual + affine LayerNorm --------
        res = x2d
        h1 = jnp.maximum(
            jnp.dot(x2d, w_ff1_ref[li], preferred_element_type=jnp.float32), 0.0)
        y = jnp.dot(h1, w_ff2_ref[li], preferred_element_type=jnp.float32) + res
        x2d = _layer_norm(y) * ln_g_ref[li] + ln_b_ref[li]

    out_ref[...] = x2d
    # ONE lane-dense store of ALL attention probabilities (last dim = 128 here)
    attn_ref[...] = jnp.concatenate(sa_chunks + ea_chunks, axis=-1)


# ------------------------------ model wrappers --------------------------------
def make_positional_encoding():
    position = jnp.arange(MAXLEN, dtype=jnp.float32)[:, None]
    div = jnp.exp(jnp.arange(0, D_MODEL, 2, dtype=jnp.float32)
                  * (-math.log(10000.0) / D_MODEL))
    pe = jnp.zeros((MAXLEN, D_MODEL), jnp.float32)
    pe = pe.at[:, 0::2].set(jnp.sin(position * div))
    pe = pe.at[:, 1::2].set(jnp.cos(position * div))
    return pe


def build_additive_masks(dec_inputs, enc_inputs):
    """(B,Lq,Lk) float additive masks (0 for keep, -1e9 for masked)."""
    B, Ld = dec_inputs.shape
    Le = enc_inputs.shape[1]
    pad_self = (dec_inputs == 0)[:, None, :]                        # (B,1,Ld)
    causal = jnp.triu(jnp.ones((Ld, Ld), jnp.bool_), k=1)[None]     # (1,Ld,Ld)
    self_mask = jnp.logical_or(pad_self, causal)                    # (B,Ld,Ld)
    enc_mask = jnp.broadcast_to((enc_inputs == 0)[:, None, :], (B, Ld, Le))
    smask_add = jnp.where(self_mask, NEG_INF, 0.0).astype(jnp.float32)
    emask_add = jnp.where(enc_mask, NEG_INF, 0.0).astype(jnp.float32)
    return smask_add, emask_add


def init_params(key):
    k_emb, k_lay = jax.random.split(key)
    lk = jax.random.split(k_lay, 7 * N_LAYERS).reshape(N_LAYERS, 7, 2)

    def w(k, shape):
        return 0.15 * jax.random.normal(k, shape, jnp.float32)

    return {
        "emb": jax.random.normal(k_emb, (TRG_VOCAB, D_MODEL), jnp.float32),
        "pe": make_positional_encoding(),
        # per-layer weights stacked along a leading N_LAYERS axis
        "w_sa_qkv": jnp.stack([w(lk[i, 0], (D_MODEL, 3 * D_MODEL))
                               for i in range(N_LAYERS)]),
        "w_sa_o": jnp.stack([w(lk[i, 1], (N_HEADS * D_V, D_MODEL))
                             for i in range(N_LAYERS)]),
        "w_ea_q": jnp.stack([w(lk[i, 2], (D_MODEL, N_HEADS * D_K))
                             for i in range(N_LAYERS)]),
        "w_ea_kv": jnp.stack([w(lk[i, 3], (D_MODEL, 2 * D_MODEL))
                              for i in range(N_LAYERS)]),
        "w_ea_o": jnp.stack([w(lk[i, 4], (N_HEADS * D_V, D_MODEL))
                             for i in range(N_LAYERS)]),
        "w_ff1": jnp.stack([w(lk[i, 5], (D_MODEL, D_FF))
                            for i in range(N_LAYERS)]),
        "w_ff2": jnp.stack([w(lk[i, 6], (D_FF, D_MODEL))
                            for i in range(N_LAYERS)]),
        "ln_g": jnp.ones((N_LAYERS, 1, D_MODEL), jnp.float32),
        "ln_b": jnp.zeros((N_LAYERS, 1, D_MODEL), jnp.float32),
    }


def decoder_forward(dec_inputs, enc_inputs, enc_outputs, params):
    B, Ld = dec_inputs.shape
    Le = enc_inputs.shape[1]

    # Embedding gather + mask construction stay in plain JAX glue.
    x = params["emb"][dec_inputs]                 # (B, Ld, D)
    pe = params["pe"][:Ld]                        # (Ld, D)
    smask_add, emask_add = build_additive_masks(dec_inputs, enc_inputs)

    # Fuse the layer-invariant encoder K/V weights across layers: (D, L*2D)=
    # (32, 128), so the hoisted in-kernel projection is one 128-wide matmul.
    w_ea_kv_all = jnp.transpose(params["w_ea_kv"], (1, 0, 2)).reshape(
        D_MODEL, N_LAYERS * 2 * D_MODEL)

    n_self = N_LAYERS * N_HEADS * Ld
    n_enc = N_LAYERS * N_HEADS * Le
    out_shape = (jax.ShapeDtypeStruct((B * Ld, D_MODEL), jnp.float32),
                 jax.ShapeDtypeStruct((B * Ld, n_self + n_enc), jnp.float32))

    dec2d, attn_slab = pl.pallas_call(
        _decoder_kernel,
        out_shape=out_shape,          # single grid-less invocation, all in VMEM
        compiler_params=pltpu.CompilerParams(vmem_limit_bytes=32 * 1024 * 1024),
    )(x, enc_outputs, pe, smask_add, emask_add,
      params["w_sa_qkv"], params["w_sa_o"],
      params["w_ea_q"], w_ea_kv_all, params["w_ea_o"],
      params["w_ff1"], params["w_ff2"],
      params["ln_g"], params["ln_b"])

    dec_out = dec2d.reshape(B, Ld, D_MODEL)
    # Unpack the lane-packed probabilities: rows = (b, q), lanes = (layer, h, k).
    sa = attn_slab[:, :n_self].reshape(B, Ld, N_LAYERS, N_HEADS, Ld)
    ea = attn_slab[:, n_self:].reshape(B, Ld, N_LAYERS, N_HEADS, Le)
    self_attns = [jnp.transpose(sa[:, :, li], (0, 2, 1, 3))
                  for li in range(N_LAYERS)]
    enc_attns = [jnp.transpose(ea[:, :, li], (0, 2, 1, 3))
                 for li in range(N_LAYERS)]
    return dec_out, self_attns, enc_attns


# --------------------------- pure-JAX reference --------------------------------
def _layer_norm_ref(y, g=None, b=None):
    mean = jnp.mean(y, axis=-1, keepdims=True)
    var = jnp.mean(jnp.square(y - mean), axis=-1, keepdims=True)
    out = (y - mean) * jax.lax.rsqrt(var + LN_EPS)
    return out if g is None else out * g + b


def _mha_ref(q_in, k_in, v_in, mask_add, wq, wk, wv, wo):
    B, Lq, _ = q_in.shape
    Lk = k_in.shape[1]
    q = (q_in @ wq).reshape(B, Lq, N_HEADS, D_K).transpose(0, 2, 1, 3)
    k = (k_in @ wk).reshape(B, Lk, N_HEADS, D_K).transpose(0, 2, 1, 3)
    v = (v_in @ wv).reshape(B, Lk, N_HEADS, D_V).transpose(0, 2, 1, 3)
    s = jnp.einsum('bhqd,bhkd->bhqk', q, k) / math.sqrt(D_K) + mask_add[:, None]
    p = jax.nn.softmax(s, axis=-1)
    ctx = jnp.einsum('bhqk,bhkd->bhqd', p, v).transpose(0, 2, 1, 3)
    ctx = ctx.reshape(B, Lq, N_HEADS * D_V)
    return _layer_norm_ref(ctx @ wo + q_in), p


def decoder_reference(dec_inputs, enc_inputs, enc_outputs, params):
    B, Ld = dec_inputs.shape
    D = D_MODEL
    x = params["emb"][dec_inputs] + params["pe"][:Ld][None]
    smask_add, emask_add = build_additive_masks(dec_inputs, enc_inputs)
    self_attns, enc_attns = [], []
    for li in range(N_LAYERS):
        wqkv = params["w_sa_qkv"][li]
        x, p = _mha_ref(x, x, x, smask_add,
                        wqkv[:, :D], wqkv[:, D:2 * D], wqkv[:, 2 * D:],
                        params["w_sa_o"][li])
        self_attns.append(p)
        wkv = params["w_ea_kv"][li]
        x, p = _mha_ref(x, enc_outputs, enc_outputs, emask_add,
                        params["w_ea_q"][li], wkv[:, :D], wkv[:, D:],
                        params["w_ea_o"][li])
        enc_attns.append(p)
        h = jnp.maximum(x @ params["w_ff1"][li], 0.0)
        x = _layer_norm_ref(h @ params["w_ff2"][li] + x,
                            params["ln_g"][li], params["ln_b"][li])
    return x, self_attns, enc_attns


# ----------------------------------- main ------------------------------------
if __name__ == "__main__":
    key = jax.random.PRNGKey(0)
    k1, k2, k3, kp = jax.random.split(key, 4)

    B, L_DEC, L_ENC = 2, 8, 8
    dec_inputs = jax.random.randint(k1, (B, L_DEC), 1, TRG_VOCAB, dtype=jnp.int32)
    dec_inputs = dec_inputs.at[1, -2:].set(0)        # trailing pad tokens
    enc_inputs = jax.random.randint(k2, (B, L_ENC), 1, TRG_VOCAB, dtype=jnp.int32)
    enc_inputs = enc_inputs.at[0, -1].set(0)         # one pad in the encoder seq
    enc_outputs = jax.random.normal(k3, (B, L_ENC, D_MODEL), jnp.float32)

    params = init_params(kp)

    fwd = jax.jit(decoder_forward)
    dec_out, self_attns, enc_attns = fwd(dec_inputs, enc_inputs, enc_outputs,
                                         params)
    jax.block_until_ready(dec_out)
    jax.block_until_ready(self_attns)
    jax.block_until_ready(enc_attns)

    # shape / sanity checks
    assert dec_out.shape == (B, L_DEC, D_MODEL)
    assert len(self_attns) == N_LAYERS and len(enc_attns) == N_LAYERS
    assert self_attns[0].shape == (B, N_HEADS, L_DEC, L_DEC)
    assert enc_attns[0].shape == (B, N_HEADS, L_DEC, L_ENC)
    assert bool(jnp.all(jnp.isfinite(dec_out)))
    # exact softmax -> rows sum to 1 tightly
    for li in range(N_LAYERS):
        assert bool(jnp.allclose(jnp.sum(self_attns[li], axis=-1), 1.0, atol=1e-3))
        assert bool(jnp.allclose(jnp.sum(enc_attns[li], axis=-1), 1.0, atol=1e-3))

    # Parity with a pure-JAX reference of the same module (loose tolerance:
    # default TPU matmul precision differs between the fused kernel matmul
    # shapes and the XLA reference; layout bugs would be O(1) errors).
    ref_out, ref_sa, ref_ea = decoder_reference(dec_inputs, enc_inputs,
                                                enc_outputs, params)
    assert bool(jnp.allclose(dec_out, ref_out, atol=1e-1)), \
        float(jnp.max(jnp.abs(dec_out - ref_out)))
    for li in range(N_LAYERS):
        assert bool(jnp.allclose(self_attns[li], ref_sa[li], atol=5e-2))
        assert bool(jnp.allclose(enc_attns[li], ref_ea[li], atol=5e-2))

    print("KERNEL_OK")
</pallas_src>

<mosaic_0001>
module attributes {stable_mosaic.version = 11 : i64} {
  func.func @_decoder_kernel(%arg0: memref<2x8x32xf32, #tpu.memory_space<vmem>>, %arg1: memref<2x8x32xf32, #tpu.memory_space<vmem>>, %arg2: memref<8x32xf32, #tpu.memory_space<vmem>>, %arg3: memref<2x8x8xf32, #tpu.memory_space<vmem>>, %arg4: memref<2x8x8xf32, #tpu.memory_space<vmem>>, %arg5: memref<2x32x96xf32, #tpu.memory_space<vmem>>, %arg6: memref<2x32x32xf32, #tpu.memory_space<vmem>>, %arg7: memref<2x32x32xf32, #tpu.memory_space<vmem>>, %arg8: memref<32x128xf32, #tpu.memory_space<vmem>>, %arg9: memref<2x32x32xf32, #tpu.memory_space<vmem>>, %arg10: memref<2x32x128xf32, #tpu.memory_space<vmem>>, %arg11: memref<2x128x32xf32, #tpu.memory_space<vmem>>, %arg12: memref<2x1x32xf32, #tpu.memory_space<vmem>>, %arg13: memref<2x1x32xf32, #tpu.memory_space<vmem>>, %arg14: memref<16x32xf32, #tpu.memory_space<vmem>>, %arg15: memref<16x128xf32, #tpu.memory_space<vmem>>) attributes {dimension_semantics = [], scalar_prefetch = 0 : i64, scratch_operands = 0 : i64, tpu.core_type = #tpu.core_type<tc>} {
    %c0 = arith.constant 0 : index
    %c0_0 = arith.constant 0 : index
    %c0_1 = arith.constant 0 : index
    %0 = vector.load %arg0[%c0, %c0_0, %c0_1] : memref<2x8x32xf32, #tpu.memory_space<vmem>>, vector<2x8x32xf32>
    %c0_2 = arith.constant 0 : index
    %c0_3 = arith.constant 0 : index
    %1 = vector.load %arg2[%c0_2, %c0_3] : memref<8x32xf32, #tpu.memory_space<vmem>>, vector<8x32xf32>
    %2 = vector.shape_cast %1 : vector<8x32xf32> to vector<1x8x32xf32>
    %3 = vector.broadcast %2 : vector<1x8x32xf32> to vector<2x8x32xf32>
    %4 = arith.addf %0, %3 : vector<2x8x32xf32>
    %5 = vector.shape_cast %4 : vector<2x8x32xf32> to vector<16x32xf32>
    %c0_4 = arith.constant 0 : index
    %c0_5 = arith.constant 0 : index
    %c0_6 = arith.constant 0 : index
    %6 = vector.load %arg1[%c0_4, %c0_5, %c0_6] : memref<2x8x32xf32, #tpu.memory_space<vmem>>, vector<2x8x32xf32>
    %7 = vector.shape_cast %6 : vector<2x8x32xf32> to vector<16x32xf32>
    %c0_7 = arith.constant 0 : index
    %c0_8 = arith.constant 0 : index
    %c0_9 = arith.constant 0 : index
    %8 = vector.load %arg3[%c0_7, %c0_8, %c0_9] : memref<2x8x8xf32, #tpu.memory_space<vmem>>, vector<2x8x8xf32>
    %9 = vector.shape_cast %8 : vector<2x8x8xf32> to vector<1x2x8x8xf32>
    %10 = vector.shape_cast %9 : vector<1x2x8x8xf32> to vector<1x2x8x8xf32>
    %11 = vector.broadcast %10 : vector<1x2x8x8xf32> to vector<4x2x8x8xf32>
    %12 = vector.shape_cast %11 : vector<4x2x8x8xf32> to vector<8x8x8xf32>
    %c0_10 = arith.constant 0 : index
    %c0_11 = arith.constant 0 : index
    %c0_12 = arith.constant 0 : index
    %13 = vector.load %arg4[%c0_10, %c0_11, %c0_12] : memref<2x8x8xf32, #tpu.memory_space<vmem>>, vector<2x8x8xf32>
    %14 = vector.shape_cast %13 : vector<2x8x8xf32> to vector<1x2x8x8xf32>
    %15 = vector.shape_cast %14 : vector<1x2x8x8xf32> to vector<1x2x8x8xf32>
    %16 = vector.broadcast %15 : vector<1x2x8x8xf32> to vector<4x2x8x8xf32>
    %17 = vector.shape_cast %16 : vector<4x2x8x8xf32> to vector<8x8x8xf32>
    %c0_13 = arith.constant 0 : index
    %c0_14 = arith.constant 0 : index
    %18 = vector.load %arg8[%c0_13, %c0_14] : memref<32x128xf32, #tpu.memory_space<vmem>>, vector<32x128xf32>
    %cst = arith.constant dense<0.000000e+00> : vector<16x128xf32>
    %19 = tpu.matmul %7, %18, %cst {dimension_numbers = #tpu.dot_dimension_numbers<[1], [0], [0], [1], [0, 0, 1, 1], [], []>} : vector<16x32xf32>, vector<32x128xf32>, vector<16x128xf32> -> vector<16x128xf32>
    %20 = vector.extract_strided_slice %19 {offsets = [0, 0], sizes = [16, 32], strides = [1, 1]} : vector<16x128xf32> to vector<16x32xf32>
    %21 = vector.extract_strided_slice %20 {offsets = [0, 0], sizes = [16, 8], strides = [1, 1]} : vector<16x32xf32> to vector<16x8xf32>
    %22 = vector.extract_strided_slice %20 {offsets = [0, 8], sizes = [16, 8], strides = [1, 1]} : vector<16x32xf32> to vector<16x8xf32>
    %23 = vector.extract_strided_slice %20 {offsets = [0, 16], sizes = [16, 8], strides = [1, 1]} : vector<16x32xf32> to vector<16x8xf32>
    %24 = vector.extract_strided_slice %20 {offsets = [0, 24], sizes = [16, 8], strides = [1, 1]} : vector<16x32xf32> to vector<16x8xf32>
    %25 = vector.shape_cast %21 : vector<16x8xf32> to vector<1x16x8xf32>
    %26 = vector.shape_cast %22 : vector<16x8xf32> to vector<1x16x8xf32>
    %27 = vector.shape_cast %23 : vector<16x8xf32> to vector<1x16x8xf32>
    %28 = vector.shape_cast %24 : vector<16x8xf32> to vector<1x16x8xf32>
    %29 = tpu.concatenate %25, %26, %27, %28 in 0 : vector<1x16x8xf32>, vector<1x16x8xf32>, vector<1x16x8xf32>, vector<1x16x8xf32> -> vector<4x16x8xf32>
    %30 = vector.shape_cast %29 : vector<4x16x8xf32> to vector<8x8x8xf32>
    %31 = vector.extract_strided_slice %19 {offsets = [0, 32], sizes = [16, 32], strides = [1, 1]} : vector<16x128xf32> to vector<16x32xf32>
    %32 = vector.extract_strided_slice %31 {offsets = [0, 0], sizes = [16, 8], strides = [1, 1]} : vector<16x32xf32> to vector<16x8xf32>
    %33 = vector.extract_strided_slice %31 {offsets = [0, 8], sizes = [16, 8], strides = [1, 1]} : vector<16x32xf32> to vector<16x8xf32>
    %34 = vector.extract_strided_slice %31 {offsets = [0, 16], sizes = [16, 8], strides = [1, 1]} : vector<16x32xf32> to vector<16x8xf32>
    %35 = vector.extract_strided_slice %31 {offsets = [0, 24], sizes = [16, 8], strides = [1, 1]} : vector<16x32xf32> to vector<16x8xf32>
    %36 = vector.shape_cast %32 : vector<16x8xf32> to vector<1x16x8xf32>
    %37 = vector.shape_cast %33 : vector<16x8xf32> to vector<1x16x8xf32>
    %38 = vector.shape_cast %34 : vector<16x8xf32> to vector<1x16x8xf32>
    %39 = vector.shape_cast %35 : vector<16x8xf32> to vector<1x16x8xf32>
    %40 = tpu.concatenate %36, %37, %38, %39 in 0 : vector<1x16x8xf32>, vector<1x16x8xf32>, vector<1x16x8xf32>, vector<1x16x8xf32> -> vector<4x16x8xf32>
    %41 = vector.shape_cast %40 : vector<4x16x8xf32> to vector<8x8x8xf32>
    %42 = vector.extract_strided_slice %19 {offsets = [0, 64], sizes = [16, 32], strides = [1, 1]} : vector<16x128xf32> to vector<16x32xf32>
    %43 = vector.extract_strided_slice %42 {offsets = [0, 0], sizes = [16, 8], strides = [1, 1]} : vector<16x32xf32> to vector<16x8xf32>
    %44 = vector.extract_strided_slice %42 {offsets = [0, 8], sizes = [16, 8], strides = [1, 1]} : vector<16x32xf32> to vector<16x8xf32>
    %45 = vector.extract_strided_slice %42 {offsets = [0, 16], sizes = [16, 8], strides = [1, 1]} : vector<16x32xf32> to vector<16x8xf32>
    %46 = vector.extract_strided_slice %42 {offsets = [0, 24], sizes = [16, 8], strides = [1, 1]} : vector<16x32xf32> to vector<16x8xf32>
    %47 = vector.shape_cast %43 : vector<16x8xf32> to vector<1x16x8xf32>
    %48 = vector.shape_cast %44 : vector<16x8xf32> to vector<1x16x8xf32>
    %49 = vector.shape_cast %45 : vector<16x8xf32> to vector<1x16x8xf32>
    %50 = vector.shape_cast %46 : vector<16x8xf32> to vector<1x16x8xf32>
    %51 = tpu.concatenate %47, %48, %49, %50 in 0 : vector<1x16x8xf32>, vector<1x16x8xf32>, vector<1x16x8xf32>, vector<1x16x8xf32> -> vector<4x16x8xf32>
    %52 = vector.shape_cast %51 : vector<4x16x8xf32> to vector<8x8x8xf32>
    %53 = vector.extract_strided_slice %19 {offsets = [0, 96], sizes = [16, 32], strides = [1, 1]} : vector<16x128xf32> to vector<16x32xf32>
    %54 = vector.extract_strided_slice %53 {offsets = [0, 0], sizes = [16, 8], strides = [1, 1]} : vector<16x32xf32> to vector<16x8xf32>
    %55 = vector.extract_strided_slice %53 {offsets = [0, 8], sizes = [16, 8], strides = [1, 1]} : vector<16x32xf32> to vector<16x8xf32>
    %56 = vector.extract_strided_slice %53 {offsets = [0, 16], sizes = [16, 8], strides = [1, 1]} : vector<16x32xf32> to vector<16x8xf32>
    %57 = vector.extract_strided_slice %53 {offsets = [0, 24], sizes = [16, 8], strides = [1, 1]} : vector<16x32xf32> to vector<16x8xf32>
    %58 = vector.shape_cast %54 : vector<16x8xf32> to vector<1x16x8xf32>
    %59 = vector.shape_cast %55 : vector<16x8xf32> to vector<1x16x8xf32>
    %60 = vector.shape_cast %56 : vector<16x8xf32> to vector<1x16x8xf32>
    %61 = vector.shape_cast %57 : vector<16x8xf32> to vector<1x16x8xf32>
    %62 = tpu.concatenate %58, %59, %60, %61 in 0 : vector<1x16x8xf32>, vector<1x16x8xf32>, vector<1x16x8xf32>, vector<1x16x8xf32> -> vector<4x16x8xf32>
    %63 = vector.shape_cast %62 : vector<4x16x8xf32> to vector<8x8x8xf32>
    %c0_15 = arith.constant 0 : index
    %c0_16 = arith.constant 0 : index
    %c0_17 = arith.constant 0 : index
    %64 = vector.load %arg5[%c0_15, %c0_16, %c0_17] : memref<2x32x96xf32, #tpu.memory_space<vmem>>, vector<1x32x96xf32>
    %65 = vector.shape_cast %64 : vector<1x32x96xf32> to vector<32x96xf32>
    %cst_18 = arith.constant dense<0.000000e+00> : vector<16x96xf32>
    %66 = tpu.matmul %5, %65, %cst_18 {dimension_numbers = #tpu.dot_dimension_numbers<[1], [0], [0], [1], [0, 0, 1, 1], [], []>} : vector<16x32xf32>, vector<32x96xf32>, vector<16x96xf32> -> vector<16x96xf32>
    %67 = vector.extract_strided_slice %66 {offsets = [0, 0], sizes = [16, 32], strides = [1, 1]} : vector<16x96xf32> to vector<16x32xf32>
    %68 = vector.extract_strided_slice %67 {offsets = [0, 0], sizes = [16, 8], strides = [1, 1]} : vector<16x32xf32> to vector<16x8xf32>
    %69 = vector.extract_strided_slice %67 {offsets = [0, 8], sizes = [16, 8], strides = [1, 1]} : vector<16x32xf32> to vector<16x8xf32>
    %70 = vector.extract_strided_slice %67 {offsets = [0, 16], sizes = [16, 8], strides = [1, 1]} : vector<16x32xf32> to vector<16x8xf32>
    %71 = vector.extract_strided_slice %67 {offsets = [0, 24], sizes = [16, 8], strides = [1, 1]} : vector<16x32xf32> to vector<16x8xf32>
    %72 = vector.shape_cast %68 : vector<16x8xf32> to vector<1x16x8xf32>
    %73 = vector.shape_cast %69 : vector<16x8xf32> to vector<1x16x8xf32>
    %74 = vector.shape_cast %70 : vector<16x8xf32> to vector<1x16x8xf32>
    %75 = vector.shape_cast %71 : vector<16x8xf32> to vector<1x16x8xf32>
    %76 = tpu.concatenate %72, %73, %74, %75 in 0 : vector<1x16x8xf32>, vector<1x16x8xf32>, vector<1x16x8xf32>, vector<1x16x8xf32> -> vector<4x16x8xf32>
    %77 = vector.shape_cast %76 : vector<4x16x8xf32> to vector<8x8x8xf32>
    %78 = vector.extract_strided_slice %66 {offsets = [0, 32], sizes = [16, 32], strides = [1, 1]} : vector<16x96xf32> to vector<16x32xf32>
    %79 = vector.extract_strided_slice %78 {offsets = [0, 0], sizes = [16, 8], strides = [1, 1]} : vector<16x32xf32> to vector<16x8xf32>
    %80 = vector.extract_strided_slice %78 {offsets = [0, 8], sizes = [16, 8], strides = [1, 1]} : vector<16x32xf32> to vector<16x8xf32>
    %81 = vector.extract_strided_slice %78 {offsets = [0, 16], sizes = [16, 8], strides = [1, 1]} : vector<16x32xf32> to vector<16x8xf32>
    %82 = vector.extract_strided_slice %78 {offsets = [0, 24], sizes = [16, 8], strides = [1, 1]} : vector<16x32xf32> to vector<16x8xf32>
    %83 = vector.shape_cast %79 : vector<16x8xf32> to vector<1x16x8xf32>
    %84 = vector.shape_cast %80 : vector<16x8xf32> to vector<1x16x8xf32>
    %85 = vector.shape_cast %81 : vector<16x8xf32> to vector<1x16x8xf32>
    %86 = vector.shape_cast %82 : vector<16x8xf32> to vector<1x16x8xf32>
    %87 = tpu.concatenate %83, %84, %85, %86 in 0 : vector<1x16x8xf32>, vector<1x16x8xf32>, vector<1x16x8xf32>, vector<1x16x8xf32> -> vector<4x16x8xf32>
    %88 = vector.shape_cast %87 : vector<4x16x8xf32> to vector<8x8x8xf32>
    %89 = vector.extract_strided_slice %66 {offsets = [0, 64], sizes = [16, 32], strides = [1, 1]} : vector<16x96xf32> to vector<16x32xf32>
    %90 = vector.extract_strided_slice %89 {offsets = [0, 0], sizes = [16, 8], strides = [1, 1]} : vector<16x32xf32> to vector<16x8xf32>
    %91 = vector.extract_strided_slice %89 {offsets = [0, 8], sizes = [16, 8], strides = [1, 1]} : vector<16x32xf32> to vector<16x8xf32>
    %92 = vector.extract_strided_slice %89 {offsets = [0, 16], sizes = [16, 8], strides = [1, 1]} : vector<16x32xf32> to vector<16x8xf32>
    %93 = vector.extract_strided_slice %89 {offsets = [0, 24], sizes = [16, 8], strides = [1, 1]} : vector<16x32xf32> to vector<16x8xf32>
    %94 = vector.shape_cast %90 : vector<16x8xf32> to vector<1x16x8xf32>
    %95 = vector.shape_cast %91 : vector<16x8xf32> to vector<1x16x8xf32>
    %96 = vector.shape_cast %92 : vector<16x8xf32> to vector<1x16x8xf32>
    %97 = vector.shape_cast %93 : vector<16x8xf32> to vector<1x16x8xf32>
    %98 = tpu.concatenate %94, %95, %96, %97 in 0 : vector<1x16x8xf32>, vector<1x16x8xf32>, vector<1x16x8xf32>, vector<1x16x8xf32> -> vector<4x16x8xf32>
    %99 = vector.shape_cast %98 : vector<4x16x8xf32> to vector<8x8x8xf32>
    %c0_19 = arith.constant 0 : index
    %c0_20 = arith.constant 0 : index
    %c0_21 = arith.constant 0 : index
    %100 = vector.load %arg6[%c0_19, %c0_20, %c0_21] : memref<2x32x32xf32, #tpu.memory_space<vmem>>, vector<1x32x32xf32>
    %101 = vector.shape_cast %100 : vector<1x32x32xf32> to vector<32x32xf32>
    "tpu.trace_start"() <{level = 10 : i32, message = "bqd,bkd->bqk"}> : () -> ()
    %cst_22 = arith.constant dense<0.000000e+00> : vector<8x8x8xf32>
    %102 = tpu.matmul %77, %88, %cst_22 {dimension_numbers = #tpu.dot_dimension_numbers<[2], [2], [1], [1], [0, 0, 0, 1, 1, 1], [0], [0]>} : vector<8x8x8xf32>, vector<8x8x8xf32>, vector<8x8x8xf32> -> vector<8x8x8xf32>
    "tpu.trace_stop"() : () -> ()
    %cst_23 = arith.constant 0.353553385 : f32
    %103 = vector.broadcast %cst_23 : f32 to vector<8x8x8xf32>
    %104 = arith.mulf %102, %103 : vector<8x8x8xf32>
    %105 = arith.addf %104, %12 : vector<8x8x8xf32>
    %cst_24 = arith.constant dense<0xFF800000> : vector<8x8xf32>
    %106 = vector.multi_reduction <maximumf>, %105, %cst_24 [2] : vector<8x8x8xf32> to vector<8x8xf32>
    %107 = vector.shape_cast %106 : vector<8x8xf32> to vector<8x8x1xf32>
    %108 = vector.broadcast %107 : vector<8x8x1xf32> to vector<8x8x8xf32>
    %109 = arith.subf %105, %108 : vector<8x8x8xf32>
    %110 = math.exp %109 : vector<8x8x8xf32>
    %cst_25 = arith.constant dense<0.000000e+00> : vector<8x8xf32>
    %111 = vector.multi_reduction <add>, %110, %cst_25 [2] : vector<8x8x8xf32> to vector<8x8xf32>
    %112 = vector.shape_cast %111 : vector<8x8xf32> to vector<8x8x1xf32>
    %113 = vector.broadcast %112 : vector<8x8x1xf32> to vector<8x8x8xf32>
    %114 = arith.divf %110, %113 : vector<8x8x8xf32>
    "tpu.trace_start"() <{level = 10 : i32, message = "bqk,bkd->bqd"}> : () -> ()
    %cst_26 = arith.constant dense<0.000000e+00> : vector<8x8x8xf32>
    %115 = tpu.matmul %114, %99, %cst_26 {dimension_numbers = #tpu.dot_dimension_numbers<[2], [1], [1], [2], [0, 0, 0, 1, 1, 2], [0], [0]>} : vector<8x8x8xf32>, vector<8x8x8xf32>, vector<8x8x8xf32> -> vector<8x8x8xf32>
    "tpu.trace_stop"() : () -> ()
    %116 = vector.shape_cast %115 : vector<8x8x8xf32> to vector<4x16x8xf32>
    %117 = vector.extract_strided_slice %116 {offsets = [0, 0, 0], sizes = [1, 16, 8], strides = [1, 1, 1]} : vector<4x16x8xf32> to vector<1x16x8xf32>
    %118 = vector.shape_cast %117 : vector<1x16x8xf32> to vector<16x8xf32>
    %119 = vector.extract_strided_slice %116 {offsets = [1, 0, 0], sizes = [1, 16, 8], strides = [1, 1, 1]} : vector<4x16x8xf32> to vector<1x16x8xf32>
    %120 = vector.shape_cast %119 : vector<1x16x8xf32> to vector<16x8xf32>
    %121 = vector.extract_strided_slice %116 {offsets = [2, 0, 0], sizes = [1, 16, 8], strides = [1, 1, 1]} : vector<4x16x8xf32> to vector<1x16x8xf32>
    %122 = vector.shape_cast %121 : vector<1x16x8xf32> to vector<16x8xf32>
    %123 = vector.extract_strided_slice %116 {offsets = [3, 0, 0], sizes = [1, 16, 8], strides = [1, 1, 1]} : vector<4x16x8xf32> to vector<1x16x8xf32>
    %124 = vector.shape_cast %123 : vector<1x16x8xf32> to vector<16x8xf32>
    %125 = tpu.concatenate %118, %120, %122, %124 in 1 : vector<16x8xf32>, vector<16x8xf32>, vector<16x8xf32>, vector<16x8xf32> -> vector<16x32xf32>
    %cst_27 = arith.constant dense<0.000000e+00> : vector<16x32xf32>
    %126 = tpu.matmul %125, %101, %cst_27 {dimension_numbers = #tpu.dot_dimension_numbers<[1], [0], [0], [1], [0, 0, 1, 1], [], []>} : vector<16x32xf32>, vector<32x32xf32>, vector<16x32xf32> -> vector<16x32xf32>
    %127 = vector.shape_cast %114 : vector<8x8x8xf32> to vector<4x2x8x8xf32>
    %128 = vector.extract_strided_slice %127 {offsets = [0, 0, 0, 0], sizes = [1, 2, 8, 8], strides = [1, 1, 1, 1]} : vector<4x2x8x8xf32> to vector<1x2x8x8xf32>
    %129 = vector.shape_cast %128 : vector<1x2x8x8xf32> to vector<2x8x8xf32>
    %130 = vector.shape_cast %129 : vector<2x8x8xf32> to vector<16x8xf32>
    %131 = vector.extract_strided_slice %127 {offsets = [1, 0, 0, 0], sizes = [1, 2, 8, 8], strides = [1, 1, 1, 1]} : vector<4x2x8x8xf32> to vector<1x2x8x8xf32>
    %132 = vector.shape_cast %131 : vector<1x2x8x8xf32> to vector<2x8x8xf32>
    %133 = vector.shape_cast %132 : vector<2x8x8xf32> to vector<16x8xf32>
    %134 = vector.extract_strided_slice %127 {offsets = [2, 0, 0, 0], sizes = [1, 2, 8, 8], strides = [1, 1, 1, 1]} : vector<4x2x8x8xf32> to vector<1x2x8x8xf32>
    %135 = vector.shape_cast %134 : vector<1x2x8x8xf32> to vector<2x8x8xf32>
    %136 = vector.shape_cast %135 : vector<2x8x8xf32> to vector<16x8xf32>
    %137 = vector.extract_strided_slice %127 {offsets = [3, 0, 0, 0], sizes = [1, 2, 8, 8], strides = [1, 1, 1, 1]} : vector<4x2x8x8xf32> to vector<1x2x8x8xf32>
    %138 = vector.shape_cast %137 : vector<1x2x8x8xf32> to vector<2x8x8xf32>
    %139 = vector.shape_cast %138 : vector<2x8x8xf32> to vector<16x8xf32>
    %140 = tpu.concatenate %130, %133, %136, %139 in 1 : vector<16x8xf32>, vector<16x8xf32>, vector<16x8xf32>, vector<16x8xf32> -> vector<16x32xf32>
    %141 = arith.addf %126, %5 : vector<16x32xf32>
    %cst_28 = arith.constant dense<0.000000e+00> : vector<16xf32>
    %142 = vector.multi_reduction <add>, %141, %cst_28 [1] : vector<16x32xf32> to vector<16xf32>
    %143 = vector.shape_cast %142 : vector<16xf32> to vector<16x1xf32>
    %cst_29 = arith.constant 3.200000e+01 : f32
    %144 = vector.broadcast %cst_29 : f32 to vector<16x1xf32>
    %145 = arith.divf %143, %144 : vector<16x1xf32>
    %146 = vector.broadcast %145 : vector<16x1xf32> to vector<16x32xf32>
    %147 = arith.subf %141, %146 : vector<16x32xf32>
    %148 = arith.mulf %147, %147 : vector<16x32xf32>
    %cst_30 = arith.constant dense<0.000000e+00> : vector<16xf32>
    %149 = vector.multi_reduction <add>, %148, %cst_30 [1] : vector<16x32xf32> to vector<16xf32>
    %150 = vector.shape_cast %149 : vector<16xf32> to vector<16x1xf32>
    %cst_31 = arith.constant 3.200000e+01 : f32
    %151 = vector.broadcast %cst_31 : f32 to vector<16x1xf32>
    %152 = arith.divf %150, %151 : vector<16x1xf32>
    %153 = vector.broadcast %145 : vector<16x1xf32> to vector<16x32xf32>
    %154 = arith.subf %141, %153 : vector<16x32xf32>
    %cst_32 = arith.constant 9.99999974E-6 : f32
    %155 = vector.broadcast %cst_32 : f32 to vector<16x1xf32>
    %156 = arith.addf %152, %155 : vector<16x1xf32>
    %157 = math.rsqrt %156 : vector<16x1xf32>
    %158 = vector.broadcast %157 : vector<16x1xf32> to vector<16x32xf32>
    %159 = arith.mulf %154, %158 : vector<16x32xf32>
    %c0_33 = arith.constant 0 : index
    %c0_34 = arith.constant 0 : index
    %c0_35 = arith.constant 0 : index
    %160 = vector.load %arg7[%c0_33, %c0_34, %c0_35] : memref<2x32x32xf32, #tpu.memory_space<vmem>>, vector<1x32x32xf32>
    %161 = vector.shape_cast %160 : vector<1x32x32xf32> to vector<32x32xf32>
    %cst_36 = arith.constant dense<0.000000e+00> : vector<16x32xf32>
    %162 = tpu.matmul %159, %161, %cst_36 {dimension_numbers = #tpu.dot_dimension_numbers<[1], [0], [0], [1], [0, 0, 1, 1], [], []>} : vector<16x32xf32>, vector<32x32xf32>, vector<16x32xf32> -> vector<16x32xf32>
    %163 = vector.extract_strided_slice %162 {offsets = [0, 0], sizes = [16, 8], strides = [1, 1]} : vector<16x32xf32> to vector<16x8xf32>
    %164 = vector.extract_strided_slice %162 {offsets = [0, 8], sizes = [16, 8], strides = [1, 1]} : vector<16x32xf32> to vector<16x8xf32>
    %165 = vector.extract_strided_slice %162 {offsets = [0, 16], sizes = [16, 8], strides = [1, 1]} : vector<16x32xf32> to vector<16x8xf32>
    %166 = vector.extract_strided_slice %162 {offsets = [0, 24], sizes = [16, 8], strides = [1, 1]} : vector<16x32xf32> to vector<16x8xf32>
    %167 = vector.shape_cast %163 : vector<16x8xf32> to vector<1x16x8xf32>
    %168 = vector.shape_cast %164 : vector<16x8xf32> to vector<1x16x8xf32>
    %169 = vector.shape_cast %165 : vector<16x8xf32> to vector<1x16x8xf32>
    %170 = vector.shape_cast %166 : vector<16x8xf32> to vector<1x16x8xf32>
    %171 = tpu.concatenate %167, %168, %169, %170 in 0 : vector<1x16x8xf32>, vector<1x16x8xf32>, vector<1x16x8xf32>, vector<1x16x8xf32> -> vector<4x16x8xf32>
    %172 = vector.shape_cast %171 : vector<4x16x8xf32> to vector<8x8x8xf32>
    %c0_37 = arith.constant 0 : index
    %c0_38 = arith.constant 0 : index
    %c0_39 = arith.constant 0 : index
    %173 = vector.load %arg9[%c0_37, %c0_38, %c0_39] : memref<2x32x32xf32, #tpu.memory_space<vmem>>, vector<1x32x32xf32>
    %174 = vector.shape_cast %173 : vector<1x32x32xf32> to vector<32x32xf32>
    "tpu.trace_start"() <{level = 10 : i32, message = "bqd,bkd->bqk"}> : () -> ()
    %cst_40 = arith.constant dense<0.000000e+00> : vector<8x8x8xf32>
    %175 = tpu.matmul %172, %30, %cst_40 {dimension_numbers = #tpu.dot_dimension_numbers<[2], [2], [1], [1], [0, 0, 0, 1, 1, 1], [0], [0]>} : vector<8x8x8xf32>, vector<8x8x8xf32>, vector<8x8x8xf32> -> vector<8x8x8xf32>
    "tpu.trace_stop"() : () -> ()
    %cst_41 = arith.constant 0.353553385 : f32
    %176 = vector.broadcast %cst_41 : f32 to vector<8x8x8xf32>
    %177 = arith.mulf %175, %176 : vector<8x8x8xf32>
    %178 = arith.addf %177, %17 : vector<8x8x8xf32>
    %cst_42 = arith.constant dense<0xFF800000> : vector<8x8xf32>
    %179 = vector.multi_reduction <maximumf>, %178, %cst_42 [2] : vector<8x8x8xf32> to vector<8x8xf32>
    %180 = vector.shape_cast %179 : vector<8x8xf32> to vector<8x8x1xf32>
    %181 = vector.broadcast %180 : vector<8x8x1xf32> to vector<8x8x8xf32>
    %182 = arith.subf %178, %181 : vector<8x8x8xf32>
    %183 = math.exp %182 : vector<8x8x8xf32>
    %cst_43 = arith.constant dense<0.000000e+00> : vector<8x8xf32>
    %184 = vector.multi_reduction <add>, %183, %cst_43 [2] : vector<8x8x8xf32> to vector<8x8xf32>
    %185 = vector.shape_cast %184 : vector<8x8xf32> to vector<8x8x1xf32>
    %186 = vector.broadcast %185 : vector<8x8x1xf32> to vector<8x8x8xf32>
    %187 = arith.divf %183, %186 : vector<8x8x8xf32>
    "tpu.trace_start"() <{level = 10 : i32, message = "bqk,bkd->bqd"}> : () -> ()
    %cst_44 = arith.constant dense<0.000000e+00> : vector<8x8x8xf32>
    %188 = tpu.matmul %187, %41, %cst_44 {dimension_numbers = #tpu.dot_dimension_numbers<[2], [1], [1], [2], [0, 0, 0, 1, 1, 2], [0], [0]>} : vector<8x8x8xf32>, vector<8x8x8xf32>, vector<8x8x8xf32> -> vector<8x8x8xf32>
    "tpu.trace_stop"() : () -> ()
    %189 = vector.shape_cast %188 : vector<8x8x8xf32> to vector<4x16x8xf32>
    %190 = vector.extract_strided_slice %189 {offsets = [0, 0, 0], sizes = [1, 16, 8], strides = [1, 1, 1]} : vector<4x16x8xf32> to vector<1x16x8xf32>
    %191 = vector.shape_cast %190 : vector<1x16x8xf32> to vector<16x8xf32>
    %192 = vector.extract_strided_slice %189 {offsets = [1, 0, 0], sizes = [1, 16, 8], strides = [1, 1, 1]} : vector<4x16x8xf32> to vector<1x16x8xf32>
    %193 = vector.shape_cast %192 : vector<1x16x8xf32> to vector<16x8xf32>
    %194 = vector.extract_strided_slice %189 {offsets = [2, 0, 0], sizes = [1, 16, 8], strides = [1, 1, 1]} : vector<4x16x8xf32> to vector<1x16x8xf32>
    %195 = vector.shape_cast %194 : vector<1x16x8xf32> to vector<16x8xf32>
    %196 = vector.extract_strided_slice %189 {offsets = [3, 0, 0], sizes = [1, 16, 8], strides = [1, 1, 1]} : vector<4x16x8xf32> to vector<1x16x8xf32>
    %197 = vector.shape_cast %196 : vector<1x16x8xf32> to vector<16x8xf32>
    %198 = tpu.concatenate %191, %193, %195, %197 in 1 : vector<16x8xf32>, vector<16x8xf32>, vector<16x8xf32>, vector<16x8xf32> -> vector<16x32xf32>
    %cst_45 = arith.constant dense<0.000000e+00> : vector<16x32xf32>
    %199 = tpu.matmul %198, %174, %cst_45 {dimension_numbers = #tpu.dot_dimension_numbers<[1], [0], [0], [1], [0, 0, 1, 1], [], []>} : vector<16x32xf32>, vector<32x32xf32>, vector<16x32xf32> -> vector<16x32xf32>
    %200 = vector.shape_cast %187 : vector<8x8x8xf32> to vector<4x2x8x8xf32>
    %201 = vector.extract_strided_slice %200 {offsets = [0, 0, 0, 0], sizes = [1, 2, 8, 8], strides = [1, 1, 1, 1]} : vector<4x2x8x8xf32> to vector<1x2x8x8xf32>
    %202 = vector.shape_cast %201 : vector<1x2x8x8xf32> to vector<2x8x8xf32>
    %203 = vector.shape_cast %202 : vector<2x8x8xf32> to vector<16x8xf32>
    %204 = vector.extract_strided_slice %200 {offsets = [1, 0, 0, 0], sizes = [1, 2, 8, 8], strides = [1, 1, 1, 1]} : vector<4x2x8x8xf32> to vector<1x2x8x8xf32>
    %205 = vector.shape_cast %204 : vector<1x2x8x8xf32> to vector<2x8x8xf32>
    %206 = vector.shape_cast %205 : vector<2x8x8xf32> to vector<16x8xf32>
    %207 = vector.extract_strided_slice %200 {offsets = [2, 0, 0, 0], sizes = [1, 2, 8, 8], strides = [1, 1, 1, 1]} : vector<4x2x8x8xf32> to vector<1x2x8x8xf32>
    %208 = vector.shape_cast %207 : vector<1x2x8x8xf32> to vector<2x8x8xf32>
    %209 = vector.shape_cast %208 : vector<2x8x8xf32> to vector<16x8xf32>
    %210 = vector.extract_strided_slice %200 {offsets = [3, 0, 0, 0], sizes = [1, 2, 8, 8], strides = [1, 1, 1, 1]} : vector<4x2x8x8xf32> to vector<1x2x8x8xf32>
    %211 = vector.shape_cast %210 : vector<1x2x8x8xf32> to vector<2x8x8xf32>
    %212 = vector.shape_cast %211 : vector<2x8x8xf32> to vector<16x8xf32>
    %213 = tpu.concatenate %203, %206, %209, %212 in 1 : vector<16x8xf32>, vector<16x8xf32>, vector<16x8xf32>, vector<16x8xf32> -> vector<16x32xf32>
    %214 = arith.addf %199, %159 : vector<16x32xf32>
    %cst_46 = arith.constant dense<0.000000e+00> : vector<16xf32>
    %215 = vector.multi_reduction <add>, %214, %cst_46 [1] : vector<16x32xf32> to vector<16xf32>
    %216 = vector.shape_cast %215 : vector<16xf32> to vector<16x1xf32>
    %cst_47 = arith.constant 3.200000e+01 : f32
    %217 = vector.broadcast %cst_47 : f32 to vector<16x1xf32>
    %218 = arith.divf %216, %217 : vector<16x1xf32>
    %219 = vector.broadcast %218 : vector<16x1xf32> to vector<16x32xf32>
    %220 = arith.subf %214, %219 : vector<16x32xf32>
    %221 = arith.mulf %220, %220 : vector<16x32xf32>
    %cst_48 = arith.constant dense<0.000000e+00> : vector<16xf32>
    %222 = vector.multi_reduction <add>, %221, %cst_48 [1] : vector<16x32xf32> to vector<16xf32>
    %223 = vector.shape_cast %222 : vector<16xf32> to vector<16x1xf32>
    %cst_49 = arith.constant 3.200000e+01 : f32
    %224 = vector.broadcast %cst_49 : f32 to vector<16x1xf32>
    %225 = arith.divf %223, %224 : vector<16x1xf32>
    %226 = vector.broadcast %218 : vector<16x1xf32> to vector<16x32xf32>
    %227 = arith.subf %214, %226 : vector<16x32xf32>
    %cst_50 = arith.constant 9.99999974E-6 : f32
    %228 = vector.broadcast %cst_50 : f32 to vector<16x1xf32>
    %229 = arith.addf %225, %228 : vector<16x1xf32>
    %230 = math.rsqrt %229 : vector<16x1xf32>
    %231 = vector.broadcast %230 : vector<16x1xf32> to vector<16x32xf32>
    %232 = arith.mulf %227, %231 : vector<16x32xf32>
    %c0_51 = arith.constant 0 : index
    %c0_52 = arith.constant 0 : index
    %c0_53 = arith.constant 0 : index
    %233 = vector.load %arg10[%c0_51, %c0_52, %c0_53] : memref<2x32x128xf32, #tpu.memory_space<vmem>>, vector<1x32x128xf32>
    %234 = vector.shape_cast %233 : vector<1x32x128xf32> to vector<32x128xf32>
    %cst_54 = arith.constant dense<0.000000e+00> : vector<16x128xf32>
    %235 = tpu.matmul %232, %234, %cst_54 {dimension_numbers = #tpu.dot_dimension_numbers<[1], [0], [0], [1], [0, 0, 1, 1], [], []>} : vector<16x32xf32>, vector<32x128xf32>, vector<16x128xf32> -> vector<16x128xf32>
    %cst_55 = arith.constant 0.000000e+00 : f32
    %236 = vector.broadcast %cst_55 : f32 to vector<16x128xf32>
    %237 = arith.maximumf %235, %236 : vector<16x128xf32>
    %c0_56 = arith.constant 0 : index
    %c0_57 = arith.constant 0 : index
    %c0_58 = arith.constant 0 : index
    %238 = vector.load %arg11[%c0_56, %c0_57, %c0_58] : memref<2x128x32xf32, #tpu.memory_space<vmem>>, vector<1x128x32xf32>
    %239 = vector.shape_cast %238 : vector<1x128x32xf32> to vector<128x32xf32>
    %cst_59 = arith.constant dense<0.000000e+00> : vector<16x32xf32>
    %240 = tpu.matmul %237, %239, %cst_59 {dimension_numbers = #tpu.dot_dimension_numbers<[1], [0], [0], [1], [0, 0, 1, 1], [], []>} : vector<16x128xf32>, vector<128x32xf32>, vector<16x32xf32> -> vector<16x32xf32>
    %241 = arith.addf %240, %232 : vector<16x32xf32>
    %cst_60 = arith.constant dense<0.000000e+00> : vector<16xf32>
    %242 = vector.multi_reduction <add>, %241, %cst_60 [1] : vector<16x32xf32> to vector<16xf32>
    %243 = vector.shape_cast %242 : vector<16xf32> to vector<16x1xf32>
    %cst_61 = arith.constant 3.200000e+01 : f32
    %244 = vector.broadcast %cst_61 : f32 to vector<16x1xf32>
    %245 = arith.divf %243, %244 : vector<16x1xf32>
    %246 = vector.broadcast %245 : vector<16x1xf32> to vector<16x32xf32>
    %247 = arith.subf %241, %246 : vector<16x32xf32>
    %248 = arith.mulf %247, %247 : vector<16x32xf32>
    %cst_62 = arith.constant dense<0.000000e+00> : vector<16xf32>
    %249 = vector.multi_reduction <add>, %248, %cst_62 [1] : vector<16x32xf32> to vector<16xf32>
    %250 = vector.shape_cast %249 : vector<16xf32> to vector<16x1xf32>
    %cst_63 = arith.constant 3.200000e+01 : f32
    %251 = vector.broadcast %cst_63 : f32 to vector<16x1xf32>
    %252 = arith.divf %250, %251 : vector<16x1xf32>
    %253 = vector.broadcast %245 : vector<16x1xf32> to vector<16x32xf32>
    %254 = arith.subf %241, %253 : vector<16x32xf32>
    %cst_64 = arith.constant 9.99999974E-6 : f32
    %255 = vector.broadcast %cst_64 : f32 to vector<16x1xf32>
    %256 = arith.addf %252, %255 : vector<16x1xf32>
    %257 = math.rsqrt %256 : vector<16x1xf32>
    %258 = vector.broadcast %257 : vector<16x1xf32> to vector<16x32xf32>
    %259 = arith.mulf %254, %258 : vector<16x32xf32>
    %c0_65 = arith.constant 0 : index
    %c0_66 = arith.constant 0 : index
    %c0_67 = arith.constant 0 : index
    %260 = vector.load %arg12[%c0_65, %c0_66, %c0_67] : memref<2x1x32xf32, #tpu.memory_space<vmem>>, vector<1x1x32xf32>
    %261 = vector.shape_cast %260 : vector<1x1x32xf32> to vector<1x32xf32>
    %262 = vector.broadcast %261 : vector<1x32xf32> to vector<16x32xf32>
    %263 = arith.mulf %259, %262 : vector<16x32xf32>
    %c0_68 = arith.constant 0 : index
    %c0_69 = arith.constant 0 : index
    %c0_70 = arith.constant 0 : index
    %264 = vector.load %arg13[%c0_68, %c0_69, %c0_70] : memref<2x1x32xf32, #tpu.memory_space<vmem>>, vector<1x1x32xf32>
    %265 = vector.shape_cast %264 : vector<1x1x32xf32> to vector<1x32xf32>
    %266 = vector.broadcast %265 : vector<1x32xf32> to vector<16x32xf32>
    %267 = arith.addf %263, %266 : vector<16x32xf32>
    %c1 = arith.constant 1 : index
    %c0_71 = arith.constant 0 : index
    %c0_72 = arith.constant 0 : index
    %268 = vector.load %arg5[%c1, %c0_71, %c0_72] : memref<2x32x96xf32, #tpu.memory_space<vmem>>, vector<1x32x96xf32>
    %269 = vector.shape_cast %268 : vector<1x32x96xf32> to vector<32x96xf32>
    %cst_73 = arith.constant dense<0.000000e+00> : vector<16x96xf32>
    %270 = tpu.matmul %267, %269, %cst_73 {dimension_numbers = #tpu.dot_dimension_numbers<[1], [0], [0], [1], [0, 0, 1, 1], [], []>} : vector<16x32xf32>, vector<32x96xf32>, vector<16x96xf32> -> vector<16x96xf32>
    %271 = vector.extract_strided_slice %270 {offsets = [0, 0], sizes = [16, 32], strides = [1, 1]} : vector<16x96xf32> to vector<16x32xf32>
    %272 = vector.extract_strided_slice %271 {offsets = [0, 0], sizes = [16, 8], strides = [1, 1]} : vector<16x32xf32> to vector<16x8xf32>
    %273 = vector.extract_strided_slice %271 {offsets = [0, 8], sizes = [16, 8], strides = [1, 1]} : vector<16x32xf32> to vector<16x8xf32>
    %274 = vector.extract_strided_slice %271 {offsets = [0, 16], sizes = [16, 8], strides = [1, 1]} : vector<16x32xf32> to vector<16x8xf32>
    %275 = vector.extract_strided_slice %271 {offsets = [0, 24], sizes = [16, 8], strides = [1, 1]} : vector<16x32xf32> to vector<16x8xf32>
    %276 = vector.shape_cast %272 : vector<16x8xf32> to vector<1x16x8xf32>
    %277 = vector.shape_cast %273 : vector<16x8xf32> to vector<1x16x8xf32>
    %278 = vector.shape_cast %274 : vector<16x8xf32> to vector<1x16x8xf32>
    %279 = vector.shape_cast %275 : vector<16x8xf32> to vector<1x16x8xf32>
    %280 = tpu.concatenate %276, %277, %278, %279 in 0 : vector<1x16x8xf32>, vector<1x16x8xf32>, vector<1x16x8xf32>, vector<1x16x8xf32> -> vector<4x16x8xf32>
    %281 = vector.shape_cast %280 : vector<4x16x8xf32> to vector<8x8x8xf32>
    %282 = vector.extract_strided_slice %270 {offsets = [0, 32], sizes = [16, 32], strides = [1, 1]} : vector<16x96xf32> to vector<16x32xf32>
    %283 = vector.extract_strided_slice %282 {offsets = [0, 0], sizes = [16, 8], strides = [1, 1]} : vector<16x32xf32> to vector<16x8xf32>
    %284 = vector.extract_strided_slice %282 {offsets = [0, 8], sizes = [16, 8], strides = [1, 1]} : vector<16x32xf32> to vector<16x8xf32>
    %285 = vector.extract_strided_slice %282 {offsets = [0, 16], sizes = [16, 8], strides = [1, 1]} : vector<16x32xf32> to vector<16x8xf32>
    %286 = vector.extract_strided_slice %282 {offsets = [0, 24], sizes = [16, 8], strides = [1, 1]} : vector<16x32xf32> to vector<16x8xf32>
    %287 = vector.shape_cast %283 : vector<16x8xf32> to vector<1x16x8xf32>
    %288 = vector.shape_cast %284 : vector<16x8xf32> to vector<1x16x8xf32>
    %289 = vector.shape_cast %285 : vector<16x8xf32> to vector<1x16x8xf32>
    %290 = vector.shape_cast %286 : vector<16x8xf32> to vector<1x16x8xf32>
    %291 = tpu.concatenate %287, %288, %289, %290 in 0 : vector<1x16x8xf32>, vector<1x16x8xf32>, vector<1x16x8xf32>, vector<1x16x8xf32> -> vector<4x16x8xf32>
    %292 = vector.shape_cast %291 : vector<4x16x8xf32> to vector<8x8x8xf32>
    %293 = vector.extract_strided_slice %270 {offsets = [0, 64], sizes = [16, 32], strides = [1, 1]} : vector<16x96xf32> to vector<16x32xf32>
    %294 = vector.extract_strided_slice %293 {offsets = [0, 0], sizes = [16, 8], strides = [1, 1]} : vector<16x32xf32> to vector<16x8xf32>
    %295 = vector.extract_strided_slice %293 {offsets = [0, 8], sizes = [16, 8], strides = [1, 1]} : vector<16x32xf32> to vector<16x8xf32>
    %296 = vector.extract_strided_slice %293 {offsets = [0, 16], sizes = [16, 8], strides = [1, 1]} : vector<16x32xf32> to vector<16x8xf32>
    %297 = vector.extract_strided_slice %293 {offsets = [0, 24], sizes = [16, 8], strides = [1, 1]} : vector<16x32xf32> to vector<16x8xf32>
    %298 = vector.shape_cast %294 : vector<16x8xf32> to vector<1x16x8xf32>
    %299 = vector.shape_cast %295 : vector<16x8xf32> to vector<1x16x8xf32>
    %300 = vector.shape_cast %296 : vector<16x8xf32> to vector<1x16x8xf32>
    %301 = vector.shape_cast %297 : vector<16x8xf32> to vector<1x16x8xf32>
    %302 = tpu.concatenate %298, %299, %300, %301 in 0 : vector<1x16x8xf32>, vector<1x16x8xf32>, vector<1x16x8xf32>, vector<1x16x8xf32> -> vector<4x16x8xf32>
    %303 = vector.shape_cast %302 : vector<4x16x8xf32> to vector<8x8x8xf32>
    %c1_74 = arith.constant 1 : index
    %c0_75 = arith.constant 0 : index
    %c0_76 = arith.constant 0 : index
    %304 = vector.load %arg6[%c1_74, %c0_75, %c0_76] : memref<2x32x32xf32, #tpu.memory_space<vmem>>, vector<1x32x32xf32>
    %305 = vector.shape_cast %304 : vector<1x32x32xf32> to vector<32x32xf32>
    "tpu.trace_start"() <{level = 10 : i32, message = "bqd,bkd->bqk"}> : () -> ()
    %cst_77 = arith.constant dense<0.000000e+00> : vector<8x8x8xf32>
    %306 = tpu.matmul %281, %292, %cst_77 {dimension_numbers = #tpu.dot_dimension_numbers<[2], [2], [1], [1], [0, 0, 0, 1, 1, 1], [0], [0]>} : vector<8x8x8xf32>, vector<8x8x8xf32>, vector<8x8x8xf32> -> vector<8x8x8xf32>
    "tpu.trace_stop"() : () -> ()
    %cst_78 = arith.constant 0.353553385 : f32
    %307 = vector.broadcast %cst_78 : f32 to vector<8x8x8xf32>
    %308 = arith.mulf %306, %307 : vector<8x8x8xf32>
    %309 = arith.addf %308, %12 : vector<8x8x8xf32>
    %cst_79 = arith.constant dense<0xFF800000> : vector<8x8xf32>
    %310 = vector.multi_reduction <maximumf>, %309, %cst_79 [2] : vector<8x8x8xf32> to vector<8x8xf32>
    %311 = vector.shape_cast %310 : vector<8x8xf32> to vector<8x8x1xf32>
    %312 = vector.broadcast %311 : vector<8x8x1xf32> to vector<8x8x8xf32>
    %313 = arith.subf %309, %312 : vector<8x8x8xf32>
    %314 = math.exp %313 : vector<8x8x8xf32>
    %cst_80 = arith.constant dense<0.000000e+00> : vector<8x8xf32>
    %315 = vector.multi_reduction <add>, %314, %cst_80 [2] : vector<8x8x8xf32> to vector<8x8xf32>
    %316 = vector.shape_cast %315 : vector<8x8xf32> to vector<8x8x1xf32>
    %317 = vector.broadcast %316 : vector<8x8x1xf32> to vector<8x8x8xf32>
    %318 = arith.divf %314, %317 : vector<8x8x8xf32>
    "tpu.trace_start"() <{level = 10 : i32, message = "bqk,bkd->bqd"}> : () -> ()
    %cst_81 = arith.constant dense<0.000000e+00> : vector<8x8x8xf32>
    %319 = tpu.matmul %318, %303, %cst_81 {dimension_numbers = #tpu.dot_dimension_numbers<[2], [1], [1], [2], [0, 0, 0, 1, 1, 2], [0], [0]>} : vector<8x8x8xf32>, vector<8x8x8xf32>, vector<8x8x8xf32> -> vector<8x8x8xf32>
    "tpu.trace_stop"() : () -> ()
    %320 = vector.shape_cast %319 : vector<8x8x8xf32> to vector<4x16x8xf32>
    %321 = vector.extract_strided_slice %320 {offsets = [0, 0, 0], sizes = [1, 16, 8], strides = [1, 1, 1]} : vector<4x16x8xf32> to vector<1x16x8xf32>
    %322 = vector.shape_cast %321 : vector<1x16x8xf32> to vector<16x8xf32>
    %323 = vector.extract_strided_slice %320 {offsets = [1, 0, 0], sizes = [1, 16, 8], strides = [1, 1, 1]} : vector<4x16x8xf32> to vector<1x16x8xf32>
    %324 = vector.shape_cast %323 : vector<1x16x8xf32> to vector<16x8xf32>
    %325 = vector.extract_strided_slice %320 {offsets = [2, 0, 0], sizes = [1, 16, 8], strides = [1, 1, 1]} : vector<4x16x8xf32> to vector<1x16x8xf32>
    %326 = vector.shape_cast %325 : vector<1x16x8xf32> to vector<16x8xf32>
    %327 = vector.extract_strided_slice %320 {offsets = [3, 0, 0], sizes = [1, 16, 8], strides = [1, 1, 1]} : vector<4x16x8xf32> to vector<1x16x8xf32>
    %328 = vector.shape_cast %327 : vector<1x16x8xf32> to vector<16x8xf32>
    %329 = tpu.concatenate %322, %324, %326, %328 in 1 : vector<16x8xf32>, vector<16x8xf32>, vector<16x8xf32>, vector<16x8xf32> -> vector<16x32xf32>
    %cst_82 = arith.constant dense<0.000000e+00> : vector<16x32xf32>
    %330 = tpu.matmul %329, %305, %cst_82 {dimension_numbers = #tpu.dot_dimension_numbers<[1], [0], [0], [1], [0, 0, 1, 1], [], []>} : vector<16x32xf32>, vector<32x32xf32>, vector<16x32xf32> -> vector<16x32xf32>
    %331 = vector.shape_cast %318 : vector<8x8x8xf32> to vector<4x2x8x8xf32>
    %332 = vector.extract_strided_slice %331 {offsets = [0, 0, 0, 0], sizes = [1, 2, 8, 8], strides = [1, 1, 1, 1]} : vector<4x2x8x8xf32> to vector<1x2x8x8xf32>
    %333 = vector.shape_cast %332 : vector<1x2x8x8xf32> to vector<2x8x8xf32>
    %334 = vector.shape_cast %333 : vector<2x8x8xf32> to vector<16x8xf32>
    %335 = vector.extract_strided_slice %331 {offsets = [1, 0, 0, 0], sizes = [1, 2, 8, 8], strides = [1, 1, 1, 1]} : vector<4x2x8x8xf32> to vector<1x2x8x8xf32>
    %336 = vector.shape_cast %335 : vector<1x2x8x8xf32> to vector<2x8x8xf32>
    %337 = vector.shape_cast %336 : vector<2x8x8xf32> to vector<16x8xf32>
    %338 = vector.extract_strided_slice %331 {offsets = [2, 0, 0, 0], sizes = [1, 2, 8, 8], strides = [1, 1, 1, 1]} : vector<4x2x8x8xf32> to vector<1x2x8x8xf32>
    %339 = vector.shape_cast %338 : vector<1x2x8x8xf32> to vector<2x8x8xf32>
    %340 = vector.shape_cast %339 : vector<2x8x8xf32> to vector<16x8xf32>
    %341 = vector.extract_strided_slice %331 {offsets = [3, 0, 0, 0], sizes = [1, 2, 8, 8], strides = [1, 1, 1, 1]} : vector<4x2x8x8xf32> to vector<1x2x8x8xf32>
    %342 = vector.shape_cast %341 : vector<1x2x8x8xf32> to vector<2x8x8xf32>
    %343 = vector.shape_cast %342 : vector<2x8x8xf32> to vector<16x8xf32>
    %344 = tpu.concatenate %334, %337, %340, %343 in 1 : vector<16x8xf32>, vector<16x8xf32>, vector<16x8xf32>, vector<16x8xf32> -> vector<16x32xf32>
    %345 = arith.addf %330, %267 : vector<16x32xf32>
    %cst_83 = arith.constant dense<0.000000e+00> : vector<16xf32>
    %346 = vector.multi_reduction <add>, %345, %cst_83 [1] : vector<16x32xf32> to vector<16xf32>
    %347 = vector.shape_cast %346 : vector<16xf32> to vector<16x1xf32>
    %cst_84 = arith.constant 3.200000e+01 : f32
    %348 = vector.broadcast %cst_84 : f32 to vector<16x1xf32>
    %349 = arith.divf %347, %348 : vector<16x1xf32>
    %350 = vector.broadcast %349 : vector<16x1xf32> to vector<16x32xf32>
    %351 = arith.subf %345, %350 : vector<16x32xf32>
    %352 = arith.mulf %351, %351 : vector<16x32xf32>
    %cst_85 = arith.constant dense<0.000000e+00> : vector<16xf32>
    %353 = vector.multi_reduction <add>, %352, %cst_85 [1] : vector<16x32xf32> to vector<16xf32>
    %354 = vector.shape_cast %353 : vector<16xf32> to vector<16x1xf32>
    %cst_86 = arith.constant 3.200000e+01 : f32
    %355 = vector.broadcast %cst_86 : f32 to vector<16x1xf32>
    %356 = arith.divf %354, %355 : vector<16x1xf32>
    %357 = vector.broadcast %349 : vector<16x1xf32> to vector<16x32xf32>
    %358 = arith.subf %345, %357 : vector<16x32xf32>
    %cst_87 = arith.constant 9.99999974E-6 : f32
    %359 = vector.broadcast %cst_87 : f32 to vector<16x1xf32>
    %360 = arith.addf %356, %359 : vector<16x1xf32>
    %361 = math.rsqrt %360 : vector<16x1xf32>
    %362 = vector.broadcast %361 : vector<16x1xf32> to vector<16x32xf32>
    %363 = arith.mulf %358, %362 : vector<16x32xf32>
    %c1_88 = arith.constant 1 : index
    %c0_89 = arith.constant 0 : index
    %c0_90 = arith.constant 0 : index
    %364 = vector.load %arg7[%c1_88, %c0_89, %c0_90] : memref<2x32x32xf32, #tpu.memory_space<vmem>>, vector<1x32x32xf32>
    %365 = vector.shape_cast %364 : vector<1x32x32xf32> to vector<32x32xf32>
    %cst_91 = arith.constant dense<0.000000e+00> : vector<16x32xf32>
    %366 = tpu.matmul %363, %365, %cst_91 {dimension_numbers = #tpu.dot_dimension_numbers<[1], [0], [0], [1], [0, 0, 1, 1], [], []>} : vector<16x32xf32>, vector<32x32xf32>, vector<16x32xf32> -> vector<16x32xf32>
    %367 = vector.extract_strided_slice %366 {offsets = [0, 0], sizes = [16, 8], strides = [1, 1]} : vector<16x32xf32> to vector<16x8xf32>
    %368 = vector.extract_strided_slice %366 {offsets = [0, 8], sizes = [16, 8], strides = [1, 1]} : vector<16x32xf32> to vector<16x8xf32>
    %369 = vector.extract_strided_slice %366 {offsets = [0, 16], sizes = [16, 8], strides = [1, 1]} : vector<16x32xf32> to vector<16x8xf32>
    %370 = vector.extract_strided_slice %366 {offsets = [0, 24], sizes = [16, 8], strides = [1, 1]} : vector<16x32xf32> to vector<16x8xf32>
    %371 = vector.shape_cast %367 : vector<16x8xf32> to vector<1x16x8xf32>
    %372 = vector.shape_cast %368 : vector<16x8xf32> to vector<1x16x8xf32>
    %373 = vector.shape_cast %369 : vector<16x8xf32> to vector<1x16x8xf32>
    %374 = vector.shape_cast %370 : vector<16x8xf32> to vector<1x16x8xf32>
    %375 = tpu.concatenate %371, %372, %373, %374 in 0 : vector<1x16x8xf32>, vector<1x16x8xf32>, vector<1x16x8xf32>, vector<1x16x8xf32> -> vector<4x16x8xf32>
    %376 = vector.shape_cast %375 : vector<4x16x8xf32> to vector<8x8x8xf32>
    %c1_92 = arith.constant 1 : index
    %c0_93 = arith.constant 0 : index
    %c0_94 = arith.constant 0 : index
    %377 = vector.load %arg9[%c1_92, %c0_93, %c0_94] : memref<2x32x32xf32, #tpu.memory_space<vmem>>, vector<1x32x32xf32>
    %378 = vector.shape_cast %377 : vector<1x32x32xf32> to vector<32x32xf32>
    "tpu.trace_start"() <{level = 10 : i32, message = "bqd,bkd->bqk"}> : () -> ()
    %cst_95 = arith.constant dense<0.000000e+00> : vector<8x8x8xf32>
    %379 = tpu.matmul %376, %52, %cst_95 {dimension_numbers = #tpu.dot_dimension_numbers<[2], [2], [1], [1], [0, 0, 0, 1, 1, 1], [0], [0]>} : vector<8x8x8xf32>, vector<8x8x8xf32>, vector<8x8x8xf32> -> vector<8x8x8xf32>
    "tpu.trace_stop"() : () -> ()
    %cst_96 = arith.constant 0.353553385 : f32
    %380 = vector.broadcast %cst_96 : f32 to vector<8x8x8xf32>
    %381 = arith.mulf %379, %380 : vector<8x8x8xf32>
    %382 = arith.addf %381, %17 : vector<8x8x8xf32>
    %cst_97 = arith.constant dense<0xFF800000> : vector<8x8xf32>
    %383 = vector.multi_reduction <maximumf>, %382, %cst_97 [2] : vector<8x8x8xf32> to vector<8x8xf32>
    %384 = vector.shape_cast %383 : vector<8x8xf32> to vector<8x8x1xf32>
    %385 = vector.broadcast %384 : vector<8x8x1xf32> to vector<8x8x8xf32>
    %386 = arith.subf %382, %385 : vector<8x8x8xf32>
    %387 = math.exp %386 : vector<8x8x8xf32>
    %cst_98 = arith.constant dense<0.000000e+00> : vector<8x8xf32>
    %388 = vector.multi_reduction <add>, %387, %cst_98 [2] : vector<8x8x8xf32> to vector<8x8xf32>
    %389 = vector.shape_cast %388 : vector<8x8xf32> to vector<8x8x1xf32>
    %390 = vector.broadcast %389 : vector<8x8x1xf32> to vector<8x8x8xf32>
    %391 = arith.divf %387, %390 : vector<8x8x8xf32>
    "tpu.trace_start"() <{level = 10 : i32, message = "bqk,bkd->bqd"}> : () -> ()
    %cst_99 = arith.constant dense<0.000000e+00> : vector<8x8x8xf32>
    %392 = tpu.matmul %391, %63, %cst_99 {dimension_numbers = #tpu.dot_dimension_numbers<[2], [1], [1], [2], [0, 0, 0, 1, 1, 2], [0], [0]>} : vector<8x8x8xf32>, vector<8x8x8xf32>, vector<8x8x8xf32> -> vector<8x8x8xf32>
    "tpu.trace_stop"() : () -> ()
    %393 = vector.shape_cast %392 : vector<8x8x8xf32> to vector<4x16x8xf32>
    %394 = vector.extract_strided_slice %393 {offsets = [0, 0, 0], sizes = [1, 16, 8], strides = [1, 1, 1]} : vector<4x16x8xf32> to vector<1x16x8xf32>
    %395 = vector.shape_cast %394 : vector<1x16x8xf32> to vector<16x8xf32>
    %396 = vector.extract_strided_slice %393 {offsets = [1, 0, 0], sizes = [1, 16, 8], strides = [1, 1, 1]} : vector<4x16x8xf32> to vector<1x16x8xf32>
    %397 = vector.shape_cast %396 : vector<1x16x8xf32> to vector<16x8xf32>
    %398 = vector.extract_strided_slice %393 {offsets = [2, 0, 0], sizes = [1, 16, 8], strides = [1, 1, 1]} : vector<4x16x8xf32> to vector<1x16x8xf32>
    %399 = vector.shape_cast %398 : vector<1x16x8xf32> to vector<16x8xf32>
    %400 = vector.extract_strided_slice %393 {offsets = [3, 0, 0], sizes = [1, 16, 8], strides = [1, 1, 1]} : vector<4x16x8xf32> to vector<1x16x8xf32>
    %401 = vector.shape_cast %400 : vector<1x16x8xf32> to vector<16x8xf32>
    %402 = tpu.concatenate %395, %397, %399, %401 in 1 : vector<16x8xf32>, vector<16x8xf32>, vector<16x8xf32>, vector<16x8xf32> -> vector<16x32xf32>
    %cst_100 = arith.constant dense<0.000000e+00> : vector<16x32xf32>
    %403 = tpu.matmul %402, %378, %cst_100 {dimension_numbers = #tpu.dot_dimension_numbers<[1], [0], [0], [1], [0, 0, 1, 1], [], []>} : vector<16x32xf32>, vector<32x32xf32>, vector<16x32xf32> -> vector<16x32xf32>
    %404 = vector.shape_cast %391 : vector<8x8x8xf32> to vector<4x2x8x8xf32>
    %405 = vector.extract_strided_slice %404 {offsets = [0, 0, 0, 0], sizes = [1, 2, 8, 8], strides = [1, 1, 1, 1]} : vector<4x2x8x8xf32> to vector<1x2x8x8xf32>
    %406 = vector.shape_cast %405 : vector<1x2x8x8xf32> to vector<2x8x8xf32>
    %407 = vector.shape_cast %406 : vector<2x8x8xf32> to vector<16x8xf32>
    %408 = vector.extract_strided_slice %404 {offsets = [1, 0, 0, 0], sizes = [1, 2, 8, 8], strides = [1, 1, 1, 1]} : vector<4x2x8x8xf32> to vector<1x2x8x8xf32>
    %409 = vector.shape_cast %408 : vector<1x2x8x8xf32> to vector<2x8x8xf32>
    %410 = vector.shape_cast %409 : vector<2x8x8xf32> to vector<16x8xf32>
    %411 = vector.extract_strided_slice %404 {offsets = [2, 0, 0, 0], sizes = [1, 2, 8, 8], strides = [1, 1, 1, 1]} : vector<4x2x8x8xf32> to vector<1x2x8x8xf32>
    %412 = vector.shape_cast %411 : vector<1x2x8x8xf32> to vector<2x8x8xf32>
    %413 = vector.shape_cast %412 : vector<2x8x8xf32> to vector<16x8xf32>
    %414 = vector.extract_strided_slice %404 {offsets = [3, 0, 0, 0], sizes = [1, 2, 8, 8], strides = [1, 1, 1, 1]} : vector<4x2x8x8xf32> to vector<1x2x8x8xf32>
    %415 = vector.shape_cast %414 : vector<1x2x8x8xf32> to vector<2x8x8xf32>
    %416 = vector.shape_cast %415 : vector<2x8x8xf32> to vector<16x8xf32>
    %417 = tpu.concatenate %407, %410, %413, %416 in 1 : vector<16x8xf32>, vector<16x8xf32>, vector<16x8xf32>, vector<16x8xf32> -> vector<16x32xf32>
    %418 = arith.addf %403, %363 : vector<16x32xf32>
    %cst_101 = arith.constant dense<0.000000e+00> : vector<16xf32>
    %419 = vector.multi_reduction <add>, %418, %cst_101 [1] : vector<16x32xf32> to vector<16xf32>
    %420 = vector.shape_cast %419 : vector<16xf32> to vector<16x1xf32>
    %cst_102 = arith.constant 3.200000e+01 : f32
    %421 = vector.broadcast %cst_102 : f32 to vector<16x1xf32>
    %422 = arith.divf %420, %421 : vector<16x1xf32>
    %423 = vector.broadcast %422 : vector<16x1xf32> to vector<16x32xf32>
    %424 = arith.subf %418, %423 : vector<16x32xf32>
    %425 = arith.mulf %424, %424 : vector<16x32xf32>
    %cst_103 = arith.constant dense<0.000000e+00> : vector<16xf32>
    %426 = vector.multi_reduction <add>, %425, %cst_103 [1] : vector<16x32xf32> to vector<16xf32>
    %427 = vector.shape_cast %426 : vector<16xf32> to vector<16x1xf32>
    %cst_104 = arith.constant 3.200000e+01 : f32
    %428 = vector.broadcast %cst_104 : f32 to vector<16x1xf32>
    %429 = arith.divf %427, %428 : vector<16x1xf32>
    %430 = vector.broadcast %422 : vector<16x1xf32> to vector<16x32xf32>
    %431 = arith.subf %418, %430 : vector<16x32xf32>
    %cst_105 = arith.constant 9.99999974E-6 : f32
    %432 = vector.broadcast %cst_105 : f32 to vector<16x1xf32>
    %433 = arith.addf %429, %432 : vector<16x1xf32>
    %434 = math.rsqrt %433 : vector<16x1xf32>
    %435 = vector.broadcast %434 : vector<16x1xf32> to vector<16x32xf32>
    %436 = arith.mulf %431, %435 : vector<16x32xf32>
    %c1_106 = arith.constant 1 : index
    %c0_107 = arith.constant 0 : index
    %c0_108 = arith.constant 0 : index
    %437 = vector.load %arg10[%c1_106, %c0_107, %c0_108] : memref<2x32x128xf32, #tpu.memory_space<vmem>>, vector<1x32x128xf32>
    %438 = vector.shape_cast %437 : vector<1x32x128xf32> to vector<32x128xf32>
    %cst_109 = arith.constant dense<0.000000e+00> : vector<16x128xf32>
    %439 = tpu.matmul %436, %438, %cst_109 {dimension_numbers = #tpu.dot_dimension_numbers<[1], [0], [0], [1], [0, 0, 1, 1], [], []>} : vector<16x32xf32>, vector<32x128xf32>, vector<16x128xf32> -> vector<16x128xf32>
    %cst_110 = arith.constant 0.000000e+00 : f32
    %440 = vector.broadcast %cst_110 : f32 to vector<16x128xf32>
    %441 = arith.maximumf %439, %440 : vector<16x128xf32>
    %c1_111 = arith.constant 1 : index
    %c0_112 = arith.constant 0 : index
    %c0_113 = arith.constant 0 : index
    %442 = vector.load %arg11[%c1_111, %c0_112, %c0_113] : memref<2x128x32xf32, #tpu.memory_space<vmem>>, vector<1x128x32xf32>
    %443 = vector.shape_cast %442 : vector<1x128x32xf32> to vector<128x32xf32>
    %cst_114 = arith.constant dense<0.000000e+00> : vector<16x32xf32>
    %444 = tpu.matmul %441, %443, %cst_114 {dimension_numbers = #tpu.dot_dimension_numbers<[1], [0], [0], [1], [0, 0, 1, 1], [], []>} : vector<16x128xf32>, vector<128x32xf32>, vector<16x32xf32> -> vector<16x32xf32>
    %445 = arith.addf %444, %436 : vector<16x32xf32>
    %cst_115 = arith.constant dense<0.000000e+00> : vector<16xf32>
    %446 = vector.multi_reduction <add>, %445, %cst_115 [1] : vector<16x32xf32> to vector<16xf32>
    %447 = vector.shape_cast %446 : vector<16xf32> to vector<16x1xf32>
    %cst_116 = arith.constant 3.200000e+01 : f32
    %448 = vector.broadcast %cst_116 : f32 to vector<16x1xf32>
    %449 = arith.divf %447, %448 : vector<16x1xf32>
    %450 = vector.broadcast %449 : vector<16x1xf32> to vector<16x32xf32>
    %451 = arith.subf %445, %450 : vector<16x32xf32>
    %452 = arith.mulf %451, %451 : vector<16x32xf32>
    %cst_117 = arith.constant dense<0.000000e+00> : vector<16xf32>
    %453 = vector.multi_reduction <add>, %452, %cst_117 [1] : vector<16x32xf32> to vector<16xf32>
    %454 = vector.shape_cast %453 : vector<16xf32> to vector<16x1xf32>
    %cst_118 = arith.constant 3.200000e+01 : f32
    %455 = vector.broadcast %cst_118 : f32 to vector<16x1xf32>
    %456 = arith.divf %454, %455 : vector<16x1xf32>
    %457 = vector.broadcast %449 : vector<16x1xf32> to vector<16x32xf32>
    %458 = arith.subf %445, %457 : vector<16x32xf32>
    %cst_119 = arith.constant 9.99999974E-6 : f32
    %459 = vector.broadcast %cst_119 : f32 to vector<16x1xf32>
    %460 = arith.addf %456, %459 : vector<16x1xf32>
    %461 = math.rsqrt %460 : vector<16x1xf32>
    %462 = vector.broadcast %461 : vector<16x1xf32> to vector<16x32xf32>
    %463 = arith.mulf %458, %462 : vector<16x32xf32>
    %c1_120 = arith.constant 1 : index
    %c0_121 = arith.constant 0 : index
    %c0_122 = arith.constant 0 : index
    %464 = vector.load %arg12[%c1_120, %c0_121, %c0_122] : memref<2x1x32xf32, #tpu.memory_space<vmem>>, vector<1x1x32xf32>
    %465 = vector.shape_cast %464 : vector<1x1x32xf32> to vector<1x32xf32>
    %466 = vector.broadcast %465 : vector<1x32xf32> to vector<16x32xf32>
    %467 = arith.mulf %463, %466 : vector<16x32xf32>
    %c1_123 = arith.constant 1 : index
    %c0_124 = arith.constant 0 : index
    %c0_125 = arith.constant 0 : index
    %468 = vector.load %arg13[%c1_123, %c0_124, %c0_125] : memref<2x1x32xf32, #tpu.memory_space<vmem>>, vector<1x1x32xf32>
    %469 = vector.shape_cast %468 : vector<1x1x32xf32> to vector<1x32xf32>
    %470 = vector.broadcast %469 : vector<1x32xf32> to vector<16x32xf32>
    %471 = arith.addf %467, %470 : vector<16x32xf32>
    %c0_126 = arith.constant 0 : index
    %c0_127 = arith.constant 0 : index
    %472 = vector.load %arg14[%c0_126, %c0_127] : memref<16x32xf32, #tpu.memory_space<vmem>>, vector<16x32xf32>
    tpu.vector_store %arg14[%c0_126, %c0_127], %471 {strides = array<i32>} : memref<16x32xf32, #tpu.memory_space<vmem>>, vector<16x32xf32>,
    %473 = tpu.concatenate %140, %344, %213, %417 in 1 : vector<16x32xf32>, vector<16x32xf32>, vector<16x32xf32>, vector<16x32xf32> -> vector<16x128xf32>
    %c0_128 = arith.constant 0 : index
    %c0_129 = arith.constant 0 : index
    %474 = vector.load %arg15[%c0_128, %c0_129] : memref<16x128xf32, #tpu.memory_space<vmem>>, vector<16x128xf32>
    tpu.vector_store %arg15[%c0_128, %c0_129], %473 {strides = array<i32>} : memref<16x128xf32, #tpu.memory_space<vmem>>, vector<16x128xf32>,
    return
  }
}

</mosaic_0001>

<bundles_post_ra>
// kernel: decoder_forward.1
= control target key start
LH: loop header
LB: loop body
LE: loop exit
PB: predicated region body
PF: predicated region fallthrough
CT: control target
= control target key end

     0   :  { %s5507_s0 = inlined_call_operand.vmem [shape: f32[2,8,32], index: 0, kind: input, shape index: {}]   ;;  %s5508_s1 = inlined_call_operand.vmem [shape: f32[2,8,32], index: 1, kind: input, shape index: {}]   ;;  %s5509_s2 = inlined_call_operand.vmem [shape: f32[8,32], index: 2, kind: input, shape index: {}]   ;;  %s5510_s3 = inlined_call_operand.vmem [shape: f32[2,8,8], index: 3, kind: input, shape index: {}]   ;;  %s5511_s4 = inlined_call_operand.vmem [shape: f32[2,8,8], index: 4, kind: input, shape index: {}]   ;;  %s5512_s5 = inlined_call_operand.vmem [shape: f32[2,32,96], index: 5, kind: input, shape index: {}]   ;;  %s5513_s6 = inlined_call_operand.vmem [shape: f32[2,32,32], index: 6, kind: input, shape index: {}]   ;;  %s5514_s7 = inlined_call_operand.vmem [shape: f32[2,32,32], index: 7, kind: input, shape index: {}]   ;;  %s5515_s8 = inlined_call_operand.vmem [shape: f32[32,128], index: 8, kind: input, shape index: {}]   ;;  %s5516_s9 = inlined_call_operand.vmem [shape: f32[2,32,32], index: 9, kind: input, shape index: {}]   ;;  %s5517_s10 = inlined_call_operand.vmem [shape: f32[2,32,128], index: 10, kind: input, shape index: {}]   ;;  %s5518_s11 = inlined_call_operand.vmem [shape: f32[2,128,32], index: 11, kind: input, shape index: {}]   ;;  %s5519_s12 = inlined_call_operand.vmem [shape: f32[2,1,32], index: 12, kind: input, shape index: {}]   ;;  %s5520_s13 = inlined_call_operand.vmem [shape: f32[2,1,32], index: 13, kind: input, shape index: {}]   ;;  %s5521_s14 = inlined_call_operand.hbm [shape: f32[16,32], index: 14, kind: output, shape index: {0}]   ;;  %s5522_s15 = inlined_call_operand.vmem [shape: f32[16,128], index: 15, kind: output, shape index: {1}]  }
   0x1   :  { %v112_v0 = vld [vmem:[%s5512_s5 + $0x18] sm:$0xff]  ;;  %v111_v1 = vld [vmem:[%s5512_s5 + $0x10] sm:$0xff]  ;;  %v50_v2 = vld [vmem:[%s5507_s0] sm:$0xff] }
   0x2   :  { %131 = vmatpush.msra.mxu1 %v112_v0  ;;  %v52_v3 = vld [vmem:[%s5509_s2] sm:$0xff]  ;;  %v110_v4 = vld [vmem:[%s5512_s5 + $0x8] sm:$0xff] }
   0x4   :  { %132 = vmatpush.msra.mxu1 %v111_v1 }
   0x5   :  { %21 = vsyncpa [#allocation3], 0  ;;  %v109_v5 = vld [vmem:[%s5512_s5] sm:$0xff]  ;;  %v4163_v6 = vadd.f32 %v52_v3, %v50_v2  ;;  %vm65_vm0 = vcmask 261120   ;;  %v51_v7 = vld [vmem:[%s5507_s0 + $0x8] sm:$0xff]  ;;  %s4053_s16 = smov 104  }
   0x6   :  { %133 = vmatpush.msra.mxu1 %v110_v4  ;;  %v4170_v8 = vadd.f32 %v52_v3, %v51_v7  ;;  %s4054_s17 = smov 112   ;;  %s4055_s18 = smov 120   ;;  %vm162_vm1 = vcmask 64512   ;;  %v64_v18 = vld [vmem:[%s5515_s8 + $0x18] sm:$0xff]  ;;  %v63_v19 = vld [vmem:[%s5515_s8 + $0x10] sm:$0xff]  ;;  %v62_v20 = vld [vmem:[%s5515_s8 + $0x8] sm:$0xff] }
   0x7   :  { %s4056_s0 = smov 96   ;;  %84 = vmatpush.msra.mxu0 %v64_v18  ;;  %v61_v21 = vld [vmem:[%s5515_s8] sm:$0xff]  ;;  %v56_v23 = vld [vmem:[%s5508_s1 + $0x8] sm:$0xff]  ;;  %s4057_s20 = smov 64  }
   0x8   :  { %134 = vmatpush.msra.mxu1 %v109_v5  ;;  %v55_v22 = vld [vmem:[%s5508_s1] sm:$0xff]  ;;  %v58_v45 = vld [vmem:[%s5510_s3 + $0x8] sm:$0xff]  ;;  %s4058_s29 = smov 8   ;;  %s4059_s30 = smov 16  }
   0x9   :  { %3639 = vmatmul.msk.f32.vlgmr.msra.gmra.mxu1 %vm65_vm0, %v4163_v6  ;;  %85 = vmatpush.msra.mxu0 %v63_v19  ;;  %v57_v32 = vld [vmem:[%s5510_s3] sm:$0xff]  ;;  %s4060_s1 = smov 24   ;;  %s4063_s23 = smov [#allocation2]  }
   0xa   :  { %s3619_s24 = sshll.u32 %s4063_s23, 4  ;;  %s3620_s24 = int_to_ptr.vmem [resolvable:$true] %s3619_s24 }
   0xb   :  { %86 = vmatpush.msra.mxu0 %v62_v20 }
   0xd   :  { %87 = vmatpush.msra.mxu0 %v61_v21 }
   0xe   :  { %3637 = vmatmul.msk.f32.vlgmr.msra.gmra.mxu0 %vm65_vm0, %v55_v22 }
  0x11   :  { %3640 = vmatmul.msk.f32.gmra.mxu1 %vm65_vm0, %v4170_v8 }
  0x16   :  { %3638 = vmatmul.msk.f32.gmra.mxu0 %vm65_vm0, %v56_v23 }
  0x86   :  { %v4174_v9 = vpop.f32.mrf.mxu1 }
  0x87   :  { %152 = vrot.lane.b32.xlu2 %v4174_v9, %s4053_s16  ;;  %148 = vrot.lane.b32.xlu1 %v4174_v9, %s4054_s17 }
  0x88   :  { %144 = vrot.lane.b32.xlu0 %v4174_v9, %s4055_s18 }
  0x8b   :  { %v4266_v36 = vpop.f32.mrf.mxu0 }
  0x8e   :  { %v4182_v10 = vpop.f32.mrf.mxu1 }
  0x8f   :  { %150 = vrot.lane.b32.xlu1 %v4182_v10, %s4054_s17  ;;  %154 = vrot.lane.b32.xlu2 %v4182_v10, %s4053_s16 }
  0x90   :  { %146 = vrot.lane.b32.xlu0 %v4182_v10, %s4055_s18 }
  0x93   :  { %v4268_v37 = vpop.f32.mrf.mxu0 }
  0x98   :  { %160 = vrot.lane.b32.xlu0 %v4174_v9, %s4056_s0 }
  0xe1   :  { %v4200_v13 = vpop.permute.xlu2 %152 }
  0xe9   :  { %v4210_v15 = vpop.permute.xlu2 %154 }
  0xf9   :  { %v4192_v11 = vpop.permute.xlu1 %148 }
  0xfa   :  { %v4194_v12 = vpop.permute.xlu0 %144  ;;  %265 = vrot.lane.b32.xlu0 %v4192_v11, %s4056_s0  ;;  %v3810_v19 = vpack.i.bf16 %v4192_v11, %v4182_v10 }
  0xfb   :  { %213 = vrot.lane.b32.xlu1 %v4194_v12, %s4056_s0  ;;  %v3805_v18 = vpack.i.bf16 %v4194_v12, %v4174_v9 }
 0x101   :  { %v4212_v16 = vpop.permute.xlu1 %150 }
 0x102   :  { %v4202_v14 = vpop.permute.xlu0 %146  ;;  %317 = vrot.lane.b32.xlu0 %v4200_v13, %s4056_s0 }
 0x103   :  { %187 = vrot.lane.b32.xlu1 %v4182_v10, %s4056_s0  ;;  %239 = vrot.lane.b32.xlu2 %v4202_v14, %s4056_s0 }
 0x10a   :  { %v161_v17 = vpop.permute.xlu0 %160 }
 0x10b   :  { %343 = vrot.lane.b32.xlu1 %v4210_v15, %s4056_s0  ;;  %291 = vrot.lane.b32.xlu2 %v4212_v16, %s4056_s0 }
 0x10c   :  { %3641 = vmatpush.xpose.msk.msra.mxu2 %vm162_vm1, %v161_v17 }
 0x10f   :  { %3642 = vmatmul.msk.f32.vlgmr.msra.gmra.mxu2 %vm162_vm1, %v4174_v9 }
 0x15d   :  { %v240_v24 = vpop.permute.xlu2 %239 }
 0x15e   :  { %3647 = vmatpush.xpose.msk.msra.mxu3 %vm162_vm1, %v240_v24 }
 0x161   :  { %3648 = vmatmul.msk.f32.vlgmr.msra.gmra.mxu3 %vm162_vm1, %v4202_v14 }
 0x165   :  { %v292_v25 = vpop.permute.xlu2 %291 }
 0x166   :  { %3651 = vmatpush.xpose.msk.msrb.mxu3 %vm162_vm1, %v292_v25 }
 0x169   :  { %3652 = vmatmul.msk.f32.vlgmr.msrb.gmra.mxu3 %vm162_vm1, %v4212_v16 }
 0x16c   :  { %v266_v26 = vpop.permute.xlu0 %265 }
 0x16d   :  { %v214_v27 = vpop.permute.xlu1 %213 }
 0x16e   :  { %3645 = vmatpush.xpose.msk.msrb.mxu2 %vm162_vm1, %v214_v27 }
 0x171   :  { %3646 = vmatmul.msk.f32.vlgmr.msrb.gmra.mxu2 %vm162_vm1, %v4194_v12 }
 0x172   :  { %3649 = vmatpush.xpose.msk.msra.mxu2 %vm162_vm1, %v266_v26 }
 0x174   :  { %v318_v28 = vpop.permute.xlu0 %317 }
 0x175   :  { %v188_v29 = vpop.permute.xlu1 %187  ;;  %3653 = vmatpush.xpose.msk.msrb.mxu0 %vm162_vm1, %v318_v28 }
 0x176   :  { %3643 = vmatpush.xpose.msk.msrb.mxu1 %vm162_vm1, %v188_v29 }
 0x178   :  { %3654 = vmatmul.msk.f32.vlgmr.msrb.gmra.mxu0 %vm162_vm1, %v4200_v13 }
 0x179   :  { %3644 = vmatmul.msk.f32.vlgmr.msrb.gmra.mxu1 %vm162_vm1, %v4182_v10  ;;  %3650 = vmatmul.msk.f32.vlgmr.msra.gmra.mxu2 %vm162_vm1, %v4192_v11 }
 0x17d   :  { %v344_v30 = vpop.permute.xlu1 %343 }
 0x17e   :  { %3655 = vmatpush.xpose.msk.msra.mxu1 %vm162_vm1, %v344_v30 }
 0x181   :  { %3656 = vmatmul.msk.f32.vlgmr.msra.gmra.mxu1 %vm162_vm1, %v4210_v15 }
 0x192   :  { %v184_v31 = vpop.f32.mrf.mxu2 }
 0x193   :  { %v369_v33 = vmul.f32 0.35355338, %v184_v31 }
 0x195   :  { %v377_v34 = vadd.f32 %v369_v33, %v57_v32 }
 0x197   :  { %v385_v35 = vsel %vm162_vm1, %v377_v34, -inf }
 0x198   :  { %386 = vmax.xlane.f32.xlu2 %v385_v35 }
 0x1e4   :  { %v262_v38 = vpop.f32.mrf.mxu3 }
 0x1e5   :  { %v372_v57 = vmul.f32 0.35355338, %v262_v38 }
 0x1e7   :  { %v380_v61 = vadd.f32 %v372_v57, %v58_v45 }
 0x1e9   :  { %v394_v0 = vsel %vm162_vm1, %v380_v61, -inf }
 0x1ec   :  { %v314_v44 = vpop.f32.mrf.mxu3 }
 0x1ed   :  { %v374_v50 = vmul.f32 0.35355338, %v314_v44 }
 0x1ef   :  { %v382_v56 = vadd.f32 %v374_v50, %v58_v45 }
 0x1f1   :  { %v400_v60 = vsel %vm162_vm1, %v382_v56, -inf }
 0x1f4   :  { %v236_v39 = vpop.f32.mrf.mxu2 }
 0x1f5   :  { %v340_v40 = vpop.f32.mrf.mxu0  ;;  %v371_v48 = vmul.f32 0.35355338, %v236_v39 }
 0x1f6   :  { %v210_v41 = vpop.f32.mrf.mxu1  ;;  %v375_v42 = vmul.f32 0.35355338, %v340_v40 }
 0x1f7   :  { %v370_v43 = vmul.f32 0.35355338, %v210_v41  ;;  %v379_v54 = vadd.f32 %v371_v48, %v57_v32 }
 0x1f8   :  { %v383_v46 = vadd.f32 %v375_v42, %v57_v32 }
 0x1f9   :  { %v378_v47 = vadd.f32 %v370_v43, %v58_v45  ;;  %v391_v59 = vsel %vm162_vm1, %v379_v54, -inf }
 0x1fa   :  { %v403_v49 = vsel %vm162_vm1, %v383_v46, -inf }
 0x1fb   :  { %v388_v51 = vsel %vm162_vm1, %v378_v47, -inf  ;;  %404 = vmax.xlane.f32.xlu0 %v403_v49 }
 0x1fc   :  { %389 = vmax.xlane.f32.xlu1 %v388_v51  ;;  %v288_v52 = vpop.f32.mrf.mxu2 }
 0x1fd   :  { %v373_v53 = vmul.f32 0.35355338, %v288_v52 }
 0x1fe   :  { %v366_v62 = vpop.f32.mrf.mxu1 }
 0x1ff   :  { %v381_v55 = vadd.f32 %v373_v53, %v57_v32  ;;  %v376_v63 = vmul.f32 0.35355338, %v366_v62 }
 0x201   :  { %v397_v58 = vsel %vm162_vm1, %v381_v55, -inf  ;;  %v384_v3 = vadd.f32 %v376_v63, %v58_v45 }
 0x202   :  { %398 = vmax.xlane.f32.xlu2 %v397_v58 }
 0x203   :  { %392 = vmax.xlane.f32.xlu0 %v391_v59  ;;  %v406_v5 = vsel %vm162_vm1, %v384_v3, -inf }
 0x204   :  { %401 = vmax.xlane.f32.xlu1 %v400_v60 }
 0x20a   :  { %395 = vmax.xlane.f32.xlu2 %v394_v0 }
 0x20b   :  { %v387_v1 = vpop.xlane.xlu2 %386 }
 0x20c   :  { %v409_v2 = vsub.f32 %v377_v34, %v387_v1 }
 0x20e   :  { %v417_v4 = vmul.f32 1.442695, %v409_v2 }
 0x210   :  { %3869 = vpow2.f32 %v417_v4 }
 0x212   :  { %407 = vmax.xlane.f32.xlu2 %v406_v5 }
 0x216   :  { %v4280_v7 = vpop.eup %3869 }
 0x217   :  { %v433_v17 = vsel %vm162_vm1, %v4280_v7, 0.0 }
 0x218   :  { %434 = vadd.xlane.f32.xlu0 %v433_v17 }
 0x21d   :  { %3806 = vrot.lane.b32.xlu1 %v3805_v18, %s4057_s20  ;;  %v3815_v18 = vpack.i.bf16 %v4200_v13, %v4202_v14 }
 0x22c   :  { %3811 = vrot.lane.b32.xlu0 %v3810_v19, %s4057_s20 }
 0x26e   :  { %v405_v20 = vpop.xlane.xlu0 %404 }
 0x26f   :  { %v390_v21 = vpop.xlane.xlu1 %389  ;;  %v415_v23 = vsub.f32 %v383_v46, %v405_v20 }
 0x270   :  { %v410_v22 = vsub.f32 %v378_v47, %v390_v21 }
 0x271   :  { %v429_v25 = vmul.f32 1.442695, %v415_v23 }
 0x272   :  { %v419_v24 = vmul.f32 1.442695, %v410_v22 }
 0x274   :  { %3871 = vpow2.f32 %v419_v24 }
 0x275   :  { %v399_v26 = vpop.xlane.xlu2 %398  ;;  %3873 = vpow2.f32 %v429_v25 }
 0x276   :  { %v413_v27 = vsub.f32 %v381_v55, %v399_v26  ;;  %v393_v28 = vpop.xlane.xlu0 %392 }
 0x277   :  { %v402_v29 = vpop.xlane.xlu1 %401  ;;  %v411_v9 = vsub.f32 %v379_v54, %v393_v28 }
 0x278   :  { %v425_v12 = vmul.f32 1.442695, %v413_v27  ;;  %v414_v30 = vsub.f32 %v382_v56, %v402_v29 }
 0x279   :  { %v421_v31 = vmul.f32 1.442695, %v411_v9 }
 0x27a   :  { %v4290_v32 = vpop.eup %3871  ;;  %3875 = vpow2.f32 %v425_v12  ;;  %v427_v11 = vmul.f32 1.442695, %v414_v30 }
 0x27b   :  { %3877 = vpow2.f32 %v421_v31  ;;  %v436_v10 = vsel %vm162_vm1, %v4290_v32, 0.0  ;;  %v4294_v35 = vpop.eup %3873 }
 0x27c   :  { %437 = vadd.xlane.f32.xlu2 %v436_v10  ;;  %3879 = vpow2.f32 %v427_v11  ;;  %v451_v43 = vsel %vm162_vm1, %v4294_v35, 0.0 }
 0x27d   :  { %v396_v33 = vpop.xlane.xlu2 %395 }
 0x27e   :  { %v412_v34 = vsub.f32 %v380_v61, %v396_v33 }
 0x280   :  { %v4296_v38 = vpop.eup %3875  ;;  %v423_v39 = vmul.f32 1.442695, %v412_v34 }
 0x281   :  { %v4298_v40 = vpop.eup %3877  ;;  %v445_v41 = vsel %vm162_vm1, %v4296_v38, 0.0 }
 0x282   :  { %3881 = vpow2.f32 %v423_v39  ;;  %446 = vadd.xlane.f32.xlu0 %v445_v41  ;;  %v439_v42 = vsel %vm162_vm1, %v4298_v40, 0.0  ;;  %v4306_v45 = vpop.eup %3879 }
 0x283   :  { %440 = vadd.xlane.f32.xlu1 %v439_v42  ;;  %v448_v49 = vsel %vm162_vm1, %v4306_v45, 0.0 }
 0x284   :  { %452 = vadd.xlane.f32.xlu2 %v451_v43 }
 0x285   :  { %v408_v44 = vpop.xlane.xlu2 %407 }
 0x286   :  { %v416_v46 = vsub.f32 %v384_v3, %v408_v44 }
 0x288   :  { %v4308_v47 = vpop.eup %3881  ;;  %v431_v48 = vmul.f32 1.442695, %v416_v46 }
 0x289   :  { %v442_v50 = vsel %vm162_vm1, %v4308_v47, 0.0 }
 0x28a   :  { %3883 = vpow2.f32 %v431_v48  ;;  %449 = vadd.xlane.f32.xlu0 %v448_v49 }
 0x28b   :  { %v435_v51 = vpop.xlane.xlu0 %434  ;;  %443 = vadd.xlane.f32.xlu1 %v442_v50 }
 0x28c   :  { %3885 = vrcp.f32 %v435_v51  ;;  %v468_v60 = vand.u32 2147483648, %v435_v51  ;;  %v466_v62 = vand.u32 2147483647, %v435_v51  ;;  %vm462_vm3 = vweird.f32 %v435_v51 }
 0x28e   :  { %v469_v0 = vor.u32 1.1754944e-38, %v468_v60  ;;  %vm467_vm5 = vcmp.eq.f32.partialorder %v466_v62, 8.507059e+37 }
 0x28f   :  { %v3807_v52 = vpop.permute.xlu1 %3806 }
 0x290   :  { %v4314_v53 = vpop.eup %3883  ;;  %v3809_v54 = vunpack.i.h.bf16 %v3807_v52  ;;  %v3808_v55 = vunpack.i.l.bf16 %v3807_v52 }
 0x291   :  { %v454_v56 = vsel %vm162_vm1, %v4314_v53, 0.0 }
 0x292   :  { %v3886_v57 = vpop.eup %3885  ;;  %598 = vmatpush.msrb.mxu2 %v3808_v55  ;;  %650 = vmatpush.msra.mxu0 %v3809_v54 }
 0x293   :  { %v458_v58 = vmul.f32 %v3886_v57, %v435_v51  ;;  %455 = vadd.xlane.f32.xlu2 %v454_v56  ;;  %vm463_vm2 = vweird.f32 %v3886_v57 }
 0x294   :  { %vm464_vm4 = vmor %vm462_vm3, %vm463_vm2 }
 0x295   :  { %v459_v59 = vsub.f32 1.0, %v458_v58 }
 0x297   :  { %v460_v61 = vmul.f32 %v3886_v57, %v459_v59 }
 0x299   :  { %v461_v63 = vadd.f32 %v3886_v57, %v460_v61 }
 0x29b   :  { %v465_v1 = vsel %vm464_vm4, %v3886_v57, %v461_v63 }
 0x29c   :  { %v470_v2 = vsel %vm467_vm5, %v469_v0, %v465_v1 }
 0x29d   :  { %v4319_v3 = vmul.f32 %v4280_v7, %v470_v2 }
 0x29e   :  { %v3812_v4 = vpop.permute.xlu0 %3811  ;;  %759 = vrot.lane.b32.xlu0 %v4210_v15, %s4057_s20 }
 0x29f   :  { %v3814_v5 = vunpack.i.h.bf16 %v3812_v4  ;;  %v3813_v17 = vunpack.i.l.bf16 %v3812_v4  ;;  %3657 = vmatmul.msk.f32.vlgmr.msrb.gmra.mxu2 %vm162_vm1, %v4319_v3 }
 0x2a1   :  { %624 = vmatpush.msra.mxu3 %v3813_v17  ;;  %702 = vmatpush.msra.mxu2 %v3814_v5 }
 0x2a4   :  { %707 = vrot.lane.b32.xlu1 %v4212_v16, %s4057_s20 }
 0x2ab   :  { %3816 = vrot.lane.b32.xlu2 %v3815_v18, %s4057_s20 }
 0x2ef   :  { %v438_v7 = vpop.xlane.xlu2 %437 }
 0x2f0   :  { %3887 = vrcp.f32 %v438_v7  ;;  %v481_v24 = vand.u32 2147483647, %v438_v7  ;;  %v483_v14 = vand.u32 2147483648, %v438_v7  ;;  %vm477_vm7 = vweird.f32 %v438_v7 }
 0x2f2   :  { %vm4348_vm9 = vcmp.eq.f32.partialorder %v481_v24, 8.507059e+37  ;;  %v484_v39 = vor.u32 1.1754944e-38, %v483_v14 }
 0x2f5   :  { %v447_v19 = vpop.xlane.xlu0 %446 }
 0x2f6   :  { %v3888_v20 = vpop.eup %3887  ;;  %3889 = vrcp.f32 %v447_v19  ;;  %v4330_v15 = vpop.xlane.xlu1 %440  ;;  %v528_v11 = vand.u32 2147483648, %v447_v19  ;;  %v526_v43 = vand.u32 2147483647, %v447_v19  ;;  %vm522_vm11 = vweird.f32 %v447_v19 }
 0x2f7   :  { %v473_v21 = vmul.f32 %v3888_v20, %v438_v7  ;;  %v4332_v22 = vpop.xlane.xlu2 %452  ;;  %3891 = vrcp.f32 %v4330_v15  ;;  %vm478_vm6 = vweird.f32 %v3888_v20  ;;  %vm492_vm12 = vweird.f32 %v4330_v15 }
 0x2f8   :  { %3893 = vrcp.f32 %v4332_v22  ;;  %vm4344_vm8 = vmor %vm477_vm7, %vm478_vm6  ;;  %v529_v49 = vor.u32 1.1754944e-38, %v528_v11  ;;  %v498_v50 = vand.u32 2147483648, %v4330_v15  ;;  %v496_v56 = vand.u32 2147483647, %v4330_v15 }
 0x2f9   :  { %v474_v16 = vsub.f32 1.0, %v473_v21  ;;  %vm527_vm15 = vcmp.eq.f32.partialorder %v526_v43, 8.507059e+37  ;;  %v556_v62 = vand.u32 2147483647, %v4332_v22  ;;  %v558_v1 = vand.u32 2147483648, %v4332_v22 }
 0x2fa   :  { %v499_v2 = vor.u32 1.1754944e-38, %v498_v50  ;;  %vm497_vm4 = vcmp.eq.f32.partialorder %v496_v56, 8.507059e+37  ;;  %vm552_vm5 = vweird.f32 %v4332_v22 }
 0x2fb   :  { %v475_v23 = vmul.f32 %v3888_v20, %v474_v16 }
 0x2fc   :  { %v3890_v13 = vpop.eup %3889 }
 0x2fd   :  { %v3892_v25 = vpop.eup %3891  ;;  %v476_v26 = vadd.f32 %v3888_v20, %v475_v23  ;;  %v518_v27 = vmul.f32 %v3890_v13, %v447_v19  ;;  %v4336_v28 = vpop.xlane.xlu0 %449  ;;  %vm523_vm10 = vweird.f32 %v3890_v13 }
 0x2fe   :  { %v4338_v29 = vpop.eup %3893  ;;  %v488_v9 = vmul.f32 %v3892_v25, %v4330_v15  ;;  %3895 = vrcp.f32 %v4336_v28  ;;  %v4342_v12 = vpop.xlane.xlu1 %443  ;;  %vm493_vm13 = vweird.f32 %v3892_v25  ;;  %vm524_vm14 = vmor %vm522_vm11, %vm523_vm10  ;;  %v543_v14 = vand.u32 2147483648, %v4336_v28 }
 0x2ff   :  { %v519_v10 = vsub.f32 1.0, %v518_v27  ;;  %v548_v33 = vmul.f32 %v4338_v29, %v4332_v22  ;;  %v480_v34 = vsel %vm4344_vm8, %v3888_v20, %v476_v26  ;;  %3897 = vrcp.f32 %v4342_v12  ;;  %vm4368_vm2 = vmor %vm492_vm12, %vm493_vm13 }
 0x300   :  { %v489_v41 = vsub.f32 1.0, %v488_v9  ;;  %v485_v51 = vsel %vm4348_vm9, %v484_v39, %v480_v34  ;;  %vm553_vm3 = vweird.f32 %v4338_v29  ;;  %v511_v15 = vand.u32 2147483647, %v4342_v12 }
 0x301   :  { %v520_v42 = vmul.f32 %v3890_v13, %v519_v10  ;;  %v549_v44 = vsub.f32 1.0, %v548_v33  ;;  %v4366_v57 = vmul.f32 %v4290_v32, %v485_v51  ;;  %v513_v21 = vand.u32 2147483648, %v4342_v12  ;;  %vm4396_vm6 = vmor %vm552_vm5, %vm553_vm3 }
 0x302   :  { %v490_v46 = vmul.f32 %v3892_v25, %v489_v41  ;;  %vm4405_vm8 = vcmp.eq.f32.partialorder %v556_v62, 8.507059e+37  ;;  %vm507_vm10 = vweird.f32 %v4342_v12  ;;  %vm537_vm11 = vweird.f32 %v4336_v28 }
 0x303   :  { %v521_v48 = vadd.f32 %v3890_v13, %v520_v42  ;;  %v550_v54 = vmul.f32 %v4338_v29, %v549_v44  ;;  %3658 = vmatmul.msk.f32.vlgmr.msra.gmra.mxu3 %vm162_vm1, %v4366_v57  ;;  %v541_v27 = vand.u32 2147483647, %v4336_v28  ;;  %vm512_vm13 = vcmp.eq.f32.partialorder %v511_v15, 8.507059e+37 }
 0x304   :  { %v4361_v52 = vpop.eup %3895  ;;  %v491_v55 = vadd.f32 %v3892_v25, %v490_v46  ;;  %v544_v42 = vor.u32 1.1754944e-38, %v543_v14 }
 0x305   :  { %v525_v58 = vsel %vm524_vm14, %v3890_v13, %v521_v48  ;;  %v533_v60 = vmul.f32 %v4361_v52, %v4336_v28  ;;  %v3898_v61 = vpop.eup %3897  ;;  %v551_v17 = vadd.f32 %v4338_v29, %v550_v54  ;;  %vm538_vm9 = vweird.f32 %v4361_v52 }
 0x306   :  { %v495_v63 = vsel %vm4368_vm2, %v3892_v25, %v491_v55  ;;  %v4379_v32 = vpop.xlane.xlu2 %455  ;;  %v530_v0 = vsel %vm527_vm15, %v529_v49, %v525_v58  ;;  %v503_v5 = vmul.f32 %v3898_v61, %v4342_v12  ;;  %vm508_vm7 = vweird.f32 %v3898_v61  ;;  %vm4417_vm14 = vmor %vm537_vm11, %vm538_vm9  ;;  %v924_v12 = vld [vmem:[%s5514_s7 + $0x18] sm:$0xff]  ;;  %v923_v49 = vld [vmem:[%s5514_s7 + $0x10] sm:$0xff] }
 0x307   :  { %v534_v4 = vsub.f32 1.0, %v533_v60  ;;  %3899 = vrcp.f32 %v4379_v32  ;;  %v4388_v19 = vmul.f32 %v4296_v38, %v530_v0  ;;  %v500_v20 = vsel %vm497_vm4, %v499_v2, %v495_v63  ;;  %vm509_vm12 = vmor %vm507_vm10, %vm508_vm7  ;;  %v921_v55 = vld [vmem:[%s5514_s7] sm:$0xff] }
 0x308   :  { %v504_v7 = vsub.f32 1.0, %v503_v5  ;;  %v4394_v16 = vmul.f32 %v4298_v40, %v500_v20  ;;  %v555_v38 = vsel %vm4396_vm6, %v4338_v29, %v551_v17  ;;  %v559_v13 = vor.u32 1.1754944e-38, %v558_v1  ;;  %v158_v5 = vld [vmem:[%s5513_s6 + $0x10] sm:$0xff]  ;;  %v157_v17 = vld [vmem:[%s5513_s6 + $0x8] sm:$0xff] }
 0x309   :  { %v535_v18 = vmul.f32 %v4361_v52, %v534_v4  ;;  %3661 = vmatmul.msk.f32.vlgmr.msra.gmra.mxu2 %vm162_vm1, %v4388_v19  ;;  %v514_v29 = vor.u32 1.1754944e-38, %v513_v21  ;;  %vm542_vm15 = vcmp.eq.f32.partialorder %v541_v27, 8.507059e+37  ;;  %v573_v46 = vand.u32 2147483648, %v4379_v32  ;;  %v159_v4 = vld [vmem:[%s5513_s6 + $0x18] sm:$0xff] }
 0x30a   :  { %v505_v24 = vmul.f32 %v3898_v61, %v504_v7  ;;  %3659 = vmatmul.msk.f32.vlgmr.msra.gmra.mxu0 %vm162_vm1, %v4394_v16  ;;  %v560_v33 = vsel %vm4405_vm8, %v559_v13, %v555_v38  ;;  %v571_v51 = vand.u32 2147483647, %v4379_v32  ;;  %vm567_vm3 = vweird.f32 %v4379_v32  ;;  %859 = vmatpush.msrb.mxu2 %v159_v4 }
 0x30b   :  { %v536_v40 = vadd.f32 %v4361_v52, %v535_v18  ;;  %v4435_v48 = vmul.f32 %v4294_v35, %v560_v33  ;;  %v922_v35 = vld [vmem:[%s5514_s7 + $0x8] sm:$0xff]  ;;  %v574_v54 = vor.u32 1.1754944e-38, %v573_v46  ;;  %v156_v18 = vld [vmem:[%s5513_s6] sm:$0xff]  ;;  %vm811_vm6 = vcmask 130048  }
 0x30c   :  { %v506_v25 = vadd.f32 %v3898_v61, %v505_v24  ;;  %vm572_vm5 = vcmp.eq.f32.partialorder %v571_v51, 8.507059e+37  ;;  %860 = vmatpush.msrb.mxu2 %v158_v5  ;;  %vm814_vm7 = vcmask 195584  }
 0x30d   :  { %v3900_v26 = vpop.eup %3899  ;;  %v540_v28 = vsel %vm4417_vm14, %v4361_v52, %v536_v40 }
 0x30e   :  { %v3817_v9 = vpop.permute.xlu2 %3816  ;;  %v510_v31 = vsel %vm509_vm12, %v3898_v61, %v506_v25  ;;  %v563_v10 = vmul.f32 %v3900_v26, %v4379_v32  ;;  %vm568_vm2 = vweird.f32 %v3900_v26  ;;  %v545_v52 = vsel %vm542_vm15, %v544_v42, %v540_v28  ;;  %861 = vmatpush.msrb.mxu2 %v157_v17 }
 0x30f   :  { %v3819_v11 = vunpack.i.h.bf16 %v3817_v9  ;;  %v3818_v34 = vunpack.i.l.bf16 %v3817_v9  ;;  %v515_v41 = vsel %vm512_vm13, %v514_v29, %v510_v31  ;;  %vm569_vm4 = vmor %vm567_vm3, %vm568_vm2  ;;  %v4455_v58 = vmul.f32 %v4306_v45, %v545_v52 }
 0x310   :  { %v760_v39 = vpop.permute.xlu0 %759  ;;  %v564_v43 = vsub.f32 1.0, %v563_v10  ;;  %v4431_v44 = vmul.f32 %v4308_v47, %v515_v41  ;;  %862 = vmatpush.msrb.mxu2 %v156_v18  ;;  %v4061_v10 = vmov 32.0  }
 0x311   :  { %754 = vmatpush.msrb.mxu0 %v3819_v11  ;;  %676 = vmatpush.msrb.mxu1 %v3818_v34  ;;  %3901 = vrcp.f32 %v4061_v10 }
 0x312   :  { %v565_v50 = vmul.f32 %v3900_v26, %v564_v43  ;;  %3660 = vmatmul.msk.f32.vlgmr.msrb.gmra.mxu1 %vm162_vm1, %v4431_v44  ;;  %3663 = vmatmul.msk.f32.vlgmr.msrb.gmra.mxu0 %vm162_vm1, %v4435_v48 }
 0x313   :  { %943 = vmatpush.msra.mxu0 %v924_v12  ;;  %780 = vmatpush.msra.mxu1 %v760_v39 }
 0x314   :  { %v566_v47 = vadd.f32 %v3900_v26, %v565_v50 }
 0x315   :  { %944 = vmatpush.msra.mxu0 %v923_v49  ;;  %3671 = vmatpush.xpose.msk.msrb.mxu1 %vm162_vm1, %v4268_v37 }
 0x316   :  { %v708_v56 = vpop.permute.xlu1 %707  ;;  %v570_v59 = vsel %vm569_vm4, %v3900_v26, %v566_v47 }
 0x317   :  { %945 = vmatpush.msra.mxu0 %v922_v35  ;;  %728 = vmatpush.msrb.mxu3 %v708_v56  ;;  %v575_v60 = vsel %vm572_vm5, %v574_v54, %v570_v59  ;;  %v3902_v11 = vpop.eup %3901 }
 0x318   :  { %3662 = vmatmul.msk.f32.vlgmr.msrb.gmra.mxu3 %vm162_vm1, %v4455_v58  ;;  %v4462_v61 = vmul.f32 %v4314_v53, %v575_v60  ;;  %v877_v12 = vmul.f32 32.0, %v3902_v11  ;;  %vm881_vm8 = vweird.f32 %v3902_v11 }
 0x319   :  { %946 = vmatpush.msra.mxu0 %v921_v55 }
 0x31a   :  { %3664 = vmatmul.msk.f32.vlgmr.msra.gmra.mxu1 %vm162_vm1, %v4462_v61 }
 0x31b   :  { %3669 = vmatpush.xpose.msk.msrb.mxu0 %vm162_vm1, %v4266_v36 }
 0x322   :  { %v600_v45 = vpop.f32.mrf.mxu2 }
 0x386   :  { %v626_v53 = vpop.f32.mrf.mxu3 }
 0x387   :  { %v652_v62 = vpop.f32.mrf.mxu0 }
 0x388   :  { %787 = vrot.lane.b32.xlu1 %v652_v62, %s4058_s29 }
 0x38c   :  { %v704_v63 = vpop.f32.mrf.mxu2 }
 0x38d   :  { %795 = vrot.lane.b32.xlu0 %v704_v63, %s4059_s30 }
 0x38f   :  { %v678_v32 = vpop.f32.mrf.mxu1  ;;  %v756_v0 = vpop.f32.mrf.mxu0 }
 0x390   :  { %803 = vrot.lane.b32.xlu2 %v756_v0, %s4060_s1  ;;  %789 = vrot.lane.b32.xlu1 %v678_v32, %s4058_s29 }
 0x397   :  { %v782_v1 = vpop.f32.mrf.mxu1 }
 0x398   :  { %805 = vrot.lane.b32.xlu2 %v782_v1, %s4060_s1 }
 0x39b   :  { %v730_v2 = vpop.f32.mrf.mxu3 }
 0x39c   :  { %797 = vrot.lane.b32.xlu0 %v730_v2, %s4059_s30 }
 0x3ea   :  { %v804_v21 = vpop.permute.xlu2 %803 }
 0x3f2   :  { %v806_v13 = vpop.permute.xlu2 %805 }
 0x3fa   :  { %v788_v7 = vpop.permute.xlu1 %787 }
 0x3fb   :  { %v809_v20 = vsel %vm162_vm1, %v600_v45, %v788_v7 }
 0x3ff   :  { %v796_v15 = vpop.permute.xlu0 %795 }
 0x400   :  { %v812_v23 = vsel %vm811_vm6, %v809_v20, %v796_v15 }
 0x401   :  { %v815_v24 = vsel %vm814_vm7, %v812_v23, %v804_v21 }
 0x402   :  { %3665 = vmatmul.msk.f32.vlgmr.msrb.gmra.mxu2 %vm65_vm0, %v815_v24  ;;  %v790_v38 = vpop.permute.xlu1 %789 }
 0x403   :  { %v810_v22 = vsel %vm162_vm1, %v626_v53, %v790_v38 }
 0x40e   :  { %v798_v40 = vpop.permute.xlu0 %797 }
 0x40f   :  { %v813_v14 = vsel %vm811_vm6, %v810_v22, %v798_v40 }
 0x410   :  { %v816_v25 = vsel %vm814_vm7, %v813_v14, %v806_v13 }
 0x411   :  { %3666 = vmatmul.msk.f32.gmra.mxu2 %vm65_vm0, %v816_v25 }
 0x485   :  { %v864_v26 = vpop.f32.mrf.mxu2 }
 0x486   :  { %v865_v27 = vadd.f32 %v864_v26, %v4163_v6  ;;  %v878_v6 = vsub.f32 1.0, %v877_v12 }
 0x488   :  { %v870_v29 = vsel %vm65_vm0, %v865_v27, 0.0  ;;  %v879_v33 = vmul.f32 %v3902_v11, %v878_v6 }
 0x489   :  { %871 = vadd.xlane.f32.xlu1 %v870_v29 }
 0x48a   :  { %v880_v28 = vadd.f32 %v3902_v11, %v879_v33  ;;  %v60_v33 = vld [vmem:[%s5511_s4 + $0x8] sm:$0xff] }
 0x48c   :  { %v4500_v34 = vsel %vm881_vm8, %v3902_v11, %v880_v28 }
 0x494   :  { %v867_v9 = vpop.f32.mrf.mxu2 }
 0x495   :  { %v868_v30 = vadd.f32 %v867_v9, %v4170_v8  ;;  %v59_v9 = vld [vmem:[%s5511_s4] sm:$0xff] }
 0x497   :  { %v873_v31 = vsel %vm65_vm0, %v868_v30, 0.0 }
 0x498   :  { %874 = vadd.xlane.f32.xlu0 %v873_v31 }
 0x4ac   :  { %101 = vrot.lane.b32.xlu0 %v4266_v36, %s4054_s17 }
 0x4b4   :  { %103 = vrot.lane.b32.xlu0 %v4268_v37, %s4054_s17 }
 0x4fc   :  { %v872_v8 = vpop.xlane.xlu1 %871 }
 0x4fd   :  { %v883_v39 = vmul.f32 %v4500_v34, %v872_v8 }
 0x4ff   :  { %v885_v41 = vsub.f32 %v865_v27, %v883_v39 }
 0x501   :  { %v887_v42 = vmul.f32 %v885_v41, %v885_v41 }
 0x503   :  { %v889_v43 = vsel %vm65_vm0, %v887_v42, 0.0 }
 0x504   :  { %890 = vadd.xlane.f32.xlu2 %v889_v43 }
 0x50b   :  { %v875_v46 = vpop.xlane.xlu0 %874 }
 0x50c   :  { %v884_v49 = vmul.f32 %v4500_v34, %v875_v46 }
 0x50e   :  { %v886_v50 = vsub.f32 %v868_v30, %v884_v49 }
 0x510   :  { %v888_v51 = vmul.f32 %v886_v50, %v886_v50 }
 0x512   :  { %v892_v52 = vsel %vm65_vm0, %v888_v51, 0.0 }
 0x513   :  { %893 = vadd.xlane.f32.xlu1 %v892_v52 }
 0x51e   :  { %v4506_v35 = vpop.permute.xlu0 %101 }
 0x51f   :  { %3677 = vmatpush.xpose.msk.msra.mxu2 %vm162_vm1, %v4506_v35 }
 0x526   :  { %v4510_v47 = vpop.permute.xlu0 %103 }
 0x527   :  { %3679 = vmatpush.xpose.msk.msra.mxu3 %vm162_vm1, %v4510_v47 }
 0x52c   :  { %97 = vrot.lane.b32.xlu1 %v4266_v36, %s4055_s18 }
 0x534   :  { %99 = vrot.lane.b32.xlu1 %v4268_v37, %s4055_s18 }
 0x577   :  { %v891_v54 = vpop.xlane.xlu2 %890 }
 0x578   :  { %v895_v55 = vmul.f32 %v891_v54, %v4500_v34 }
 0x57a   :  { %v897_v56 = vadd.f32 1e-05, %v895_v55 }
 0x57c   :  { %3903 = vrsqrt.f32 %v897_v56  ;;  %vm905_vm10 = vweird.f32 %v897_v56 }
 0x582   :  { %v3904_v59 = vpop.eup %3903 }
 0x583   :  { %v900_v60 = vmul.f32 %v3904_v59, %v897_v56  ;;  %vm906_vm9 = vweird.f32 %v3904_v59 }
 0x584   :  { %vm907_vm11 = vmor %vm905_vm10, %vm906_vm9 }
 0x585   :  { %v901_v62 = vmul.f32 %v3904_v59, %v900_v60 }
 0x586   :  { %v894_v45 = vpop.xlane.xlu1 %893 }
 0x587   :  { %v896_v63 = vmul.f32 %v894_v45, %v4500_v34  ;;  %v902_v32 = vmul.f32 0.5, %v901_v62 }
 0x589   :  { %v898_v0 = vadd.f32 1e-05, %v896_v63  ;;  %v903_v53 = vsub.f32 1.5, %v902_v32 }
 0x58b   :  { %3905 = vrsqrt.f32 %v898_v0  ;;  %v904_v1 = vmul.f32 %v3904_v59, %v903_v53  ;;  %vm915_vm13 = vweird.f32 %v898_v0 }
 0x58d   :  { %v908_v2 = vsel %vm907_vm11, %v3904_v59, %v904_v1 }
 0x58e   :  { %v4520_v4 = vmul.f32 %v908_v2, %v885_v41 }
 0x590   :  { %3667 = vmatmul.msk.f32.vlgmr.msra.gmra.mxu0 %vm65_vm0, %v4520_v4 }
 0x591   :  { %v3906_v5 = vpop.eup %3905 }
 0x592   :  { %v910_v17 = vmul.f32 %v3906_v5, %v898_v0  ;;  %vm916_vm12 = vweird.f32 %v3906_v5 }
 0x593   :  { %vm917_vm14 = vmor %vm915_vm13, %vm916_vm12 }
 0x594   :  { %v911_v18 = vmul.f32 %v3906_v5, %v910_v17 }
 0x596   :  { %v912_v7 = vmul.f32 0.5, %v911_v18 }
 0x598   :  { %v913_v20 = vsub.f32 1.5, %v912_v7 }
 0x59a   :  { %v914_v15 = vmul.f32 %v3906_v5, %v913_v20 }
 0x59c   :  { %v918_v21 = vsel %vm917_vm14, %v3906_v5, %v914_v15 }
 0x59d   :  { %v4524_v23 = vmul.f32 %v918_v21, %v886_v50 }
 0x59e   :  { %v4526_v24 = vpop.permute.xlu1 %97 }
 0x59f   :  { %3668 = vmatmul.msk.f32.gmra.mxu0 %vm65_vm0, %v4524_v23 }
 0x5a0   :  { %3673 = vmatpush.xpose.msk.msra.mxu0 %vm162_vm1, %v4526_v24 }
 0x5a6   :  { %v4532_v38 = vpop.permute.xlu1 %99 }
 0x5a7   :  { %3675 = vmatpush.xpose.msk.msra.mxu1 %vm162_vm1, %v4532_v38 }
 0x60d   :  { %v948_v22 = vpop.f32.mrf.mxu0 }
 0x60e   :  { %960 = vrot.lane.b32.xlu2 %v948_v22, %s4054_s17  ;;  %964 = vrot.lane.b32.xlu1 %v948_v22, %s4053_s16 }
 0x60f   :  { %3670 = vmatmul.msk.f32.vlgmr.msrb.gmra.mxu0 %vm162_vm1, %v948_v22 }
 0x616   :  { %956 = vrot.lane.b32.xlu2 %v948_v22, %s4055_s18 }
 0x61c   :  { %v951_v40 = vpop.f32.mrf.mxu0 }
 0x61d   :  { %962 = vrot.lane.b32.xlu0 %v951_v40, %s4054_s17  ;;  %3672 = vmatmul.msk.f32.vlgmr.msrb.gmra.mxu1 %vm162_vm1, %v951_v40 }
 0x61e   :  { %105 = vrot.lane.b32.xlu2 %v4266_v36, %s4053_s16 }
 0x625   :  { %958 = vrot.lane.b32.xlu0 %v951_v40, %s4055_s18 }
 0x626   :  { %107 = vrot.lane.b32.xlu2 %v4268_v37, %s4053_s16 }
 0x62d   :  { %966 = vrot.lane.b32.xlu0 %v951_v40, %s4053_s16 }
 0x668   :  { %v961_v13 = vpop.permute.xlu2 %960 }
 0x669   :  { %3678 = vmatmul.msk.f32.vlgmr.msra.gmra.mxu2 %vm162_vm1, %v961_v13 }
 0x670   :  { %v957_v14 = vpop.permute.xlu2 %956 }
 0x671   :  { %3674 = vmatmul.msk.f32.vlgmr.msra.gmra.mxu0 %vm162_vm1, %v957_v14 }
 0x678   :  { %v4550_v25 = vpop.permute.xlu2 %105 }
 0x679   :  { %3681 = vmatpush.xpose.msk.msrb.mxu0 %vm162_vm1, %v4550_v25 }
 0x680   :  { %v4554_v26 = vpop.permute.xlu2 %107  ;;  %v965_v27 = vpop.permute.xlu1 %964 }
 0x681   :  { %3682 = vmatmul.msk.f32.vlgmr.msrb.gmra.mxu0 %vm162_vm1, %v965_v27  ;;  %3683 = vmatpush.xpose.msk.msrb.mxu1 %vm162_vm1, %v4554_v26 }
 0x68c   :  { %v993_v29 = vpop.f32.mrf.mxu0 }
 0x68d   :  { %v1164_v30 = vmul.f32 0.35355338, %v993_v29  ;;  %v3825_v29 = vpack.i.bf16 %v4506_v35, %v4268_v37 }
 0x68f   :  { %v963_v31 = vpop.permute.xlu0 %962  ;;  %v1172_v10 = vadd.f32 %v1164_v30, %v59_v9 }
 0x690   :  { %3680 = vmatmul.msk.f32.vlgmr.msra.gmra.mxu3 %vm162_vm1, %v963_v31  ;;  %v3820_v31 = vpack.i.bf16 %v4526_v24, %v4266_v36 }
 0x691   :  { %v1180_v11 = vsel %vm162_vm1, %v1172_v10, -inf }
 0x692   :  { %1181 = vmax.xlane.f32.xlu1 %v1180_v11 }
 0x697   :  { %v959_v12 = vpop.permute.xlu0 %958 }
 0x698   :  { %3676 = vmatmul.msk.f32.vlgmr.msra.gmra.mxu1 %vm162_vm1, %v959_v12 }
 0x69a   :  { %v1017_v6 = vpop.f32.mrf.mxu1 }
 0x69b   :  { %v1165_v28 = vmul.f32 0.35355338, %v1017_v6 }
 0x69d   :  { %v1173_v8 = vadd.f32 %v1165_v28, %v60_v33 }
 0x69f   :  { %v967_v39 = vpop.permute.xlu0 %966  ;;  %v1183_v41 = vsel %vm162_vm1, %v1173_v8, -inf }
 0x6a0   :  { %1184 = vmax.xlane.f32.xlu0 %v1183_v41  ;;  %3684 = vmatmul.msk.f32.vlgmr.msrb.gmra.mxu1 %vm162_vm1, %v967_v39 }
 0x6ec   :  { %v1089_v42 = vpop.f32.mrf.mxu2 }
 0x6ed   :  { %v1168_v43 = vmul.f32 0.35355338, %v1089_v42 }
 0x6ee   :  { %v1041_v46 = vpop.f32.mrf.mxu0 }
 0x6ef   :  { %v1166_v49 = vmul.f32 0.35355338, %v1041_v46  ;;  %v1176_v50 = vadd.f32 %v1168_v43, %v59_v9 }
 0x6f1   :  { %v1192_v51 = vsel %vm162_vm1, %v1176_v50, -inf  ;;  %v1174_v52 = vadd.f32 %v1166_v49, %v59_v9 }
 0x6f2   :  { %1193 = vmax.xlane.f32.xlu1 %v1192_v51 }
 0x6f3   :  { %v1186_v54 = vsel %vm162_vm1, %v1174_v52, -inf }
 0x6f4   :  { %1187 = vmax.xlane.f32.xlu2 %v1186_v54 }
 0x6fe   :  { %v1137_v55 = vpop.f32.mrf.mxu0 }
 0x6ff   :  { %v1170_v56 = vmul.f32 0.35355338, %v1137_v55 }
 0x701   :  { %v1178_v59 = vadd.f32 %v1170_v56, %v59_v9 }
 0x703   :  { %v1198_v60 = vsel %vm162_vm1, %v1178_v59, -inf }
 0x704   :  { %1199 = vmax.xlane.f32.xlu0 %v1198_v60 }
 0x705   :  { %v1182_v45 = vpop.xlane.xlu1 %1181 }
 0x706   :  { %v1204_v62 = vsub.f32 %v1172_v10, %v1182_v45 }
 0x708   :  { %v1212_v63 = vmul.f32 1.442695, %v1204_v62 }
 0x70a   :  { %3907 = vpow2.f32 %v1212_v63 }
 0x710   :  { %v4573_v32 = vpop.eup %3907 }
 0x711   :  { %v1228_v0 = vsel %vm162_vm1, %v4573_v32, 0.0 }
 0x712   :  { %1229 = vadd.xlane.f32.xlu0 %v1228_v0 }
 0x713   :  { %v1113_v53 = vpop.f32.mrf.mxu3  ;;  %v1185_v5 = vpop.xlane.xlu0 %1184 }
 0x714   :  { %v1169_v1 = vmul.f32 0.35355338, %v1113_v53  ;;  %v1205_v15 = vsub.f32 %v1173_v8, %v1185_v5 }
 0x715   :  { %v1065_v2 = vpop.f32.mrf.mxu1 }
 0x716   :  { %v1167_v17 = vmul.f32 0.35355338, %v1065_v2  ;;  %v1177_v18 = vadd.f32 %v1169_v1, %v60_v33  ;;  %v1214_v22 = vmul.f32 1.442695, %v1205_v15 }
 0x718   :  { %v1195_v7 = vsel %vm162_vm1, %v1177_v18, -inf  ;;  %v1175_v20 = vadd.f32 %v1167_v17, %v60_v33  ;;  %3909 = vpow2.f32 %v1214_v22 }
 0x719   :  { %1196 = vmax.xlane.f32.xlu1 %v1195_v7 }
 0x71a   :  { %v1189_v21 = vsel %vm162_vm1, %v1175_v20, -inf }
 0x71b   :  { %1190 = vmax.xlane.f32.xlu2 %v1189_v21 }
 0x71d   :  { %v1161_v40 = vpop.f32.mrf.mxu1 }
 0x71e   :  { %v1171_v13 = vmul.f32 0.35355338, %v1161_v40  ;;  %v4582_v9 = vpop.eup %3909 }
 0x71f   :  { %v1231_v30 = vsel %vm162_vm1, %v4582_v9, 0.0 }
 0x720   :  { %v1179_v14 = vadd.f32 %v1171_v13, %v60_v33 }
 0x722   :  { %v1201_v27 = vsel %vm162_vm1, %v1179_v14, -inf }
 0x723   :  { %1202 = vmax.xlane.f32.xlu2 %v1201_v27 }
 0x726   :  { %3826 = vrot.lane.b32.xlu0 %v3825_v29, %s4056_s0 }
 0x72b   :  { %1232 = vadd.xlane.f32.xlu2 %v1231_v30 }
 0x732   :  { %3821 = vrot.lane.b32.xlu1 %v3820_v31, %s4056_s0 }
 0x765   :  { %v1194_v10 = vpop.xlane.xlu1 %1193 }
 0x766   :  { %v1208_v11 = vsub.f32 %v1176_v50, %v1194_v10 }
 0x767   :  { %v1188_v12 = vpop.xlane.xlu2 %1187 }
 0x768   :  { %v1220_v6 = vmul.f32 1.442695, %v1208_v11  ;;  %v1206_v33 = vsub.f32 %v1174_v52, %v1188_v12 }
 0x76a   :  { %3911 = vpow2.f32 %v1220_v6  ;;  %v1216_v28 = vmul.f32 1.442695, %v1206_v33 }
 0x76c   :  { %3913 = vpow2.f32 %v1216_v28 }
 0x770   :  { %v4590_v8 = vpop.eup %3911 }
 0x771   :  { %v1240_v39 = vsel %vm162_vm1, %v4590_v8, 0.0 }
 0x772   :  { %v4594_v41 = vpop.eup %3913  ;;  %1241 = vadd.xlane.f32.xlu0 %v1240_v39 }
 0x773   :  { %v1234_v42 = vsel %vm162_vm1, %v4594_v41, 0.0 }
 0x774   :  { %1235 = vadd.xlane.f32.xlu1 %v1234_v42 }
 0x777   :  { %v1200_v43 = vpop.xlane.xlu0 %1199 }
 0x778   :  { %v1210_v46 = vsub.f32 %v1178_v59, %v1200_v43 }
 0x77a   :  { %v1224_v49 = vmul.f32 1.442695, %v1210_v46 }
 0x77c   :  { %3915 = vpow2.f32 %v1224_v49 }
 0x782   :  { %v4598_v50 = vpop.eup %3915 }
 0x783   :  { %v1246_v51 = vsel %vm162_vm1, %v4598_v50, 0.0 }
 0x784   :  { %1247 = vadd.xlane.f32.xlu2 %v1246_v51 }
 0x785   :  { %v1230_v52 = vpop.xlane.xlu0 %1229 }
 0x786   :  { %3917 = vrcp.f32 %v1230_v52  ;;  %v1263_v40 = vand.u32 2147483648, %v1230_v52  ;;  %vm1257_vm2 = vweird.f32 %v1230_v52  ;;  %v1261_v13 = vand.u32 2147483647, %v1230_v52 }
 0x788   :  { %v1264_v30 = vor.u32 1.1754944e-38, %v1263_v40  ;;  %vm1262_vm4 = vcmp.eq.f32.partialorder %v1261_v13, 8.507059e+37 }
 0x78c   :  { %v1197_v54 = vpop.xlane.xlu1 %1196  ;;  %v3918_v56 = vpop.eup %3917 }
 0x78d   :  { %v1209_v55 = vsub.f32 %v1177_v18, %v1197_v54  ;;  %v1253_v63 = vmul.f32 %v3918_v56, %v1230_v52  ;;  %vm1258_vm15 = vweird.f32 %v3918_v56 }
 0x78e   :  { %v1191_v60 = vpop.xlane.xlu2 %1190  ;;  %vm1259_vm3 = vmor %vm1257_vm2, %vm1258_vm15 }
 0x78f   :  { %v1222_v45 = vmul.f32 1.442695, %v1209_v55  ;;  %v1207_v62 = vsub.f32 %v1175_v20, %v1191_v60  ;;  %v1254_v59 = vsub.f32 1.0, %v1253_v63  ;;  %v3830_v60 = vpack.i.bf16 %v4550_v25, %v4532_v38 }
 0x791   :  { %3919 = vpow2.f32 %v1222_v45  ;;  %v1218_v0 = vmul.f32 1.442695, %v1207_v62  ;;  %v1255_v5 = vmul.f32 %v3918_v56, %v1254_v59 }
 0x793   :  { %3921 = vpow2.f32 %v1218_v0  ;;  %v1256_v22 = vadd.f32 %v3918_v56, %v1255_v5 }
 0x795   :  { %v1260_v27 = vsel %vm1259_vm3, %v3918_v56, %v1256_v22 }
 0x796   :  { %v1203_v53 = vpop.xlane.xlu2 %1202  ;;  %v1265_v10 = vsel %vm1262_vm4, %v1264_v30, %v1260_v27 }
 0x797   :  { %v4602_v1 = vpop.eup %3919  ;;  %v1211_v2 = vsub.f32 %v1179_v14, %v1203_v53  ;;  %v4615_v39 = vmul.f32 %v4573_v32, %v1265_v10 }
 0x798   :  { %v1243_v17 = vsel %vm162_vm1, %v4602_v1, 0.0  ;;  %v3827_v15 = vpop.permute.xlu0 %3826 }
 0x799   :  { %v4606_v7 = vpop.eup %3921  ;;  %v1226_v18 = vmul.f32 1.442695, %v1211_v2  ;;  %1244 = vadd.xlane.f32.xlu0 %v1243_v17  ;;  %v3828_v21 = vunpack.i.l.bf16 %v3827_v15  ;;  %v3829_v42 = vunpack.i.h.bf16 %v3827_v15 }
 0x79a   :  { %v1237_v20 = vsel %vm162_vm1, %v4606_v7, 0.0 }
 0x79b   :  { %3923 = vpow2.f32 %v1226_v18  ;;  %1238 = vadd.xlane.f32.xlu1 %v1237_v20  ;;  %1419 = vmatpush.msrb.mxu3 %v3828_v21 }
 0x79e   :  { %v1233_v14 = vpop.xlane.xlu2 %1232 }
 0x79f   :  { %3925 = vrcp.f32 %v1233_v14  ;;  %v1278_v46 = vand.u32 2147483648, %v1233_v14  ;;  %v1276_v51 = vand.u32 2147483647, %v1233_v14  ;;  %vm1272_vm8 = vweird.f32 %v1233_v14 }
 0x7a1   :  { %v4610_v29 = vpop.eup %3923  ;;  %v1279_v54 = vor.u32 1.1754944e-38, %v1278_v46  ;;  %vm1277_vm10 = vcmp.eq.f32.partialorder %v1276_v51, 8.507059e+37 }
 0x7a2   :  { %v1249_v31 = vsel %vm162_vm1, %v4610_v29, 0.0 }
 0x7a3   :  { %1250 = vadd.xlane.f32.xlu2 %v1249_v31 }
 0x7a4   :  { %v3822_v11 = vpop.permute.xlu1 %3821 }
 0x7a5   :  { %v3926_v12 = vpop.eup %3925  ;;  %v3824_v6 = vunpack.i.h.bf16 %v3822_v11  ;;  %v3823_v33 = vunpack.i.l.bf16 %v3822_v11 }
 0x7a6   :  { %v1268_v28 = vmul.f32 %v3926_v12, %v1233_v14  ;;  %vm1273_vm5 = vweird.f32 %v3926_v12 }
 0x7a7   :  { %1393 = vmatpush.msrb.mxu2 %v3823_v33  ;;  %1445 = vmatpush.msra.mxu0 %v3824_v6  ;;  %vm1274_vm9 = vmor %vm1272_vm8, %vm1273_vm5 }
 0x7a8   :  { %v1269_v43 = vsub.f32 1.0, %v1268_v28  ;;  %3685 = vmatmul.msk.f32.vlgmr.msrb.gmra.mxu2 %vm162_vm1, %v4615_v39 }
 0x7a9   :  { %1497 = vmatpush.msra.mxu2 %v3829_v42 }
 0x7aa   :  { %v1270_v49 = vmul.f32 %v3926_v12, %v1269_v43 }
 0x7ac   :  { %v1271_v52 = vadd.f32 %v3926_v12, %v1270_v49 }
 0x7ad   :  { %1554 = vrot.lane.b32.xlu0 %v4554_v26, %s4056_s0 }
 0x7ae   :  { %v1275_v32 = vsel %vm1274_vm9, %v3926_v12, %v1271_v52 }
 0x7af   :  { %v1280_v55 = vsel %vm1277_vm10, %v1279_v54, %v1275_v32 }
 0x7b0   :  { %v4622_v56 = vmul.f32 %v4582_v9, %v1280_v55 }
 0x7b2   :  { %3686 = vmatmul.msk.f32.vlgmr.msrb.gmra.mxu3 %vm162_vm1, %v4622_v56 }
 0x7b4   :  { %1502 = vrot.lane.b32.xlu1 %v4510_v47, %s4056_s0 }
 0x7bb   :  { %3831 = vrot.lane.b32.xlu2 %v3830_v60, %s4056_s0 }
 0x7e5   :  { %v1242_v45 = vpop.xlane.xlu0 %1241 }
 0x7e6   :  { %3927 = vrcp.f32 %v1242_v45  ;;  %v1323_v2 = vand.u32 2147483648, %v1242_v45  ;;  %v1321_v17 = vand.u32 2147483647, %v1242_v45  ;;  %vm1317_vm12 = vweird.f32 %v1242_v45 }
 0x7e7   :  { %v1236_v62 = vpop.xlane.xlu1 %1235 }
 0x7e8   :  { %3929 = vrcp.f32 %v1236_v62  ;;  %v1293_v15 = vand.u32 2147483648, %v1236_v62  ;;  %v1291_v22 = vand.u32 2147483647, %v1236_v62  ;;  %v1324_v40 = vor.u32 1.1754944e-38, %v1323_v2 }
 0x7e9   :  { %vm1322_vm15 = vcmp.eq.f32.partialorder %v1321_v17, 8.507059e+37  ;;  %vm1287_vm2 = vweird.f32 %v1236_v62 }
 0x7ea   :  { %v1294_v30 = vor.u32 1.1754944e-38, %v1293_v15  ;;  %vm1292_vm4 = vcmp.eq.f32.partialorder %v1291_v22, 8.507059e+37 }
 0x7ec   :  { %v3928_v63 = vpop.eup %3927 }
 0x7ed   :  { %v1313_v0 = vmul.f32 %v3928_v63, %v1242_v45  ;;  %vm1318_vm11 = vweird.f32 %v3928_v63 }
 0x7ee   :  { %v3930_v59 = vpop.eup %3929  ;;  %vm1319_vm14 = vmor %vm1317_vm12, %vm1318_vm11 }
 0x7ef   :  { %v1314_v9 = vsub.f32 1.0, %v1313_v0  ;;  %v1283_v53 = vmul.f32 %v3930_v59, %v1236_v62  ;;  %vm1288_vm13 = vweird.f32 %v3930_v59 }
 0x7f0   :  { %vm1289_vm3 = vmor %vm1287_vm2, %vm1288_vm13 }
 0x7f1   :  { %v1315_v5 = vmul.f32 %v3928_v63, %v1314_v9  ;;  %v1284_v18 = vsub.f32 1.0, %v1283_v53 }
 0x7f3   :  { %v1316_v20 = vadd.f32 %v3928_v63, %v1315_v5  ;;  %v1285_v21 = vmul.f32 %v3930_v59, %v1284_v18 }
 0x7f5   :  { %v1320_v13 = vsel %vm1319_vm14, %v3928_v63, %v1316_v20  ;;  %v1286_v14 = vadd.f32 %v3930_v59, %v1285_v21 }
 0x7f6   :  { %v1325_v27 = vsel %vm1322_vm15, %v1324_v40, %v1320_v13 }
 0x7f7   :  { %v1290_v31 = vsel %vm1289_vm3, %v3930_v59, %v1286_v14  ;;  %v4632_v10 = vmul.f32 %v4590_v8, %v1325_v27  ;;  %v1248_v6 = vpop.xlane.xlu2 %1247 }
 0x7f8   :  { %v1295_v11 = vsel %vm1292_vm4, %v1294_v30, %v1290_v31  ;;  %3931 = vrcp.f32 %v1248_v6  ;;  %v1351_v60 = vand.u32 2147483647, %v1248_v6  ;;  %v1353_v45 = vand.u32 2147483648, %v1248_v6 }
 0x7f9   :  { %3689 = vmatmul.msk.f32.vlgmr.msra.gmra.mxu2 %vm162_vm1, %v4632_v10  ;;  %v4637_v12 = vmul.f32 %v4594_v41, %v1295_v11  ;;  %vm1347_vm8 = vweird.f32 %v1248_v6 }
 0x7fa   :  { %vm1352_vm11 = vcmp.eq.f32.partialorder %v1351_v60, 8.507059e+37  ;;  %v1354_v5 = vor.u32 1.1754944e-38, %v1353_v45 }
 0x7fb   :  { %3687 = vmatmul.msk.f32.vlgmr.msra.gmra.mxu0 %vm162_vm1, %v4637_v12 }
 0x7fe   :  { %v3932_v33 = vpop.eup %3931 }
 0x7ff   :  { %v1343_v28 = vmul.f32 %v3932_v33, %v1248_v6  ;;  %vm1348_vm5 = vweird.f32 %v3932_v33 }
 0x800   :  { %vm4641_vm9 = vmor %vm1347_vm8, %vm1348_vm5 }
 0x801   :  { %v1344_v43 = vsub.f32 1.0, %v1343_v28 }
 0x803   :  { %v1345_v8 = vmul.f32 %v3932_v33, %v1344_v43 }
 0x805   :  { %v1346_v54 = vadd.f32 %v3932_v33, %v1345_v8 }
 0x807   :  { %v1350_v9 = vsel %vm4641_vm9, %v3932_v33, %v1346_v54 }
 0x808   :  { %v1355_v22 = vsel %vm1352_vm11, %v1354_v5, %v1350_v9  ;;  %v970_v5 = vld [vmem:[%s5516_s9 + $0x10] sm:$0xff] }
 0x80c   :  { %v1245_v42 = vpop.xlane.xlu0 %1244 }
 0x80d   :  { %3933 = vrcp.f32 %v1245_v42  ;;  %vm1332_vm14 = vweird.f32 %v1245_v42  ;;  %v1338_v20 = vand.u32 2147483648, %v1245_v42  ;;  %v1336_v40 = vand.u32 2147483647, %v1245_v42 }
 0x80e   :  { %v1239_v46 = vpop.xlane.xlu1 %1238 }
 0x80f   :  { %3935 = vrcp.f32 %v1239_v46  ;;  %v1308_v59 = vand.u32 2147483648, %v1239_v46  ;;  %v1306_v2 = vand.u32 2147483647, %v1239_v46  ;;  %vm1302_vm13 = vweird.f32 %v1239_v46 }
 0x810   :  { %vm1337_vm4 = vcmp.eq.f32.partialorder %v1336_v40, 8.507059e+37 }
 0x811   :  { %v1309_v21 = vor.u32 1.1754944e-38, %v1308_v59  ;;  %vm1307_vm2 = vcmp.eq.f32.partialorder %v1306_v2, 8.507059e+37  ;;  %v971_v2 = vld [vmem:[%s5516_s9 + $0x18] sm:$0xff] }
 0x812   :  { %1652 = vmatpush.msrb.mxu2 %v971_v2 }
 0x813   :  { %v3934_v49 = vpop.eup %3933 }
 0x814   :  { %v1328_v51 = vmul.f32 %v3934_v49, %v1245_v42  ;;  %vm1333_vm12 = vweird.f32 %v3934_v49  ;;  %v4657_v42 = vmul.f32 %v4598_v50, %v1355_v22  ;;  %1653 = vmatpush.msrb.mxu2 %v970_v5 }
 0x815   :  { %v3936_v52 = vpop.eup %3935  ;;  %vm4647_vm3 = vmor %vm1332_vm14, %vm1333_vm12 }
 0x816   :  { %v1329_v41 = vsub.f32 1.0, %v1328_v51  ;;  %v1298_v32 = vmul.f32 %v3936_v52, %v1239_v46  ;;  %v1251_v55 = vpop.xlane.xlu2 %1250  ;;  %vm1303_vm10 = vweird.f32 %v3936_v52  ;;  %v1339_v46 = vor.u32 1.1754944e-38, %v1338_v20 }
 0x817   :  { %3937 = vrcp.f32 %v1251_v55  ;;  %vm1304_vm15 = vmor %vm1302_vm13, %vm1303_vm10  ;;  %v1368_v8 = vand.u32 2147483648, %v1251_v55  ;;  %vm1362_vm8 = vweird.f32 %v1251_v55 }
 0x818   :  { %v1330_v62 = vmul.f32 %v3934_v49, %v1329_v41  ;;  %v1299_v63 = vsub.f32 1.0, %v1298_v32 }
 0x819   :  { %v1369_v50 = vor.u32 1.1754944e-38, %v1368_v8 }
 0x81a   :  { %v1300_v53 = vmul.f32 %v3936_v52, %v1299_v63  ;;  %v1331_v17 = vadd.f32 %v3934_v49, %v1330_v62 }
 0x81c   :  { %v1301_v18 = vadd.f32 %v3936_v52, %v1300_v53  ;;  %v1335_v33 = vsel %vm4647_vm3, %v3934_v49, %v1331_v17  ;;  %v969_v17 = vld [vmem:[%s5516_s9 + $0x8] sm:$0xff] }
 0x81d   :  { %v3938_v15 = vpop.eup %3937  ;;  %1654 = vmatpush.msrb.mxu2 %v969_v17 }
 0x81e   :  { %v1305_v13 = vsel %vm1304_vm15, %v3936_v52, %v1301_v18  ;;  %v1358_v14 = vmul.f32 %v3938_v15, %v1251_v55  ;;  %v3832_v27 = vpop.permute.xlu2 %3831  ;;  %vm1363_vm5 = vweird.f32 %v3938_v15  ;;  %v1366_v52 = vand.u32 2147483647, %v1251_v55  ;;  %v968_v18 = vld [vmem:[%s5516_s9] sm:$0xff] }
 0x81f   :  { %v1310_v31 = vsel %vm1307_vm2, %v1309_v21, %v1305_v13  ;;  %v3834_v11 = vunpack.i.h.bf16 %v3832_v27  ;;  %v3833_v6 = vunpack.i.l.bf16 %v3832_v27  ;;  %v1555_v54 = vpop.permute.xlu0 %1554  ;;  %vm1364_vm9 = vmor %vm1362_vm8, %vm1363_vm5  ;;  %1655 = vmatpush.msrb.mxu2 %v968_v18 }
 0x820   :  { %v1359_v28 = vsub.f32 1.0, %v1358_v14  ;;  %v4654_v43 = vmul.f32 %v4606_v7, %v1310_v31  ;;  %v1340_v7 = vsel %vm1337_vm4, %v1339_v46, %v1335_v33  ;;  %vm1367_vm10 = vcmp.eq.f32.partialorder %v1366_v52, 8.507059e+37 }
 0x821   :  { %1471 = vmatpush.msra.mxu1 %v3833_v6  ;;  %1549 = vmatpush.msrb.mxu0 %v3834_v11  ;;  %v4664_v60 = vmul.f32 %v4602_v1, %v1340_v7 }
 0x822   :  { %v1360_v51 = vmul.f32 %v3938_v15, %v1359_v28  ;;  %3688 = vmatmul.msk.f32.vlgmr.msra.gmra.mxu1 %vm162_vm1, %v4654_v43  ;;  %3691 = vmatmul.msk.f32.vlgmr.msrb.gmra.mxu0 %vm162_vm1, %v4657_v42 }
 0x823   :  { %1575 = vmatpush.msrb.mxu1 %v1555_v54 }
 0x824   :  { %v1361_v49 = vadd.f32 %v3938_v15, %v1360_v51 }
 0x826   :  { %v1365_v41 = vsel %vm1364_vm9, %v3938_v15, %v1361_v49  ;;  %v1503_v32 = vpop.permute.xlu1 %1502 }
 0x827   :  { %1523 = vmatpush.msra.mxu3 %v1503_v32  ;;  %v1370_v45 = vsel %vm1367_vm10, %v1369_v50, %v1365_v41 }
 0x828   :  { %3690 = vmatmul.msk.f32.vlgmr.msra.gmra.mxu3 %vm162_vm1, %v4664_v60  ;;  %v4669_v62 = vmul.f32 %v4610_v29, %v1370_v45 }
 0x82a   :  { %3692 = vmatmul.msk.f32.vlgmr.msrb.gmra.mxu1 %vm162_vm1, %v4669_v62 }
 0x82b   :  { %v1395_v55 = vpop.f32.mrf.mxu2 }
 0x835   :  { %v1421_v9 = vpop.f32.mrf.mxu3 }
 0x878   :  { %v1447_v63 = vpop.f32.mrf.mxu0 }
 0x879   :  { %1582 = vrot.lane.b32.xlu1 %v1447_v63, %s4058_s29  ;;  %v1710_v63 = vld [vmem:[%s5517_s10 + $0x18] sm:$0xff] }
 0x87a   :  { %1729 = vmatpush.msrb.mxu3 %v1710_v63 }
 0x87c   :  { %v1499_v0 = vpop.f32.mrf.mxu2 }
 0x87d   :  { %1590 = vrot.lane.b32.xlu0 %v1499_v0, %s4059_s30  ;;  %v1709_v0 = vld [vmem:[%s5517_s10 + $0x10] sm:$0xff] }
 0x87e   :  { %1730 = vmatpush.msrb.mxu3 %v1709_v0 }
 0x89f   :  { %v1473_v1 = vpop.f32.mrf.mxu1  ;;  %v1551_v59 = vpop.f32.mrf.mxu0 }
 0x8a0   :  { %1598 = vrot.lane.b32.xlu2 %v1551_v59, %s4060_s1  ;;  %1584 = vrot.lane.b32.xlu1 %v1473_v1, %s4058_s29  ;;  %v1708_v1 = vld [vmem:[%s5517_s10 + $0x8] sm:$0xff]  ;;  %v1707_v59 = vld [vmem:[%s5517_s10] sm:$0xff] }
 0x8a1   :  { %1731 = vmatpush.msrb.mxu3 %v1708_v1  ;;  %v1743_v1 = vld [vmem:[%s5518_s11 + $0x8] sm:$0xff] }
 0x8a3   :  { %1732 = vmatpush.msrb.mxu3 %v1707_v59  ;;  %v1742_v59 = vld [vmem:[%s5518_s11] sm:$0xff] }
 0x8a7   :  { %v1577_v53 = vpop.f32.mrf.mxu1 }
 0x8a8   :  { %1600 = vrot.lane.b32.xlu2 %v1577_v53, %s4060_s1 }
 0x8ab   :  { %v1525_v29 = vpop.f32.mrf.mxu3 }
 0x8ac   :  { %1592 = vrot.lane.b32.xlu0 %v1525_v29, %s4059_s30 }
 0x8eb   :  { %v1583_v15 = vpop.permute.xlu1 %1582 }
 0x8ec   :  { %v1604_v21 = vsel %vm162_vm1, %v1395_v55, %v1583_v15 }
 0x8ef   :  { %v1591_v20 = vpop.permute.xlu0 %1590 }
 0x8f0   :  { %v1606_v22 = vsel %vm811_vm6, %v1604_v21, %v1591_v20 }
 0x8fa   :  { %v1599_v40 = vpop.permute.xlu2 %1598 }
 0x8fb   :  { %v1608_v13 = vsel %vm814_vm7, %v1606_v22, %v1599_v40  ;;  %v1757_v40 = vld [vmem:[%s5518_s11 + $0x78] sm:$0xff] }
 0x8fc   :  { %3693 = vmatmul.msk.f32.vlgmr.msrb.gmra.mxu2 %vm65_vm0, %v1608_v13  ;;  %v1756_v13 = vld [vmem:[%s5518_s11 + $0x70] sm:$0xff]  ;;  %1758 = vmatpush.msra.mxu0 %v1757_v40 }
 0x8fe   :  { %1759 = vmatpush.msra.mxu0 %v1756_v13 }
 0x902   :  { %v1601_v31 = vpop.permute.xlu2 %1600 }
 0x912   :  { %v1585_v14 = vpop.permute.xlu1 %1584 }
 0x913   :  { %v1605_v27 = vsel %vm162_vm1, %v1421_v9, %v1585_v14  ;;  %v1755_v14 = vld [vmem:[%s5518_s11 + $0x68] sm:$0xff] }
 0x914   :  { %1760 = vmatpush.msra.mxu0 %v1755_v14 }
 0x91e   :  { %v1593_v30 = vpop.permute.xlu0 %1592 }
 0x91f   :  { %v1607_v11 = vsel %vm811_vm6, %v1605_v27, %v1593_v30  ;;  %v1754_v27 = vld [vmem:[%s5518_s11 + $0x60] sm:$0xff]  ;;  %v1753_v30 = vld [vmem:[%s5518_s11 + $0x58] sm:$0xff] }
 0x920   :  { %v1609_v6 = vsel %vm814_vm7, %v1607_v11, %v1601_v31  ;;  %1761 = vmatpush.msra.mxu0 %v1754_v27 }
 0x921   :  { %3694 = vmatmul.msk.f32.gmra.mxu2 %vm65_vm0, %v1609_v6  ;;  %v1752_v6 = vld [vmem:[%s5518_s11 + $0x50] sm:$0xff] }
 0x922   :  { %1762 = vmatpush.msra.mxu0 %v1753_v30 }
 0x924   :  { %1763 = vmatpush.msra.mxu0 %v1752_v6 }
 0x97f   :  { %v1657_v33 = vpop.f32.mrf.mxu2 }
 0x980   :  { %v1658_v28 = vadd.f32 %v1657_v33, %v4520_v4 }
 0x982   :  { %v1663_v46 = vsel %vm65_vm0, %v1658_v28, 0.0 }
 0x983   :  { %1664 = vadd.xlane.f32.xlu1 %v1663_v46  ;;  %v1750_v46 = vld [vmem:[%s5518_s11 + $0x40] sm:$0xff] }
 0x9a4   :  { %v1660_v8 = vpop.f32.mrf.mxu2 }
 0x9a5   :  { %v1661_v51 = vadd.f32 %v1660_v8, %v4524_v23  ;;  %v1749_v8 = vld [vmem:[%s5518_s11 + $0x38] sm:$0xff] }
 0x9a7   :  { %v1666_v52 = vsel %vm65_vm0, %v1661_v51, 0.0 }
 0x9a8   :  { %1667 = vadd.xlane.f32.xlu0 %v1666_v52 }
 0x9f6   :  { %v1665_v54 = vpop.xlane.xlu1 %1664 }
 0x9f7   :  { %v1669_v7 = vmul.f32 %v1665_v54, %v4500_v34  ;;  %v1747_v54 = vld [vmem:[%s5518_s11 + $0x28] sm:$0xff] }
 0x9f9   :  { %v1671_v49 = vsub.f32 %v1658_v28, %v1669_v7  ;;  %v1751_v28 = vld [vmem:[%s5518_s11 + $0x48] sm:$0xff] }
 0x9fa   :  { %1764 = vmatpush.msra.mxu0 %v1751_v28  ;;  %v3699_v28 = vld [vmem:[%s5512_s5 + $0x30] sm:$0xff] }
 0x9fb   :  { %v1673_v50 = vmul.f32 %v1671_v49, %v1671_v49 }
 0x9fc   :  { %1765 = vmatpush.msra.mxu0 %v1750_v46  ;;  %v3698_v46 = vld [vmem:[%s5512_s5 + $0x28] sm:$0xff] }
 0x9fd   :  { %v1675_v41 = vsel %vm65_vm0, %v1673_v50, 0.0 }
 0x9fe   :  { %1676 = vadd.xlane.f32.xlu2 %v1675_v41  ;;  %1766 = vmatpush.msra.mxu0 %v1749_v8  ;;  %v1745_v41 = vld [vmem:[%s5518_s11 + $0x18] sm:$0xff]  ;;  %v3697_v8 = vld [vmem:[%s5512_s5 + $0x20] sm:$0xff] }
 0xa1b   :  { %v1668_v32 = vpop.xlane.xlu0 %1667 }
 0xa1c   :  { %v1670_v4 = vmul.f32 %v1668_v32, %v4500_v34 }
 0xa1e   :  { %v4706_v45 = vsub.f32 %v1661_v51, %v1670_v4  ;;  %v1748_v51 = vld [vmem:[%s5518_s11 + $0x30] sm:$0xff] }
 0xa1f   :  { %1767 = vmatpush.msra.mxu0 %v1748_v51  ;;  %v1744_v4 = vld [vmem:[%s5518_s11 + $0x10] sm:$0xff] }
 0xa20   :  { %v1674_v55 = vmul.f32 %v4706_v45, %v4706_v45 }
 0xa21   :  { %1768 = vmatpush.msra.mxu0 %v1747_v54 }
 0xa22   :  { %v1678_v23 = vsel %vm65_vm0, %v1674_v55, 0.0 }
 0xa23   :  { %1679 = vadd.xlane.f32.xlu1 %v1678_v23 }
 0xa71   :  { %v1677_v9 = vpop.xlane.xlu2 %1676 }
 0xa72   :  { %v1681_v53 = vmul.f32 %v1677_v9, %v4500_v34 }
 0xa74   :  { %v1683_v29 = vadd.f32 1e-05, %v1681_v53 }
 0xa76   :  { %3939 = vrsqrt.f32 %v1683_v29  ;;  %vm1691_vm12 = vweird.f32 %v1683_v29 }
 0xa7c   :  { %v3940_v2 = vpop.eup %3939 }
 0xa7d   :  { %v1686_v5 = vmul.f32 %v3940_v2, %v1683_v29  ;;  %vm1692_vm11 = vweird.f32 %v3940_v2 }
 0xa7e   :  { %vm1693_vm13 = vmor %vm1691_vm12, %vm1692_vm11 }
 0xa7f   :  { %v1687_v17 = vmul.f32 %v3940_v2, %v1686_v5 }
 0xa81   :  { %v1688_v18 = vmul.f32 0.5, %v1687_v17 }
 0xa83   :  { %v1689_v15 = vsub.f32 1.5, %v1688_v18 }
 0xa85   :  { %v1690_v20 = vmul.f32 %v3940_v2, %v1689_v15 }
 0xa87   :  { %v1694_v21 = vsel %vm1693_vm13, %v3940_v2, %v1690_v20 }
 0xa88   :  { %v1705_v22 = vmul.f32 %v1694_v21, %v1671_v49  ;;  %v1746_v49 = vld [vmem:[%s5518_s11 + $0x20] sm:$0xff] }
 0xa89   :  { %1769 = vmatpush.msra.mxu0 %v1746_v49 }
 0xa8a   :  { %3695 = vmatmul.msk.f32.vlgmr.msrb.gmra.mxu3 %vm65_vm0, %v1705_v22 }
 0xa8b   :  { %1770 = vmatpush.msra.mxu0 %v1745_v41 }
 0xa8d   :  { %1771 = vmatpush.msra.mxu0 %v1744_v4 }
 0xa8f   :  { %1772 = vmatpush.msra.mxu0 %v1743_v1 }
 0xa91   :  { %1773 = vmatpush.msra.mxu0 %v1742_v59 }
 0xa96   :  { %v1680_v31 = vpop.xlane.xlu1 %1679 }
 0xa97   :  { %v1682_v11 = vmul.f32 %v1680_v31, %v4500_v34 }
 0xa99   :  { %v1684_v33 = vadd.f32 1e-05, %v1682_v11 }
 0xa9b   :  { %3941 = vrsqrt.f32 %v1684_v33  ;;  %vm1701_vm15 = vweird.f32 %v1684_v33 }
 0xaa1   :  { %v3942_v52 = vpop.eup %3941 }
 0xaa2   :  { %v1696_v7 = vmul.f32 %v3942_v52, %v1684_v33  ;;  %vm1702_vm14 = vweird.f32 %v3942_v52  ;;  %v3700_v33 = vld [vmem:[%s5512_s5 + $0x38] sm:$0xff] }
 0xaa3   :  { %vm1703_vm2 = vmor %vm1701_vm15, %vm1702_vm14  ;;  %1860 = vmatpush.msra.mxu1 %v3700_v33 }
 0xaa4   :  { %v1697_v50 = vmul.f32 %v3942_v52, %v1696_v7 }
 0xaa5   :  { %1861 = vmatpush.msra.mxu1 %v3699_v28 }
 0xaa6   :  { %v1698_v32 = vmul.f32 0.5, %v1697_v50 }
 0xaa7   :  { %1862 = vmatpush.msra.mxu1 %v3698_v46 }
 0xaa8   :  { %v1699_v55 = vsub.f32 1.5, %v1698_v32 }
 0xaa9   :  { %1863 = vmatpush.msra.mxu1 %v3697_v8 }
 0xaaa   :  { %v1700_v23 = vmul.f32 %v3942_v52, %v1699_v55  ;;  %v3865_v55 = vld [vmem:[%s5519_s12] ss:$0 sm:$0xff] }
 0xaac   :  { %v1704_v63 = vsel %vm1703_vm2, %v3942_v52, %v1700_v23 }
 0xaad   :  { %v1706_v0 = vmul.f32 %v1704_v63, %v4706_v45 }
 0xaaf   :  { %3696 = vmatmul.msk.f32.gmra.mxu3 %vm65_vm0, %v1706_v0 }
 0xb0d   :  { %v1734_v9 = vpop.f32.mrf.mxu3 }
 0xb0e   :  { %v1740_v53 = vmax.f32 %v1734_v9, 0.0 }
 0xb10   :  { %1774 = vmatmul.f32.vlgmr.msra.gmra.mxu0 %v1740_v53 }
 0xb32   :  { %v1737_v29 = vpop.f32.mrf.mxu3 }
 0xb33   :  { %v1741_v2 = vmax.f32 %v1737_v29, 0.0 }
 0xb35   :  { %1777 = vmatmul.f32.gmra.mxu0 %v1741_v2 }
 0xb8d   :  { %v1775_v5 = vpop.f32.mrf.mxu0 }
 0xb8e   :  { %v1776_v45 = vadd.f32 %v1775_v5, %v1705_v22 }
 0xb90   :  { %v1781_v17 = vsel %vm65_vm0, %v1776_v45, 0.0 }
 0xb91   :  { %1782 = vadd.xlane.f32.xlu0 %v1781_v17 }
 0xbb2   :  { %v1778_v18 = vpop.f32.mrf.mxu0 }
 0xbb3   :  { %v1779_v15 = vadd.f32 %v1778_v18, %v1706_v0  ;;  %v3866_v0 = vld [vmem:[%s5520_s13] ss:$0 sm:$0xff] }
 0xbb5   :  { %v1784_v20 = vsel %vm65_vm0, %v1779_v15, 0.0 }
 0xbb6   :  { %1785 = vadd.xlane.f32.xlu2 %v1784_v20 }
 0xc04   :  { %v1783_v21 = vpop.xlane.xlu0 %1782 }
 0xc05   :  { %v1787_v40 = vmul.f32 %v1783_v21, %v4500_v34 }
 0xc07   :  { %v1789_v13 = vsub.f32 %v1776_v45, %v1787_v40 }
 0xc09   :  { %v1791_v14 = vmul.f32 %v1789_v13, %v1789_v13 }
 0xc0b   :  { %v1793_v27 = vsel %vm65_vm0, %v1791_v14, 0.0 }
 0xc0c   :  { %1794 = vadd.xlane.f32.xlu1 %v1793_v27 }
 0xc29   :  { %v1786_v30 = vpop.xlane.xlu2 %1785 }
 0xc2a   :  { %v1788_v31 = vmul.f32 %v1786_v30, %v4500_v34 }
 0xc2c   :  { %v1790_v22 = vsub.f32 %v1779_v15, %v1788_v31 }
 0xc2e   :  { %v1792_v11 = vmul.f32 %v1790_v22, %v1790_v22 }
 0xc30   :  { %v1796_v6 = vsel %vm65_vm0, %v1792_v11, 0.0 }
 0xc31   :  { %1797 = vadd.xlane.f32.xlu0 %v1796_v6 }
 0xc7f   :  { %v1795_v51 = vpop.xlane.xlu1 %1794 }
 0xc80   :  { %v1799_v52 = vmul.f32 %v1795_v51, %v4500_v34 }
 0xc82   :  { %v1801_v54 = vadd.f32 1e-05, %v1799_v52 }
 0xc84   :  { %3943 = vrsqrt.f32 %v1801_v54  ;;  %vm1809_vm4 = vweird.f32 %v1801_v54 }
 0xc8a   :  { %v3944_v7 = vpop.eup %3943 }
 0xc8b   :  { %v1804_v49 = vmul.f32 %v3944_v7, %v1801_v54  ;;  %vm1810_vm3 = vweird.f32 %v3944_v7 }
 0xc8c   :  { %vm1811_vm5 = vmor %vm1809_vm4, %vm1810_vm3 }
 0xc8d   :  { %v1805_v50 = vmul.f32 %v3944_v7, %v1804_v49 }
 0xc8f   :  { %v1806_v41 = vmul.f32 0.5, %v1805_v50 }
 0xc91   :  { %v1807_v32 = vsub.f32 1.5, %v1806_v41 }
 0xc93   :  { %v1808_v4 = vmul.f32 %v3944_v7, %v1807_v32  ;;  %v4023_v32 = vld [vmem:[%s5510_s3] sm:$0xff] }
 0xc95   :  { %v1812_v23 = vsel %vm1811_vm5, %v3944_v7, %v1808_v4 }
 0xc96   :  { %v1823_v63 = vmul.f32 %v1812_v23, %v1789_v13 }
 0xc98   :  { %v1829_v1 = vmul.f32 %v3865_v55, %v1823_v63 }
 0xc9a   :  { %v4801_v59 = vadd.f32 %v3866_v0, %v1829_v1 }
 0xc9c   :  { %3701 = vmatmul.msk.f32.vlgmr.msra.gmra.mxu1 %vm65_vm0, %v4801_v59 }
 0xca4   :  { %v1798_v9 = vpop.xlane.xlu0 %1797 }
 0xca5   :  { %v1800_v53 = vmul.f32 %v1798_v9, %v4500_v34 }
 0xca7   :  { %v1802_v29 = vadd.f32 1e-05, %v1800_v53 }
 0xca9   :  { %3945 = vrsqrt.f32 %v1802_v29  ;;  %vm1819_vm9 = vweird.f32 %v1802_v29 }
 0xcaf   :  { %v3946_v2 = vpop.eup %3945 }
 0xcb0   :  { %v1814_v5 = vmul.f32 %v3946_v2, %v1802_v29  ;;  %vm1820_vm8 = vweird.f32 %v3946_v2 }
 0xcb1   :  { %vm1821_vm10 = vmor %vm1819_vm9, %vm1820_vm8 }
 0xcb2   :  { %v1815_v45 = vmul.f32 %v3946_v2, %v1814_v5 }
 0xcb4   :  { %v1816_v17 = vmul.f32 0.5, %v1815_v45 }
 0xcb6   :  { %v1817_v18 = vsub.f32 1.5, %v1816_v17 }
 0xcb8   :  { %v1818_v15 = vmul.f32 %v3946_v2, %v1817_v18 }
 0xcba   :  { %v1822_v20 = vsel %vm1821_vm10, %v3946_v2, %v1818_v15 }
 0xcbb   :  { %v1824_v21 = vmul.f32 %v1822_v20, %v1790_v22 }
 0xcbd   :  { %v1830_v40 = vmul.f32 %v3865_v55, %v1824_v21 }
 0xcbf   :  { %v4806_v13 = vadd.f32 %v3866_v0, %v1830_v40  ;;  %v4024_v0 = vld [vmem:[%s5510_s3 + $0x8] sm:$0xff] }
 0xcc1   :  { %3702 = vmatmul.msk.f32.gmra.mxu1 %vm65_vm0, %v4806_v13 }
 0xd19   :  { %v4810_v14 = vpop.f32.mrf.mxu1 }
 0xd1a   :  { %1873 = vrot.lane.b32.xlu1 %v4810_v14, %s4055_s18  ;;  %1881 = vrot.lane.b32.xlu0 %v4810_v14, %s4053_s16 }
 0xd3e   :  { %v4816_v27 = vpop.f32.mrf.mxu1 }
 0xd3f   :  { %1883 = vrot.lane.b32.xlu1 %v4816_v27, %s4053_s16  ;;  %1879 = vrot.lane.b32.xlu0 %v4816_v27, %s4054_s17 }
 0xd40   :  { %1875 = vrot.lane.b32.xlu2 %v4816_v27, %s4055_s18 }
 0xd47   :  { %1916 = vrot.lane.b32.xlu1 %v4816_v27, %s4056_s0 }
 0xd48   :  { %1877 = vrot.lane.b32.xlu2 %v4810_v14, %s4054_s17 }
 0xd50   :  { %1890 = vrot.lane.b32.xlu2 %v4810_v14, %s4056_s0 }
 0xd8c   :  { %v4830_v30 = vpop.permute.xlu1 %1873  ;;  %v4838_v22 = vpop.permute.xlu0 %1881 }
 0xd8d   :  { %1942 = vrot.lane.b32.xlu2 %v4830_v30, %s4056_s0 }
 0xd9a   :  { %v4834_v31 = vpop.permute.xlu2 %1875 }
 0xd9b   :  { %1968 = vrot.lane.b32.xlu0 %v4834_v31, %s4056_s0 }
 0xda2   :  { %v4840_v11 = vpop.permute.xlu2 %1877 }
 0xda3   :  { %1994 = vrot.lane.b32.xlu1 %v4840_v11, %s4056_s0  ;;  %2046 = vrot.lane.b32.xlu0 %v4838_v22, %s4056_s0 }
 0xdaa   :  { %v1891_v6 = vpop.permute.xlu2 %1890 }
 0xdab   :  { %3707 = vmatpush.xpose.msk.msra.mxu2 %vm162_vm1, %v1891_v6 }
 0xdae   :  { %3708 = vmatmul.msk.f32.vlgmr.msra.gmra.mxu2 %vm162_vm1, %v4810_v14 }
 0xdb1   :  { %v4849_v33 = vpop.permute.xlu1 %1883  ;;  %v4851_v28 = vpop.permute.xlu0 %1879 }
 0xdb2   :  { %2072 = vrot.lane.b32.xlu0 %v4849_v33, %s4056_s0  ;;  %2020 = vrot.lane.b32.xlu2 %v4851_v28, %s4056_s0 }
 0xdb9   :  { %v1917_v46 = vpop.permute.xlu1 %1916 }
 0xdba   :  { %3709 = vmatpush.xpose.msk.msra.mxu3 %vm162_vm1, %v1917_v46 }
 0xdbd   :  { %3710 = vmatmul.msk.f32.vlgmr.msra.gmra.mxu3 %vm162_vm1, %v4816_v27 }
 0xde7   :  { %v1943_v8 = vpop.permute.xlu2 %1942 }
 0xde8   :  { %3711 = vmatpush.xpose.msk.msrb.mxu1 %vm162_vm1, %v1943_v8 }
 0xdeb   :  { %3712 = vmatmul.msk.f32.vlgmr.msrb.gmra.mxu1 %vm162_vm1, %v4830_v30 }
 0xe0c   :  { %v2021_v51 = vpop.permute.xlu2 %2020 }
 0xe0d   :  { %v1969_v52 = vpop.permute.xlu0 %1968  ;;  %3717 = vmatpush.xpose.msk.msra.mxu1 %vm162_vm1, %v2021_v51 }
 0xe0e   :  { %3713 = vmatpush.xpose.msk.msrb.mxu2 %vm162_vm1, %v1969_v52 }
 0xe10   :  { %3718 = vmatmul.msk.f32.vlgmr.msra.gmra.mxu1 %vm162_vm1, %v4851_v28 }
 0xe11   :  { %3714 = vmatmul.msk.f32.vlgmr.msrb.gmra.mxu2 %vm162_vm1, %v4834_v31 }
 0xe15   :  { %v1995_v54 = vpop.permute.xlu1 %1994  ;;  %v2047_v7 = vpop.permute.xlu0 %2046 }
 0xe16   :  { %3715 = vmatpush.xpose.msk.msrb.mxu3 %vm162_vm1, %v1995_v54  ;;  %3719 = vmatpush.xpose.msk.msra.mxu2 %vm162_vm1, %v2047_v7 }
 0xe19   :  { %3716 = vmatmul.msk.f32.vlgmr.msrb.gmra.mxu3 %vm162_vm1, %v4840_v11  ;;  %3720 = vmatmul.msk.f32.vlgmr.msra.gmra.mxu2 %vm162_vm1, %v4838_v22 }
 0xe24   :  { %v2073_v49 = vpop.permute.xlu0 %2072 }
 0xe25   :  { %3721 = vmatpush.xpose.msk.msra.mxu3 %vm162_vm1, %v2073_v49 }
 0xe28   :  { %3722 = vmatmul.msk.f32.vlgmr.msra.gmra.mxu3 %vm162_vm1, %v4849_v33 }
 0xe31   :  { %v1913_v50 = vpop.f32.mrf.mxu2 }
 0xe32   :  { %v2098_v41 = vmul.f32 0.35355338, %v1913_v50 }
 0xe34   :  { %v2106_v4 = vadd.f32 %v4023_v32, %v2098_v41 }
 0xe36   :  { %v2114_v55 = vsel %vm162_vm1, %v2106_v4, -inf }
 0xe37   :  { %2115 = vmax.xlane.f32.xlu2 %v2114_v55 }
 0xe40   :  { %v1939_v23 = vpop.f32.mrf.mxu3 }
 0xe41   :  { %v2099_v63 = vmul.f32 0.35355338, %v1939_v23 }
 0xe43   :  { %v2107_v1 = vadd.f32 %v4024_v0, %v2099_v63 }
 0xe45   :  { %v2117_v9 = vsel %vm162_vm1, %v2107_v1, -inf }
 0xe46   :  { %2118 = vmax.xlane.f32.xlu1 %v2117_v9 }
 0xe68   :  { %v1965_v53 = vpop.f32.mrf.mxu1 }
 0xe69   :  { %v2100_v29 = vmul.f32 0.35355338, %v1965_v53 }
 0xe6b   :  { %v2108_v2 = vadd.f32 %v4023_v32, %v2100_v29  ;;  %v3840_v29 = vpack.i.bf16 %v4840_v11, %v4838_v22  ;;  %v3835_v22 = vpack.i.bf16 %v4810_v14, %v4830_v30 }
 0xe6d   :  { %v2120_v5 = vsel %vm162_vm1, %v2108_v2, -inf }
 0xe6e   :  { %2121 = vmax.xlane.f32.xlu1 %v2120_v5 }
 0xe8d   :  { %v2043_v46 = vpop.f32.mrf.mxu1 }
 0xe8e   :  { %v2103_v52 = vmul.f32 0.35355338, %v2043_v46 }
 0xe90   :  { %v2111_v49 = vadd.f32 %v4024_v0, %v2103_v52 }
 0xe92   :  { %v2129_v50 = vsel %vm162_vm1, %v2111_v49, -inf }
 0xe94   :  { %v1991_v45 = vpop.f32.mrf.mxu2 }
 0xe95   :  { %v2101_v17 = vmul.f32 0.35355338, %v1991_v45 }
 0xe97   :  { %v2109_v18 = vadd.f32 %v4024_v0, %v2101_v17 }
 0xe99   :  { %v2123_v15 = vsel %vm162_vm1, %v2109_v18, -inf }
 0xe9a   :  { %2124 = vmax.xlane.f32.xlu0 %v2123_v15 }
 0xe9c   :  { %v2017_v20 = vpop.f32.mrf.mxu3  ;;  %v2069_v21 = vpop.f32.mrf.mxu2 }
 0xe9d   :  { %v2102_v40 = vmul.f32 0.35355338, %v2017_v20  ;;  %v2104_v6 = vmul.f32 0.35355338, %v2069_v21 }
 0xe9f   :  { %v2110_v8 = vadd.f32 %v4023_v32, %v2102_v40  ;;  %v2112_v51 = vadd.f32 %v4023_v32, %v2104_v6 }
 0xea1   :  { %v2126_v54 = vsel %vm162_vm1, %v2110_v8, -inf  ;;  %v2132_v7 = vsel %vm162_vm1, %v2112_v51, -inf }
 0xea2   :  { %2127 = vmax.xlane.f32.xlu2 %v2126_v54  ;;  %2133 = vmax.xlane.f32.xlu0 %v2132_v7 }
 0xeaa   :  { %2130 = vmax.xlane.f32.xlu2 %v2129_v50  ;;  %v2116_v41 = vpop.xlane.xlu2 %2115 }
 0xeab   :  { %v2138_v55 = vsub.f32 %v2106_v4, %v2116_v41  ;;  %v2095_v23 = vpop.f32.mrf.mxu3 }
 0xeac   :  { %v2105_v63 = vmul.f32 0.35355338, %v2095_v23 }
 0xead   :  { %v2146_v9 = vmul.f32 1.442695, %v2138_v55 }
 0xeae   :  { %v2113_v53 = vadd.f32 %v4024_v0, %v2105_v63 }
 0xeaf   :  { %3947 = vpow2.f32 %v2146_v9 }
 0xeb0   :  { %v2135_v32 = vsel %vm162_vm1, %v2113_v53, -inf }
 0xeb1   :  { %2136 = vmax.xlane.f32.xlu1 %v2135_v32 }
 0xeb5   :  { %v4894_v5 = vpop.eup %3947 }
 0xeb6   :  { %3841 = vrot.lane.b32.xlu0 %v3840_v29, %s4057_s20  ;;  %v2162_v45 = vsel %vm162_vm1, %v4894_v5, 0.0 }
 0xeb7   :  { %2163 = vadd.xlane.f32.xlu2 %v2162_v45 }
 0xeb9   :  { %v2119_v4 = vpop.xlane.xlu1 %2118 }
 0xeba   :  { %v2139_v17 = vsub.f32 %v2107_v1, %v2119_v4 }
 0xebc   :  { %v2148_v15 = vmul.f32 1.442695, %v2139_v17 }
 0xebe   :  { %3949 = vpow2.f32 %v2148_v15 }
 0xec4   :  { %v4899_v0 = vpop.eup %3949 }
 0xec5   :  { %v2165_v20 = vsel %vm162_vm1, %v4899_v0, 0.0 }
 0xec6   :  { %2166 = vadd.xlane.f32.xlu2 %v2165_v20 }
 0xeca   :  { %3836 = vrot.lane.b32.xlu1 %v3835_v22, %s4057_s20 }
 0xee1   :  { %v2122_v11 = vpop.xlane.xlu1 %2121 }
 0xee2   :  { %v2140_v21 = vsub.f32 %v2108_v2, %v2122_v11 }
 0xee4   :  { %v2150_v40 = vmul.f32 1.442695, %v2140_v21 }
 0xee6   :  { %3951 = vpow2.f32 %v2150_v40 }
 0xeec   :  { %v4906_v6 = vpop.eup %3951 }
 0xeed   :  { %v2168_v1 = vsel %vm162_vm1, %v4906_v6, 0.0 }
 0xeee   :  { %2169 = vadd.xlane.f32.xlu0 %v2168_v1 }
 0xf0d   :  { %v2125_v46 = vpop.xlane.xlu0 %2124 }
 0xf0e   :  { %v2141_v41 = vsub.f32 %v2109_v18, %v2125_v46 }
 0xf10   :  { %v2152_v30 = vmul.f32 1.442695, %v2141_v41 }
 0xf15   :  { %v2128_v52 = vpop.xlane.xlu2 %2127  ;;  %v2134_v54 = vpop.xlane.xlu0 %2133 }
 0xf16   :  { %v2142_v7 = vsub.f32 %v2110_v8, %v2128_v52  ;;  %v2144_v50 = vsub.f32 %v2112_v51, %v2134_v54 }
 0xf18   :  { %v2154_v55 = vmul.f32 1.442695, %v2142_v7  ;;  %v2158_v14 = vmul.f32 1.442695, %v2144_v50  ;;  %v3845_v50 = vpack.i.bf16 %v4851_v28, %v4834_v31 }
 0xf1a   :  { %3953 = vpow2.f32 %v2154_v55 }
 0xf1b   :  { %3955 = vpow2.f32 %v2158_v14 }
 0xf1c   :  { %3957 = vpow2.f32 %v2152_v30 }
 0xf1d   :  { %v2131_v2 = vpop.xlane.xlu2 %2130 }
 0xf1e   :  { %v2143_v23 = vsub.f32 %v2111_v49, %v2131_v2 }
 0xf20   :  { %v4910_v63 = vpop.eup %3953  ;;  %v2156_v9 = vmul.f32 1.442695, %v2143_v23 }
 0xf21   :  { %v4912_v32 = vpop.eup %3955  ;;  %v2174_v29 = vsel %vm162_vm1, %v4910_v63, 0.0 }
 0xf22   :  { %3959 = vpow2.f32 %v2156_v9  ;;  %2175 = vadd.xlane.f32.xlu0 %v2174_v29  ;;  %v2180_v18 = vsel %vm162_vm1, %v4912_v32, 0.0  ;;  %v4918_v45 = vpop.eup %3957 }
 0xf23   :  { %2181 = vadd.xlane.f32.xlu1 %v2180_v18  ;;  %v2171_v15 = vsel %vm162_vm1, %v4918_v45, 0.0 }
 0xf24   :  { %v2137_v8 = vpop.xlane.xlu1 %2136 }
 0xf25   :  { %v2145_v51 = vsub.f32 %v2113_v53, %v2137_v8 }
 0xf27   :  { %v2160_v49 = vmul.f32 1.442695, %v2145_v51 }
 0xf28   :  { %v4920_v4 = vpop.eup %3959  ;;  %v3842_v55 = vpop.permute.xlu0 %3841 }
 0xf29   :  { %3961 = vpow2.f32 %v2160_v49  ;;  %v2177_v17 = vsel %vm162_vm1, %v4920_v4, 0.0  ;;  %v3843_v9 = vunpack.i.l.bf16 %v3842_v55  ;;  %v3844_v18 = vunpack.i.h.bf16 %v3842_v55 }
 0xf2a   :  { %2178 = vadd.xlane.f32.xlu2 %v2177_v17  ;;  %v2164_v20 = vpop.xlane.xlu2 %2163  ;;  %2172 = vadd.xlane.f32.xlu0 %v2171_v15 }
 0xf2b   :  { %3963 = vrcp.f32 %v2164_v20  ;;  %v2197_v1 = vand.u32 2147483648, %v2164_v20  ;;  %v2195_v52 = vand.u32 2147483647, %v2164_v20  ;;  %vm2191_vm12 = vweird.f32 %v2164_v20 }
 0xf2d   :  { %v2198_v7 = vor.u32 1.1754944e-38, %v2197_v1  ;;  %vm2196_vm14 = vcmp.eq.f32.partialorder %v2195_v52, 8.507059e+37 }
 0xf2f   :  { %v4926_v22 = vpop.eup %3961 }
 0xf30   :  { %v2183_v53 = vsel %vm162_vm1, %v4926_v22, 0.0 }
 0xf31   :  { %v3964_v11 = vpop.eup %3963 }
 0xf32   :  { %v2187_v21 = vmul.f32 %v3964_v11, %v2164_v20  ;;  %2184 = vadd.xlane.f32.xlu2 %v2183_v53  ;;  %vm2192_vm11 = vweird.f32 %v3964_v11 }
 0xf33   :  { %vm2193_vm13 = vmor %vm2191_vm12, %vm2192_vm11 }
 0xf34   :  { %v2188_v40 = vsub.f32 1.0, %v2187_v21 }
 0xf36   :  { %v2189_v46 = vmul.f32 %v3964_v11, %v2188_v40 }
 0xf38   :  { %v2190_v54 = vadd.f32 %v3964_v11, %v2189_v46 }
 0xf3a   :  { %v2194_v41 = vsel %vm2193_vm13, %v3964_v11, %v2190_v54 }
 0xf3b   :  { %v2199_v14 = vsel %vm2196_vm14, %v2198_v7, %v2194_v41 }
 0xf3c   :  { %3846 = vrot.lane.b32.xlu1 %v3845_v50, %s4057_s20  ;;  %v3837_v30 = vpop.permute.xlu1 %3836  ;;  %v4936_v29 = vmul.f32 %v4894_v5, %v2199_v14 }
 0xf3d   :  { %v3839_v2 = vunpack.i.h.bf16 %v3837_v30  ;;  %v3838_v23 = vunpack.i.l.bf16 %v3837_v30 }
 0xf3e   :  { %2488 = vrot.lane.b32.xlu0 %v4849_v33, %s4057_s20 }
 0xf3f   :  { %2327 = vmatpush.msrb.mxu1 %v3839_v2  ;;  %2379 = vmatpush.msrb.mxu3 %v3838_v23 }
 0xf40   :  { %3723 = vmatmul.msk.f32.vlgmr.msrb.gmra.mxu1 %vm162_vm1, %v4936_v29 }
 0xf41   :  { %2483 = vmatpush.msra.mxu3 %v3843_v9  ;;  %2431 = vmatpush.msra.mxu1 %v3844_v18 }
 0xf4a   :  { %2332 = vrot.lane.b32.xlu2 %v4816_v27, %s4057_s20  ;;  %v2167_v27 = vpop.xlane.xlu2 %2166 }
 0xf4b   :  { %vm2206_vm5 = vweird.f32 %v2167_v27 }
 0xf61   :  { %v2170_v31 = vpop.xlane.xlu0 %2169 }
 0xf62   :  { %3965 = vrcp.f32 %v2170_v31  ;;  %v2227_v33 = vand.u32 2147483648, %v2170_v31  ;;  %v2225_v5 = vand.u32 2147483647, %v2170_v31  ;;  %vm2221_vm2 = vweird.f32 %v2170_v31 }
 0xf63   :  { %3967 = vrcp.f32 %v2167_v27 }
 0xf64   :  { %v2228_v15 = vor.u32 1.1754944e-38, %v2227_v33  ;;  %vm2226_vm4 = vcmp.eq.f32.partialorder %v2225_v5, 8.507059e+37 }
 0xf68   :  { %v3966_v28 = vpop.eup %3965 }
 0xf69   :  { %v2217_v8 = vmul.f32 %v3966_v28, %v2170_v31  ;;  %vm2222_vm15 = vweird.f32 %v3966_v28  ;;  %v4947_v21 = vpop.eup %3967 }
 0xf6a   :  { %vm2223_vm3 = vmor %vm2221_vm2, %vm2222_vm15  ;;  %v2202_v46 = vmul.f32 %v4947_v21, %v2167_v27  ;;  %vm2207_vm10 = vweird.f32 %v4947_v21 }
 0xf6b   :  { %v2218_v51 = vsub.f32 1.0, %v2217_v8  ;;  %vm4968_vm2 = vmor %vm2206_vm5, %vm2207_vm10 }
 0xf6c   :  { %v2203_v52 = vsub.f32 1.0, %v2202_v46 }
 0xf6d   :  { %v2219_v49 = vmul.f32 %v3966_v28, %v2218_v51 }
 0xf6e   :  { %v2204_v14 = vmul.f32 %v4947_v21, %v2203_v52 }
 0xf6f   :  { %v2220_v17 = vadd.f32 %v3966_v28, %v2219_v49 }
 0xf70   :  { %v2205_v33 = vadd.f32 %v4947_v21, %v2204_v14 }
 0xf71   :  { %v2224_v20 = vsel %vm2223_vm3, %v3966_v28, %v2220_v17  ;;  %v2210_v28 = vand.u32 2147483647, %v2167_v27  ;;  %v2212_v17 = vand.u32 2147483648, %v2167_v27 }
 0xf72   :  { %v2229_v53 = vsel %vm2226_vm4, %v2228_v15, %v2224_v20 }
 0xf73   :  { %v4943_v11 = vmul.f32 %v4906_v6, %v2229_v53  ;;  %vm2211_vm4 = vcmp.eq.f32.partialorder %v2210_v28, 8.507059e+37 }
 0xf75   :  { %3725 = vmatmul.msk.f32.vlgmr.msrb.gmra.mxu3 %vm162_vm1, %v4943_v11 }
 0xf95   :  { %v2176_v40 = vpop.xlane.xlu0 %2175 }
 0xf96   :  { %v2182_v1 = vpop.xlane.xlu1 %2181  ;;  %3969 = vrcp.f32 %v2176_v40  ;;  %v2257_v23 = vand.u32 2147483648, %v2176_v40  ;;  %v2255_v31 = vand.u32 2147483647, %v2176_v40  ;;  %vm2251_vm11 = vweird.f32 %v2176_v40 }
 0xf97   :  { %3971 = vrcp.f32 %v2182_v1  ;;  %v2287_v9 = vand.u32 2147483648, %v2182_v1  ;;  %v2285_v51 = vand.u32 2147483647, %v2182_v1  ;;  %vm2281_vm12 = vweird.f32 %v2182_v1 }
 0xf98   :  { %v2258_v20 = vor.u32 1.1754944e-38, %v2257_v23  ;;  %vm2256_vm15 = vcmp.eq.f32.partialorder %v2255_v31, 8.507059e+37 }
 0xf99   :  { %v2288_v46 = vor.u32 1.1754944e-38, %v2287_v9  ;;  %vm2286_vm3 = vcmp.eq.f32.partialorder %v2285_v51, 8.507059e+37  ;;  %v2213_v9 = vor.u32 1.1754944e-38, %v2212_v17 }
 0xf9c   :  { %v3970_v54 = vpop.eup %3969 }
 0xf9d   :  { %v3972_v7 = vpop.eup %3971  ;;  %v2247_v50 = vmul.f32 %v3970_v54, %v2176_v40  ;;  %v4950_v41 = vpop.xlane.xlu2 %2178  ;;  %vm2252_vm8 = vweird.f32 %v3970_v54 }
 0xf9e   :  { %v4952_v6 = vpop.xlane.xlu0 %2172  ;;  %v2277_v55 = vmul.f32 %v3972_v7, %v2182_v1  ;;  %3973 = vrcp.f32 %v4950_v41  ;;  %vm2282_vm9 = vweird.f32 %v3972_v7  ;;  %vm2253_vm13 = vmor %vm2251_vm11, %vm2252_vm8  ;;  %vm2266_vm10 = vweird.f32 %v4950_v41 }
 0xf9f   :  { %v2248_v30 = vsub.f32 1.0, %v2247_v50  ;;  %3975 = vrcp.f32 %v4952_v6  ;;  %vm2283_vm14 = vmor %vm2281_vm12, %vm2282_vm9  ;;  %v2242_v31 = vand.u32 2147483648, %v4952_v6  ;;  %vm2236_vm9 = vweird.f32 %v4952_v6 }
 0xfa0   :  { %v2278_v2 = vsub.f32 1.0, %v2277_v55  ;;  %v2270_v17 = vand.u32 2147483647, %v4950_v41 }
 0xfa1   :  { %v2249_v18 = vmul.f32 %v3970_v54, %v2248_v30 }
 0xfa2   :  { %v2279_v8 = vmul.f32 %v3972_v7, %v2278_v2 }
 0xfa3   :  { %v2250_v49 = vadd.f32 %v3970_v54, %v2249_v18 }
 0xfa4   :  { %v4959_v5 = vpop.eup %3973  ;;  %v2280_v15 = vadd.f32 %v3972_v7, %v2279_v8 }
 0xfa5   :  { %v3976_v53 = vpop.eup %3975  ;;  %v2254_v52 = vsel %vm2253_vm13, %v3970_v54, %v2250_v49  ;;  %v2262_v50 = vmul.f32 %v4959_v5, %v4950_v41  ;;  %v4963_v55 = vpop.xlane.xlu2 %2184  ;;  %v2209_v54 = vsel %vm4968_vm2, %v4947_v21, %v2205_v33  ;;  %v2240_v21 = vand.u32 2147483647, %v4952_v6 }
 0xfa6   :  { %v2284_v1 = vsel %vm2283_vm14, %v3972_v7, %v2280_v15  ;;  %v2259_v14 = vsel %vm2256_vm15, %v2258_v20, %v2254_v52  ;;  %v2232_v30 = vmul.f32 %v3976_v53, %v4952_v6  ;;  %3977 = vrcp.f32 %v4963_v55  ;;  %v3704_v52 = vld [vmem:[%s5513_s6 + $0x28] sm:$0xff] }
 0xfa7   :  { %v2289_v2 = vsel %vm2286_vm3, %v2288_v46, %v2284_v1  ;;  %v2263_v23 = vsub.f32 1.0, %v2262_v50  ;;  %v4978_v27 = vmul.f32 %v4910_v63, %v2259_v14  ;;  %v2214_v51 = vsel %vm2211_vm4, %v2213_v9, %v2209_v54 }
 0xfa8   :  { %v2233_v18 = vsub.f32 1.0, %v2232_v30  ;;  %v4983_v8 = vmul.f32 %v4912_v32, %v2289_v2  ;;  %vm2237_vm5 = vweird.f32 %v3976_v53  ;;  %vm2267_vm8 = vweird.f32 %v4959_v5 }
 0xfa9   :  { %v2264_v7 = vmul.f32 %v4959_v5, %v2263_v23  ;;  %3727 = vmatmul.msk.f32.vlgmr.msra.gmra.mxu1 %vm162_vm1, %v4978_v27  ;;  %v2272_v63 = vand.u32 2147483648, %v4950_v41  ;;  %vm2238_vm11 = vmor %vm2236_vm9, %vm2237_vm5  ;;  %v2243_v15 = vor.u32 1.1754944e-38, %v2242_v31  ;;  %v4997_v46 = vmul.f32 %v4899_v0, %v2214_v51 }
 0xfaa   :  { %v2234_v49 = vmul.f32 %v3976_v53, %v2233_v18  ;;  %3729 = vmatmul.msk.f32.vlgmr.msra.gmra.mxu3 %vm162_vm1, %v4983_v8  ;;  %vm4999_vm12 = vmor %vm2266_vm10, %vm2267_vm8  ;;  %vm2241_vm13 = vcmp.eq.f32.partialorder %v2240_v21, 8.507059e+37  ;;  %vm2271_vm14 = vcmp.eq.f32.partialorder %v2270_v17, 8.507059e+37  ;;  %v2302_v23 = vand.u32 2147483648, %v4963_v55 }
 0xfab   :  { %v2265_v33 = vadd.f32 %v4959_v5, %v2264_v7  ;;  %v2273_v0 = vor.u32 1.1754944e-38, %v2272_v63  ;;  %vm2296_vm2 = vweird.f32 %v4963_v55 }
 0xfac   :  { %v2235_v28 = vadd.f32 %v3976_v53, %v2234_v49  ;;  %v3978_v32 = vpop.eup %3977 }
 0xfad   :  { %v2333_v20 = vpop.permute.xlu2 %2332  ;;  %v2292_v40 = vmul.f32 %v3978_v32, %v4963_v55  ;;  %v2269_v41 = vsel %vm4999_vm12, %v4959_v5, %v2265_v33  ;;  %vm2297_vm15 = vweird.f32 %v3978_v32  ;;  %v2300_v5 = vand.u32 2147483647, %v4963_v55 }
 0xfae   :  { %v2239_v50 = vsel %vm2238_vm11, %v3976_v53, %v2235_v28  ;;  %v3847_v6 = vpop.permute.xlu1 %3846  ;;  %2353 = vmatpush.msrb.mxu2 %v2333_v20  ;;  %v2274_v9 = vsel %vm2271_vm14, %v2273_v0, %v2269_v41  ;;  %vm2298_vm3 = vmor %vm2296_vm2, %vm2297_vm15  ;;  %v3705_v20 = vld [vmem:[%s5513_s6 + $0x30] sm:$0xff] }
 0xfaf   :  { %v2244_v1 = vsel %vm2241_vm13, %v2243_v15, %v2239_v50  ;;  %v3849_v14 = vunpack.i.h.bf16 %v3847_v6  ;;  %v3848_v30 = vunpack.i.l.bf16 %v3847_v6  ;;  %3724 = vmatmul.msk.f32.vlgmr.msrb.gmra.mxu2 %vm162_vm1, %v4997_v46  ;;  %v2293_v54 = vsub.f32 1.0, %v2292_v40  ;;  %v3706_v15 = vld [vmem:[%s5513_s6 + $0x38] sm:$0xff]  ;;  %v3703_v50 = vld [vmem:[%s5513_s6 + $0x20] sm:$0xff] }
 0xfb0   :  { %v2489_v2 = vpop.permute.xlu0 %2488  ;;  %v5010_v53 = vmul.f32 %v4918_v45, %v2244_v1  ;;  %v2303_v45 = vor.u32 1.1754944e-38, %v2302_v23  ;;  %v5018_v31 = vmul.f32 %v4920_v4, %v2274_v9  ;;  %vm2301_vm4 = vcmp.eq.f32.partialorder %v2300_v5, 8.507059e+37  ;;  %2586 = vmatpush.msrb.mxu1 %v3706_v15 }
 0xfb1   :  { %2405 = vmatpush.msrb.mxu0 %v3848_v30  ;;  %2457 = vmatpush.msra.mxu2 %v3849_v14  ;;  %v2294_v18 = vmul.f32 %v3978_v32, %v2293_v54 }
 0xfb2   :  { %3726 = vmatmul.msk.f32.vlgmr.msrb.gmra.mxu0 %vm162_vm1, %v5010_v53  ;;  %2587 = vmatpush.msrb.mxu1 %v3705_v20 }
 0xfb3   :  { %2509 = vmatpush.msra.mxu0 %v2489_v2  ;;  %v2295_v7 = vadd.f32 %v3978_v32, %v2294_v18 }
 0xfb4   :  { %2588 = vmatpush.msrb.mxu1 %v3704_v52 }
 0xfb5   :  { %v2299_v51 = vsel %vm2298_vm3, %v3978_v32, %v2295_v7 }
 0xfb6   :  { %v2304_v49 = vsel %vm2301_vm4, %v2303_v45, %v2299_v51  ;;  %2589 = vmatpush.msrb.mxu1 %v3703_v50 }
 0xfb7   :  { %3728 = vmatmul.msk.f32.vlgmr.msra.gmra.mxu2 %vm162_vm1, %v5018_v31  ;;  %v5023_v21 = vmul.f32 %v4926_v22, %v2304_v49 }
 0xfba   :  { %3730 = vmatmul.msk.f32.vlgmr.msra.gmra.mxu0 %vm162_vm1, %v5023_v21 }
 0xfbd   :  { %v2329_v55 = vpop.f32.mrf.mxu1 }
 0xff8   :  { %v2381_v33 = vpop.f32.mrf.mxu3 }
 0xff9   :  { %2516 = vrot.lane.b32.xlu1 %v2381_v33, %s4058_s29 }
0x1026   :  { %v2433_v63 = vpop.f32.mrf.mxu1 }
0x1027   :  { %2524 = vrot.lane.b32.xlu0 %v2433_v63, %s4059_s30 }
0x102d   :  { %v2485_v4 = vpop.f32.mrf.mxu3 }
0x102e   :  { %2532 = vrot.lane.b32.xlu1 %v2485_v4, %s4060_s1 }
0x102f   :  { %v2407_v28 = vpop.f32.mrf.mxu0 }
0x1030   :  { %2518 = vrot.lane.b32.xlu2 %v2407_v28, %s4058_s29 }
0x1032   :  { %v2355_v32 = vpop.f32.mrf.mxu2 }
0x1037   :  { %v2511_v17 = vpop.f32.mrf.mxu0 }
0x1038   :  { %2534 = vrot.lane.b32.xlu1 %v2511_v17, %s4060_s1 }
0x103a   :  { %v2459_v22 = vpop.f32.mrf.mxu2 }
0x103b   :  { %2526 = vrot.lane.b32.xlu0 %v2459_v22, %s4059_s30 }
0x106b   :  { %v2517_v40 = vpop.permute.xlu1 %2516 }
0x106c   :  { %v2538_v41 = vsel %vm162_vm1, %v2329_v55, %v2517_v40 }
0x108a   :  { %v2519_v0 = vpop.permute.xlu2 %2518 }
0x108b   :  { %v2539_v54 = vsel %vm162_vm1, %v2355_v32, %v2519_v0 }
0x1099   :  { %v2525_v6 = vpop.permute.xlu0 %2524 }
0x109a   :  { %v2540_v1 = vsel %vm811_vm6, %v2538_v41, %v2525_v6  ;;  %v3736_v6 = vld [vmem:[%s5514_s7 + $0x38] sm:$0xff]  ;;  %v3735_v41 = vld [vmem:[%s5514_s7 + $0x30] sm:$0xff] }
0x109b   :  { %2664 = vmatpush.msrb.mxu2 %v3736_v6 }
0x109d   :  { %2665 = vmatpush.msrb.mxu2 %v3735_v41 }
0x10a0   :  { %v2533_v14 = vpop.permute.xlu1 %2532 }
0x10a1   :  { %v2542_v30 = vsel %vm814_vm7, %v2540_v1, %v2533_v14  ;;  %v3734_v1 = vld [vmem:[%s5514_s7 + $0x28] sm:$0xff]  ;;  %v3733_v14 = vld [vmem:[%s5514_s7 + $0x20] sm:$0xff] }
0x10a2   :  { %3731 = vmatmul.msk.f32.vlgmr.msrb.gmra.mxu1 %vm65_vm0, %v2542_v30  ;;  %2666 = vmatpush.msrb.mxu2 %v3734_v1 }
0x10a4   :  { %2667 = vmatpush.msrb.mxu2 %v3733_v14 }
0x10aa   :  { %v2535_v23 = vpop.permute.xlu1 %2534 }
0x10ad   :  { %v2527_v2 = vpop.permute.xlu0 %2526 }
0x10ae   :  { %v2541_v9 = vsel %vm811_vm6, %v2539_v54, %v2527_v2 }
0x10af   :  { %v2543_v18 = vsel %vm814_vm7, %v2541_v9, %v2535_v23 }
0x10b0   :  { %3732 = vmatmul.msk.f32.gmra.mxu1 %vm65_vm0, %v2543_v18 }
0x111f   :  { %v2591_v5 = vpop.f32.mrf.mxu1 }
0x1120   :  { %v2592_v7 = vadd.f32 %v2591_v5, %v4801_v59 }
0x1122   :  { %v2597_v45 = vsel %vm65_vm0, %v2592_v7, 0.0 }
0x1123   :  { %2598 = vadd.xlane.f32.xlu2 %v2597_v45 }
0x112d   :  { %v2594_v51 = vpop.f32.mrf.mxu1 }
0x112e   :  { %v2595_v49 = vadd.f32 %v2594_v51, %v4806_v13 }
0x1130   :  { %v2600_v33 = vsel %vm65_vm0, %v2595_v49, 0.0 }
0x1131   :  { %2601 = vadd.xlane.f32.xlu0 %v2600_v33 }
0x1145   :  { %2694 = vrot.lane.b32.xlu0 %v4266_v36, %s4057_s20 }
0x114d   :  { %2850 = vrot.lane.b32.xlu0 %v4550_v25, %s4057_s20 }
0x1155   :  { %2720 = vrot.lane.b32.xlu0 %v4268_v37, %s4057_s20 }
0x115d   :  { %2798 = vrot.lane.b32.xlu0 %v4506_v35, %s4057_s20 }
0x1196   :  { %v2599_v59 = vpop.xlane.xlu2 %2598 }
0x1197   :  { %v2603_v55 = vmul.f32 %v2599_v59, %v4500_v34 }
0x1199   :  { %v2605_v63 = vsub.f32 %v2592_v7, %v2603_v55 }
0x119b   :  { %v2607_v13 = vmul.f32 %v2605_v63, %v2605_v63 }
0x119d   :  { %v2609_v4 = vsel %vm65_vm0, %v2607_v13, 0.0 }
0x119e   :  { %2610 = vadd.xlane.f32.xlu1 %v2609_v4 }
0x11a4   :  { %v2602_v28 = vpop.xlane.xlu0 %2601 }
0x11a5   :  { %v2604_v32 = vmul.f32 %v2602_v28, %v4500_v34 }
0x11a7   :  { %v2606_v17 = vsub.f32 %v2595_v49, %v2604_v32 }
0x11a9   :  { %v2608_v22 = vmul.f32 %v2606_v17, %v2606_v17 }
0x11ab   :  { %v2612_v15 = vsel %vm65_vm0, %v2608_v22, 0.0 }
0x11ac   :  { %2613 = vadd.xlane.f32.xlu2 %v2612_v15 }
0x11b7   :  { %v2695_v20 = vpop.permute.xlu0 %2694  ;;  %2746 = vrot.lane.b32.xlu1 %v4526_v24, %s4057_s20 }
0x11b8   :  { %3743 = vmatpush.xpose.msk.msrb.mxu3 %vm162_vm1, %v2695_v20 }
0x11bf   :  { %v2851_v52 = vpop.permute.xlu0 %2850 }
0x11c7   :  { %v2721_v50 = vpop.permute.xlu0 %2720 }
0x11c8   :  { %3745 = vmatpush.xpose.msk.msrb.mxu0 %vm162_vm1, %v2721_v50 }
0x11cf   :  { %v2799_v40 = vpop.permute.xlu0 %2798 }
0x11d0   :  { %3751 = vmatpush.xpose.msk.msra.mxu1 %vm162_vm1, %v2799_v40 }
0x1211   :  { %v2611_v30 = vpop.xlane.xlu1 %2610 }
0x1212   :  { %v2615_v0 = vmul.f32 %v2611_v30, %v4500_v34 }
0x1214   :  { %v2617_v54 = vadd.f32 1e-05, %v2615_v0 }
0x1216   :  { %3979 = vrsqrt.f32 %v2617_v54  ;;  %vm2625_vm8 = vweird.f32 %v2617_v54 }
0x121c   :  { %v3980_v2 = vpop.eup %3979 }
0x121d   :  { %v2620_v23 = vmul.f32 %v3980_v2, %v2617_v54  ;;  %vm2626_vm5 = vweird.f32 %v3980_v2 }
0x121e   :  { %vm2627_vm9 = vmor %vm2625_vm8, %vm2626_vm5 }
0x121f   :  { %v2614_v9 = vpop.xlane.xlu2 %2613  ;;  %v2621_v18 = vmul.f32 %v3980_v2, %v2620_v23 }
0x1220   :  { %v2616_v5 = vmul.f32 %v2614_v9, %v4500_v34 }
0x1221   :  { %v2622_v7 = vmul.f32 0.5, %v2621_v18 }
0x1222   :  { %v2618_v45 = vadd.f32 1e-05, %v2616_v5 }
0x1223   :  { %v2623_v51 = vsub.f32 1.5, %v2622_v7 }
0x1224   :  { %3981 = vrsqrt.f32 %v2618_v45  ;;  %vm2635_vm11 = vweird.f32 %v2618_v45 }
0x1225   :  { %v2624_v49 = vmul.f32 %v3980_v2, %v2623_v51 }
0x1227   :  { %v2628_v33 = vsel %vm2627_vm9, %v3980_v2, %v2624_v49  ;;  %v4025_v2 = vld [vmem:[%s5511_s4] sm:$0xff] }
0x1228   :  { %v5088_v59 = vmul.f32 %v2628_v33, %v2605_v63 }
0x1229   :  { %v2747_v13 = vpop.permute.xlu1 %2746 }
0x122a   :  { %v3982_v55 = vpop.eup %3981  ;;  %3737 = vmatmul.msk.f32.vlgmr.msrb.gmra.mxu2 %vm65_vm0, %v5088_v59  ;;  %3747 = vmatpush.xpose.msk.msra.mxu3 %vm162_vm1, %v2747_v13 }
0x122b   :  { %v2630_v4 = vmul.f32 %v3982_v55, %v2618_v45  ;;  %vm2636_vm10 = vweird.f32 %v3982_v55  ;;  %v4026_v45 = vld [vmem:[%s5511_s4 + $0x8] sm:$0xff]  ;;  %s4062_s4 = smov 32  }
0x122c   :  { %vm2637_vm12 = vmor %vm2635_vm11, %vm2636_vm10 }
0x122d   :  { %v2631_v28 = vmul.f32 %v3982_v55, %v2630_v4 }
0x122f   :  { %v2632_v32 = vmul.f32 0.5, %v2631_v28 }
0x1231   :  { %v2633_v22 = vsub.f32 1.5, %v2632_v32 }
0x1233   :  { %v2634_v15 = vmul.f32 %v3982_v55, %v2633_v22 }
0x1235   :  { %v2638_v20 = vsel %vm2637_vm12, %v3982_v55, %v2634_v15 }
0x1236   :  { %v5093_v50 = vmul.f32 %v2638_v20, %v2606_v17 }
0x1238   :  { %3738 = vmatmul.msk.f32.gmra.mxu2 %vm65_vm0, %v5093_v50 }
0x12ad   :  { %v2669_v63 = vpop.f32.mrf.mxu2 }
0x12ae   :  { %2685 = vrot.lane.b32.xlu1 %v2669_v63, %s4053_s16  ;;  %2677 = vrot.lane.b32.xlu2 %v2669_v63, %s4055_s18 }
0x12af   :  { %3744 = vmatmul.msk.f32.vlgmr.msrb.gmra.mxu3 %vm162_vm1, %v2669_v63 }
0x12b0   :  { %3755 = vmatpush.xpose.msk.msrb.mxu3 %vm162_vm1, %v2851_v52 }
0x12b6   :  { %2824 = vrot.lane.b32.xlu2 %v4510_v47, %s4057_s20 }
0x12bb   :  { %v2672_v40 = vpop.f32.mrf.mxu2 }
0x12bc   :  { %2679 = vrot.lane.b32.xlu0 %v2672_v40, %s4055_s18  ;;  %2683 = vrot.lane.b32.xlu1 %v2672_v40, %s4054_s17 }
0x12bd   :  { %3746 = vmatmul.msk.f32.vlgmr.msrb.gmra.mxu0 %vm162_vm1, %v2672_v40 }
0x12be   :  { %2772 = vrot.lane.b32.xlu2 %v4532_v38, %s4057_s20 }
0x12c4   :  { %2681 = vrot.lane.b32.xlu1 %v2669_v63, %s4054_s17 }
0x12c6   :  { %2876 = vrot.lane.b32.xlu2 %v4554_v26, %s4057_s20 }
0x12cc   :  { %2687 = vrot.lane.b32.xlu1 %v2672_v40, %s4053_s16 }
0x1308   :  { %v2678_v17 = vpop.permute.xlu2 %2677 }
0x1309   :  { %3748 = vmatmul.msk.f32.vlgmr.msra.gmra.mxu3 %vm162_vm1, %v2678_v17 }
0x1310   :  { %v2825_v52 = vpop.permute.xlu2 %2824 }
0x1311   :  { %3753 = vmatpush.xpose.msk.msra.mxu2 %vm162_vm1, %v2825_v52 }
0x1318   :  { %v2773_v6 = vpop.permute.xlu2 %2772 }
0x1319   :  { %3749 = vmatpush.xpose.msk.msra.mxu0 %vm162_vm1, %v2773_v6 }
0x1320   :  { %v2877_v41 = vpop.permute.xlu2 %2876  ;;  %v2686_v1 = vpop.permute.xlu1 %2685 }
0x1321   :  { %3756 = vmatmul.msk.f32.vlgmr.msrb.gmra.mxu3 %vm162_vm1, %v2686_v1  ;;  %3757 = vmatpush.xpose.msk.msrb.mxu0 %vm162_vm1, %v2877_v41 }
0x132e   :  { %v2680_v14 = vpop.permute.xlu0 %2679  ;;  %v2684_v30 = vpop.permute.xlu1 %2683 }
0x132f   :  { %3750 = vmatmul.msk.f32.vlgmr.msra.gmra.mxu0 %vm162_vm1, %v2680_v14  ;;  %3754 = vmatmul.msk.f32.vlgmr.msra.gmra.mxu2 %vm162_vm1, %v2684_v30 }
0x1332   :  { %v2717_v0 = vpop.f32.mrf.mxu3 }
0x1333   :  { %v2902_v54 = vmul.f32 0.35355338, %v2717_v0 }
0x1335   :  { %v2910_v23 = vadd.f32 %v4025_v2, %v2902_v54 }
0x1336   :  { %v2682_v9 = vpop.permute.xlu1 %2681 }
0x1337   :  { %3752 = vmatmul.msk.f32.vlgmr.msra.gmra.mxu1 %vm162_vm1, %v2682_v9  ;;  %v2918_v18 = vsel %vm162_vm1, %v2910_v23, -inf }
0x1338   :  { %2919 = vmax.xlane.f32.xlu2 %v2918_v18 }
0x133a   :  { %v2743_v5 = vpop.f32.mrf.mxu0 }
0x133b   :  { %v2903_v7 = vmul.f32 0.35355338, %v2743_v5 }
0x133d   :  { %v2911_v51 = vadd.f32 %v4026_v45, %v2903_v7 }
0x133e   :  { %v2688_v49 = vpop.permute.xlu1 %2687 }
0x133f   :  { %v2921_v33 = vsel %vm162_vm1, %v2911_v51, -inf  ;;  %3758 = vmatmul.msk.f32.vlgmr.msrb.gmra.mxu0 %vm162_vm1, %v2688_v49 }
0x1340   :  { %2922 = vmax.xlane.f32.xlu1 %v2921_v33 }
0x138c   :  { %v2769_v55 = vpop.f32.mrf.mxu3 }
0x138d   :  { %v2904_v13 = vmul.f32 0.35355338, %v2769_v55 }
0x138f   :  { %v2912_v4 = vadd.f32 %v4025_v2, %v2904_v13 }
0x1391   :  { %v2924_v28 = vsel %vm162_vm1, %v2912_v4, -inf }
0x1392   :  { %2925 = vmax.xlane.f32.xlu0 %v2924_v28 }
0x13a4   :  { %v2873_v32 = vpop.f32.mrf.mxu3 }
0x13a5   :  { %v2908_v22 = vmul.f32 0.35355338, %v2873_v32 }
0x13a7   :  { %v2916_v15 = vadd.f32 %v4025_v2, %v2908_v22 }
0x13a9   :  { %v2936_v20 = vsel %vm162_vm1, %v2916_v15, -inf }
0x13aa   :  { %2937 = vmax.xlane.f32.xlu0 %v2936_v20 }
0x13ab   :  { %v2920_v32 = vpop.xlane.xlu2 %2919 }
0x13ac   :  { %v2795_v63 = vpop.f32.mrf.mxu0  ;;  %v2942_v22 = vsub.f32 %v2910_v23, %v2920_v32 }
0x13ad   :  { %v2905_v40 = vmul.f32 0.35355338, %v2795_v63 }
0x13ae   :  { %v2950_v20 = vmul.f32 1.442695, %v2942_v22 }
0x13af   :  { %v2913_v17 = vadd.f32 %v4026_v45, %v2905_v40 }
0x13b1   :  { %v2927_v52 = vsel %vm162_vm1, %v2913_v17, -inf }
0x13b2   :  { %2928 = vmax.xlane.f32.xlu1 %v2927_v52  ;;  %v2847_v6 = vpop.f32.mrf.mxu2 }
0x13b3   :  { %v2907_v41 = vmul.f32 0.35355338, %v2847_v6  ;;  %v2923_v30 = vpop.xlane.xlu1 %2922 }
0x13b4   :  { %v2821_v1 = vpop.f32.mrf.mxu1  ;;  %v2943_v18 = vsub.f32 %v2911_v51, %v2923_v30  ;;  %v3850_v51 = vpack.i.bf16 %v4266_v36, %v4526_v24 }
0x13b5   :  { %v2915_v14 = vadd.f32 %v4026_v45, %v2907_v41  ;;  %v2906_v0 = vmul.f32 0.35355338, %v2821_v1 }
0x13b6   :  { %v2952_v7 = vmul.f32 1.442695, %v2943_v18 }
0x13b7   :  { %v2914_v54 = vadd.f32 %v4025_v2, %v2906_v0  ;;  %v2933_v9 = vsel %vm162_vm1, %v2915_v14, -inf }
0x13b8   :  { %2934 = vmax.xlane.f32.xlu0 %v2933_v9  ;;  %3983 = vpow2.f32 %v2952_v7 }
0x13b9   :  { %v2930_v5 = vsel %vm162_vm1, %v2914_v54, -inf  ;;  %3985 = vpow2.f32 %v2950_v20 }
0x13ba   :  { %2931 = vmax.xlane.f32.xlu2 %v2930_v5 }
0x13bc   :  { %v2899_v49 = vpop.f32.mrf.mxu0 }
0x13bd   :  { %v2909_v33 = vmul.f32 0.35355338, %v2899_v49 }
0x13be   :  { %v5135_v28 = vpop.eup %3983 }
0x13bf   :  { %v2917_v55 = vadd.f32 %v4026_v45, %v2909_v33  ;;  %v2969_v2 = vsel %vm162_vm1, %v5135_v28, 0.0  ;;  %v5142_v45 = vpop.eup %3985 }
0x13c0   :  { %v2966_v63 = vsel %vm162_vm1, %v5142_v45, 0.0 }
0x13c1   :  { %v2939_v13 = vsel %vm162_vm1, %v2917_v55, -inf }
0x13c2   :  { %2940 = vmax.xlane.f32.xlu2 %v2939_v13 }
0x13ca   :  { %2970 = vadd.xlane.f32.xlu2 %v2969_v2 }
0x13cc   :  { %3851 = vrot.lane.b32.xlu0 %v3850_v51, %s4062_s4 }
0x13f6   :  { %2967 = vadd.xlane.f32.xlu0 %v2966_v63 }
0x1405   :  { %v2926_v40 = vpop.xlane.xlu0 %2925 }
0x1406   :  { %v2944_v52 = vsub.f32 %v2912_v4, %v2926_v40 }
0x1408   :  { %v2954_v6 = vmul.f32 1.442695, %v2944_v52 }
0x140a   :  { %3987 = vpow2.f32 %v2954_v6 }
0x1410   :  { %v5146_v41 = vpop.eup %3987 }
0x1411   :  { %v2972_v36 = vsel %vm162_vm1, %v5146_v41, 0.0 }
0x1412   :  { %2973 = vadd.xlane.f32.xlu1 %v2972_v36 }
0x141d   :  { %v2938_v24 = vpop.xlane.xlu0 %2937 }
0x141e   :  { %v2948_v23 = vsub.f32 %v2916_v15, %v2938_v24  ;;  %v3855_v24 = vpack.i.bf16 %v4550_v25, %v4268_v37 }
0x1420   :  { %v2962_v1 = vmul.f32 1.442695, %v2948_v23  ;;  %v3860_v23 = vpack.i.bf16 %v4532_v38, %v4506_v35 }
0x1422   :  { %3989 = vpow2.f32 %v2962_v1 }
0x1425   :  { %v2929_v30 = vpop.xlane.xlu1 %2928 }
0x1426   :  { %v2945_v0 = vsub.f32 %v2913_v17, %v2929_v30 }
0x1428   :  { %v2956_v9 = vmul.f32 1.442695, %v2945_v0  ;;  %v5150_v18 = vpop.eup %3989 }
0x1429   :  { %v2984_v4 = vsel %vm162_vm1, %v5150_v18, 0.0 }
0x142a   :  { %3991 = vpow2.f32 %v2956_v9  ;;  %2985 = vadd.xlane.f32.xlu1 %v2984_v4 }
0x142b   :  { %v2935_v5 = vpop.xlane.xlu0 %2934 }
0x142c   :  { %v2947_v7 = vsub.f32 %v2915_v14, %v2935_v5 }
0x142d   :  { %v2932_v49 = vpop.xlane.xlu2 %2931 }
0x142e   :  { %v2960_v33 = vmul.f32 1.442695, %v2947_v7  ;;  %v2946_v13 = vsub.f32 %v2914_v54, %v2932_v49 }
0x1430   :  { %v5154_v2 = vpop.eup %3991  ;;  %3993 = vpow2.f32 %v2960_v33  ;;  %v2958_v15 = vmul.f32 1.442695, %v2946_v13 }
0x1431   :  { %v2975_v17 = vsel %vm162_vm1, %v5154_v2, 0.0 }
0x1432   :  { %3995 = vpow2.f32 %v2958_v15  ;;  %2976 = vadd.xlane.f32.xlu2 %v2975_v17 }
0x1435   :  { %v2941_v51 = vpop.xlane.xlu2 %2940 }
0x1436   :  { %v5158_v32 = vpop.eup %3993  ;;  %v2949_v22 = vsub.f32 %v2917_v55, %v2941_v51 }
0x1437   :  { %v2981_v20 = vsel %vm162_vm1, %v5158_v32, 0.0 }
0x1438   :  { %v5162_v14 = vpop.eup %3995  ;;  %v2964_v63 = vmul.f32 1.442695, %v2949_v22  ;;  %2982 = vadd.xlane.f32.xlu1 %v2981_v20 }
0x1439   :  { %v2978_v54 = vsel %vm162_vm1, %v5162_v14, 0.0 }
0x143a   :  { %3997 = vpow2.f32 %v2964_v63  ;;  %2979 = vadd.xlane.f32.xlu0 %v2978_v54 }
0x143e   :  { %v3852_v40 = vpop.permute.xlu0 %3851 }
0x143f   :  { %v3854_v52 = vunpack.i.h.bf16 %v3852_v40  ;;  %v3853_v6 = vunpack.i.l.bf16 %v3852_v40  ;;  %v2971_v40 = vpop.xlane.xlu2 %2970 }
0x1440   :  { %v5166_v36 = vpop.eup %3997  ;;  %vm3010_vm10 = vweird.f32 %v2971_v40 }
0x1441   :  { %3131 = vmatpush.msrb.mxu1 %v3854_v52  ;;  %3183 = vmatpush.msra.mxu3 %v3853_v6  ;;  %v2987_v55 = vsel %vm162_vm1, %v5166_v36, 0.0 }
0x1442   :  { %2988 = vadd.xlane.f32.xlu2 %v2987_v55 }
0x144e   :  { %3240 = vrot.lane.b32.xlu0 %v4510_v47, %s4062_s4 }
0x1451   :  { %3856 = vrot.lane.b32.xlu1 %v3855_v24, %s4062_s4 }
0x1456   :  { %3292 = vrot.lane.b32.xlu0 %v4554_v26, %s4062_s4 }
0x145a   :  { %3861 = vrot.lane.b32.xlu2 %v3860_v23, %s4062_s4 }
0x1469   :  { %v2968_v1 = vpop.xlane.xlu0 %2967 }
0x146a   :  { %3999 = vrcp.f32 %v2968_v1  ;;  %v3001_v4 = vand.u32 2147483648, %v2968_v1  ;;  %v2999_v5 = vand.u32 2147483647, %v2968_v1  ;;  %vm2995_vm14 = vweird.f32 %v2968_v1 }
0x146c   :  { %v3002_v25 = vor.u32 1.1754944e-38, %v3001_v4  ;;  %vm3000_vm2 = vcmp.eq.f32.partialorder %v2999_v5, 8.507059e+37 }
0x1470   :  { %v4000_v30 = vpop.eup %3999 }
0x1471   :  { %v2991_v0 = vmul.f32 %v4000_v30, %v2968_v1  ;;  %vm2996_vm13 = vweird.f32 %v4000_v30 }
0x1472   :  { %vm2997_vm15 = vmor %vm2995_vm14, %vm2996_vm13 }
0x1473   :  { %v2992_v9 = vsub.f32 1.0, %v2991_v0 }
0x1475   :  { %v2993_v47 = vmul.f32 %v4000_v30, %v2992_v9 }
0x1477   :  { %v2994_v37 = vadd.f32 %v4000_v30, %v2993_v47 }
0x1479   :  { %v2998_v7 = vsel %vm2997_vm15, %v4000_v30, %v2994_v37 }
0x147a   :  { %v3003_v26 = vsel %vm3000_vm2, %v3002_v25, %v2998_v7 }
0x147b   :  { %v5181_v35 = vmul.f32 %v5142_v45, %v3003_v26 }
0x147d   :  { %3759 = vmatmul.msk.f32.vlgmr.msrb.gmra.mxu1 %vm162_vm1, %v5181_v35 }
0x1485   :  { %v2974_v38 = vpop.xlane.xlu1 %2973 }
0x1486   :  { %4001 = vrcp.f32 %v2974_v38  ;;  %v3031_v15 = vand.u32 2147483648, %v2974_v38  ;;  %v3029_v51 = vand.u32 2147483647, %v2974_v38  ;;  %vm3025_vm4 = vweird.f32 %v2974_v38 }
0x1487   :  { %4003 = vrcp.f32 %v2971_v40 }
0x1488   :  { %v3032_v20 = vor.u32 1.1754944e-38, %v3031_v15  ;;  %vm3030_vm8 = vcmp.eq.f32.partialorder %v3029_v51, 8.507059e+37 }
0x148c   :  { %v4002_v49 = vpop.eup %4001 }
0x148d   :  { %v3021_v33 = vmul.f32 %v4002_v49, %v2974_v38  ;;  %vm3026_vm3 = vweird.f32 %v4002_v49  ;;  %v4004_v6 = vpop.eup %4003 }
0x148e   :  { %vm3027_vm5 = vmor %vm3025_vm4, %vm3026_vm3  ;;  %v3006_v24 = vmul.f32 %v4004_v6, %v2971_v40  ;;  %vm3011_vm9 = vweird.f32 %v4004_v6 }
0x148f   :  { %v3022_v13 = vsub.f32 1.0, %v3021_v33  ;;  %v3016_v33 = vand.u32 2147483648, %v2971_v40  ;;  %vm5202_vm11 = vmor %vm3010_vm10, %vm3011_vm9 }
0x1490   :  { %v3007_v23 = vsub.f32 1.0, %v3006_v24 }
0x1491   :  { %v3023_v17 = vmul.f32 %v4002_v49, %v3022_v13 }
0x1492   :  { %v3008_v4 = vmul.f32 %v4004_v6, %v3007_v23  ;;  %v3017_v23 = vor.u32 1.1754944e-38, %v3016_v33 }
0x1493   :  { %v3024_v22 = vadd.f32 %v4002_v49, %v3023_v17 }
0x1494   :  { %v3009_v25 = vadd.f32 %v4004_v6, %v3008_v4 }
0x1495   :  { %v3028_v63 = vsel %vm3027_vm5, %v4002_v49, %v3024_v22  ;;  %v3014_v49 = vand.u32 2147483647, %v2971_v40 }
0x1496   :  { %v3033_v45 = vsel %vm3030_vm8, %v3032_v20, %v3028_v63  ;;  %v3013_v22 = vsel %vm5202_vm11, %v4004_v6, %v3009_v25 }
0x1497   :  { %v5186_v54 = vmul.f32 %v5146_v41, %v3033_v45  ;;  %vm3015_vm14 = vcmp.eq.f32.partialorder %v3014_v49, 8.507059e+37 }
0x1499   :  { %3761 = vmatmul.msk.f32.vlgmr.msra.gmra.mxu3 %vm162_vm1, %v5186_v54 }
0x149d   :  { %v5190_v52 = vpop.xlane.xlu1 %2985 }
0x149e   :  { %4005 = vrcp.f32 %v5190_v52  ;;  %vm3085_vm8 = vweird.f32 %v5190_v52  ;;  %v3091_v13 = vand.u32 2147483648, %v5190_v52 }
0x14a4   :  { %v5193_v1 = vpop.eup %4005 }
0x14a5   :  { %v2977_v55 = vpop.xlane.xlu2 %2976  ;;  %v3081_v47 = vmul.f32 %v5193_v1, %v5190_v52  ;;  %vm3086_vm3 = vweird.f32 %v5193_v1 }
0x14a6   :  { %4007 = vrcp.f32 %v2977_v55  ;;  %v3046_v63 = vand.u32 2147483648, %v2977_v55  ;;  %vm3040_vm13 = vweird.f32 %v2977_v55  ;;  %v3044_v45 = vand.u32 2147483647, %v2977_v55  ;;  %vm5224_vm10 = vmor %vm3085_vm8, %vm3086_vm3 }
0x14a7   :  { %v3082_v7 = vsub.f32 1.0, %v3081_v47 }
0x14a8   :  { %v3047_v25 = vor.u32 1.1754944e-38, %v3046_v63  ;;  %vm3045_vm4 = vcmp.eq.f32.partialorder %v3044_v45, 8.507059e+37 }
0x14a9   :  { %v3083_v20 = vmul.f32 %v5193_v1, %v3082_v7 }
0x14ab   :  { %v5195_v30 = vpop.xlane.xlu1 %2982 }
0x14ac   :  { %v4008_v41 = vpop.eup %4007  ;;  %4009 = vrcp.f32 %v5195_v30 }
0x14ad   :  { %v3036_v0 = vmul.f32 %v4008_v41, %v2977_v55  ;;  %v2980_v9 = vpop.xlane.xlu0 %2979  ;;  %vm3041_vm12 = vweird.f32 %v4008_v41  ;;  %v3084_v55 = vadd.f32 %v5193_v1, %v3083_v20 }
0x14ae   :  { %4011 = vrcp.f32 %v2980_v9  ;;  %vm5214_vm15 = vmor %vm3040_vm13, %vm3041_vm12  ;;  %v3061_v4 = vand.u32 2147483648, %v2980_v9  ;;  %vm3055_vm5 = vweird.f32 %v2980_v9 }
0x14af   :  { %v3037_v5 = vsub.f32 1.0, %v3036_v0 }
0x14b1   :  { %v3038_v37 = vmul.f32 %v4008_v41, %v3037_v5  ;;  %v3059_v5 = vand.u32 2147483647, %v2980_v9 }
0x14b2   :  { %v5200_v26 = vpop.eup %4009 }
0x14b3   :  { %v3039_v15 = vadd.f32 %v4008_v41, %v3038_v37  ;;  %v3066_v40 = vmul.f32 %v5200_v26, %v5195_v30  ;;  %v3018_v37 = vsel %vm3015_vm14, %v3017_v23, %v3013_v22  ;;  %v3089_v22 = vand.u32 2147483647, %v5190_v52 }
0x14b4   :  { %v4012_v38 = vpop.eup %4011  ;;  %vm3060_vm11 = vcmp.eq.f32.partialorder %v3059_v5, 8.507059e+37  ;;  %vm3070_vm14 = vweird.f32 %v5195_v30 }
0x14b5   :  { %v3051_v17 = vmul.f32 %v4012_v38, %v2980_v9  ;;  %v5206_v51 = vpop.xlane.xlu2 %2988  ;;  %v3043_v6 = vsel %vm5214_vm15, %v4008_v41, %v3039_v15  ;;  %vm3056_vm2 = vweird.f32 %v4012_v38  ;;  %v3067_v7 = vsub.f32 1.0, %v3066_v40 }
0x14b6   :  { %4013 = vrcp.f32 %v5206_v51  ;;  %vm3057_vm9 = vmor %vm3055_vm5, %vm3056_vm2  ;;  %v3062_v41 = vor.u32 1.1754944e-38, %v3061_v4  ;;  %v3088_v9 = vsel %vm5224_vm10, %v5193_v1, %v3084_v55  ;;  %vm3090_vm12 = vcmp.eq.f32.partialorder %v3089_v22, 8.507059e+37 }
0x14b7   :  { %v3052_v24 = vsub.f32 1.0, %v3051_v17  ;;  %v3048_v17 = vsel %vm3045_vm4, %v3047_v25, %v3043_v6  ;;  %v3068_v0 = vmul.f32 %v5200_v26, %v3067_v7  ;;  %v3104_v55 = vand.u32 2147483647, %v5206_v51 }
0x14b8   :  { %v5235_v6 = vmul.f32 %v5154_v2, %v3048_v17  ;;  %vm3071_vm15 = vweird.f32 %v5200_v26  ;;  %vm3100_vm2 = vweird.f32 %v5206_v51  ;;  %v3074_v22 = vand.u32 2147483647, %v5195_v30 }
0x14b9   :  { %v3053_v47 = vmul.f32 %v4012_v38, %v3052_v24  ;;  %v3069_v25 = vadd.f32 %v5200_v26, %v3068_v0  ;;  %vm3105_vm4 = vcmp.eq.f32.partialorder %v3104_v55, 8.507059e+37  ;;  %vm3072_vm5 = vmor %vm3070_vm14, %vm3071_vm15  ;;  %vm3607_vm15 = vcmask 523264  }
0x14ba   :  { %vm3075_vm8 = vcmp.eq.f32.partialorder %v3074_v22, 8.507059e+37 }
0x14bb   :  { %v3054_v49 = vadd.f32 %v4012_v38, %v3053_v47  ;;  %v3106_v47 = vand.u32 2147483648, %v5206_v51 }
0x14bc   :  { %v4014_v33 = vpop.eup %4013 }
0x14bd   :  { %v3058_v20 = vsel %vm3057_vm9, %v4012_v38, %v3054_v49  ;;  %v3096_v63 = vmul.f32 %v4014_v33, %v5206_v51  ;;  %v3862_v45 = vpop.permute.xlu2 %3861  ;;  %v3092_v38 = vor.u32 1.1754944e-38, %v3091_v13  ;;  %vm3101_vm13 = vweird.f32 %v4014_v33 }
0x14be   :  { %v3063_v40 = vsel %vm3060_vm11, %v3062_v41, %v3058_v20  ;;  %v3864_v24 = vunpack.i.h.bf16 %v3862_v45  ;;  %v3863_v23 = vunpack.i.l.bf16 %v3862_v45  ;;  %v3076_v13 = vand.u32 2147483648, %v5195_v30  ;;  %vm3102_vm3 = vmor %vm3100_vm2, %vm3101_vm13 }
0x14bf   :  { %v3097_v4 = vsub.f32 1.0, %v3096_v63  ;;  %v5238_v52 = vmul.f32 %v5162_v14, %v3063_v40  ;;  %v3093_v2 = vsel %vm3090_vm12, %v3092_v38, %v3088_v9  ;;  %v5248_v14 = vmul.f32 %v5135_v28, %v3018_v37  ;;  %v3741_v38 = vld [vmem:[%s5516_s9 + $0x30] sm:$0xff] }
0x14c0   :  { %v3241_v5 = vpop.permute.xlu0 %3240  ;;  %3209 = vmatpush.msra.mxu0 %v3864_v24  ;;  %3235 = vmatpush.msra.mxu1 %v3863_v23  ;;  %v3107_v17 = vor.u32 1.1754944e-38, %v3106_v47  ;;  %v5256_v28 = vmul.f32 %v5150_v18, %v3093_v2  ;;  %v3073_v51 = vsel %vm3072_vm5, %v5200_v26, %v3069_v25  ;;  %v3077_v63 = vor.u32 1.1754944e-38, %v3076_v13  ;;  %v3740_v47 = vld [vmem:[%s5516_s9 + $0x28] sm:$0xff] }
0x14c1   :  { %v3098_v1 = vmul.f32 %v4014_v33, %v3097_v4  ;;  %3762 = vmatmul.msk.f32.vlgmr.msra.gmra.mxu0 %vm162_vm1, %v5235_v6  ;;  %3763 = vmatmul.msk.f32.vlgmr.msra.gmra.mxu1 %vm162_vm1, %v5238_v52  ;;  %v3742_v4 = vld [vmem:[%s5516_s9 + $0x38] sm:$0xff]  ;;  %vm3610_vm2 = vcmask 785408  }
0x14c2   :  { %v3078_v30 = vsel %vm3075_vm8, %v3077_v63, %v3073_v51  ;;  %3390 = vmatpush.msrb.mxu1 %v3742_v4 }
0x14c3   :  { %v3099_v7 = vadd.f32 %v4014_v33, %v3098_v1  ;;  %v3857_v49 = vpop.permute.xlu1 %3856  ;;  %v5268_v45 = vmul.f32 %v5158_v32, %v3078_v30 }
0x14c4   :  { %v3859_v41 = vunpack.i.h.bf16 %v3857_v49  ;;  %v3858_v15 = vunpack.i.l.bf16 %v3857_v49  ;;  %3391 = vmatpush.msrb.mxu1 %v3741_v38 }
0x14c5   :  { %v3103_v20 = vsel %vm3102_vm3, %v4014_v33, %v3099_v7 }
0x14c6   :  { %v3108_v37 = vsel %vm3105_vm4, %v3107_v17, %v3103_v20  ;;  %3157 = vmatpush.msrb.mxu2 %v3858_v15  ;;  %3287 = vmatpush.msrb.mxu3 %v3859_v41 }
0x14c7   :  { %3760 = vmatmul.msk.f32.vlgmr.msrb.gmra.mxu2 %vm162_vm1, %v5248_v14  ;;  %3765 = vmatmul.msk.f32.vlgmr.msrb.gmra.mxu3 %vm162_vm1, %v5256_v28  ;;  %v3109_v33 = vmul.f32 %v5166_v36, %v3108_v37 }
0x14c8   :  { %3261 = vmatpush.msra.mxu2 %v3241_v5  ;;  %v3293_v18 = vpop.permute.xlu0 %3292  ;;  %3392 = vmatpush.msrb.mxu1 %v3740_v47  ;;  %v3739_v5 = vld [vmem:[%s5516_s9 + $0x20] sm:$0xff]  ;;  %s3621_s9 = sshll.u32 %s5521_s14, 4  ;;  %s4064_s14 = smov 128   ;;  %s3622_s9 = int_to_ptr.hbm [resolvable:$true] %s3621_s9 }
0x14c9   :  { %3313 = vmatpush.msrb.mxu0 %v3293_v18 }
0x14ca   :  { %3766 = vmatmul.msk.f32.vlgmr.msrb.gmra.mxu0 %vm162_vm1, %v3109_v33  ;;  %3393 = vmatpush.msrb.mxu1 %v3739_v5 }
0x14cf   :  { %3764 = vmatmul.msk.f32.vlgmr.msra.gmra.mxu2 %vm162_vm1, %v5268_v45 }
0x14fa   :  { %v3133_v9 = vpop.f32.mrf.mxu1 }
0x151c   :  { %v3185_v26 = vpop.f32.mrf.mxu3 }
0x151d   :  { %3320 = vrot.lane.b32.xlu1 %v3185_v26, %s4058_s29 }
0x153e   :  { %v3211_v40 = vpop.f32.mrf.mxu0  ;;  %v3237_v36 = vpop.f32.mrf.mxu1 }
0x153f   :  { %3328 = vrot.lane.b32.xlu2 %v3237_v36, %s4059_s30  ;;  %3322 = vrot.lane.b32.xlu1 %v3211_v40, %s4058_s29 }
0x1547   :  { %v3315_v0 = vpop.f32.mrf.mxu0 }
0x154a   :  { %v3159_v24 = vpop.f32.mrf.mxu2  ;;  %v3289_v23 = vpop.f32.mrf.mxu3 }
0x154b   :  { %3336 = vrot.lane.b32.xlu0 %v3289_v23, %s4060_s1 }
0x1552   :  { %v3263_v32 = vpop.f32.mrf.mxu2 }
0x1553   :  { %3338 = vrot.lane.b32.xlu0 %v3315_v0, %s4060_s1  ;;  %3330 = vrot.lane.b32.xlu2 %v3263_v32, %s4059_s30 }
0x158f   :  { %v3321_v1 = vpop.permute.xlu1 %3320 }
0x1590   :  { %v3342_v2 = vsel %vm162_vm1, %v3133_v9, %v3321_v1 }
0x1599   :  { %v3329_v55 = vpop.permute.xlu2 %3328 }
0x159a   :  { %v3344_v25 = vsel %vm811_vm6, %v3342_v2, %v3329_v55 }
0x15ad   :  { %v3331_v41 = vpop.permute.xlu2 %3330 }
0x15b1   :  { %v3323_v13 = vpop.permute.xlu1 %3322 }
0x15b2   :  { %v3343_v17 = vsel %vm162_vm1, %v3159_v24, %v3323_v13 }
0x15b3   :  { %v3345_v22 = vsel %vm811_vm6, %v3343_v17, %v3331_v41  ;;  %v3790_v41 = vld [vmem:[%s5518_s11 + $0xf8] sm:$0xff] }
0x15b4   :  { %3498 = vmatpush.msra.mxu3 %v3790_v41 }
0x15bd   :  { %v3337_v7 = vpop.permute.xlu0 %3336 }
0x15be   :  { %v3346_v49 = vsel %vm814_vm7, %v3344_v25, %v3337_v7 }
0x15bf   :  { %3767 = vmatmul.msk.f32.vlgmr.msrb.gmra.mxu1 %vm65_vm0, %v3346_v49 }
0x15c5   :  { %v3339_v15 = vpop.permute.xlu0 %3338 }
0x15c6   :  { %v3347_v20 = vsel %vm814_vm7, %v3345_v22, %v3339_v15  ;;  %v3789_v15 = vld [vmem:[%s5518_s11 + $0xf0] sm:$0xff] }
0x15c7   :  { %3768 = vmatmul.msk.f32.gmra.mxu1 %vm65_vm0, %v3347_v20  ;;  %v3788_v20 = vld [vmem:[%s5518_s11 + $0xe8] sm:$0xff]  ;;  %3499 = vmatpush.msra.mxu3 %v3789_v15 }
0x15c9   :  { %3500 = vmatpush.msra.mxu3 %v3788_v20 }
0x163c   :  { %v3395_v37 = vpop.f32.mrf.mxu1 }
0x163d   :  { %v3396_v51 = vadd.f32 %v3395_v37, %v5088_v59 }
0x163f   :  { %v3401_v63 = vsel %vm65_vm0, %v3396_v51, 0.0 }
0x1640   :  { %3402 = vadd.xlane.f32.xlu1 %v3401_v63  ;;  %v3786_v63 = vld [vmem:[%s5518_s11 + $0xd8] sm:$0xff] }
0x1644   :  { %v3398_v18 = vpop.f32.mrf.mxu1 }
0x1645   :  { %v3399_v30 = vadd.f32 %v3398_v18, %v5093_v50  ;;  %v3785_v18 = vld [vmem:[%s5518_s11 + $0xd0] sm:$0xff] }
0x1647   :  { %v3404_v26 = vsel %vm65_vm0, %v3399_v30, 0.0 }
0x1648   :  { %3405 = vadd.xlane.f32.xlu2 %v3404_v26  ;;  %v3783_v26 = vld [vmem:[%s5518_s11 + $0xc0] sm:$0xff] }
0x1660   :  { %2546 = vrot.lane.b32.xlu2 %v5010_v53, %s4058_s29 }
0x1668   :  { %2552 = vrot.lane.b32.xlu2 %v5018_v31, %s4059_s30 }
0x1670   :  { %2556 = vrot.lane.b32.xlu2 %v4983_v8, %s4060_s1 }
0x1678   :  { %3350 = vrot.lane.b32.xlu2 %v5235_v6, %s4058_s29 }
0x1680   :  { %3354 = vrot.lane.b32.xlu2 %v5238_v52, %s4059_s30 }
0x1688   :  { %3362 = vrot.lane.b32.xlu2 %v3109_v33, %s4060_s1 }
0x1690   :  { %817 = vrot.lane.b32.xlu2 %v4394_v16, %s4058_s29 }
0x1698   :  { %819 = vrot.lane.b32.xlu2 %v4431_v44, %s4058_s29 }
0x16a0   :  { %823 = vrot.lane.b32.xlu2 %v4388_v19, %s4059_s30 }
0x16b3   :  { %v3403_v53 = vpop.xlane.xlu1 %3402 }
0x16b4   :  { %v3407_v8 = vmul.f32 %v3403_v53, %v4500_v34  ;;  %v3782_v53 = vld [vmem:[%s5518_s11 + $0xb8] sm:$0xff] }
0x16b6   :  { %v3409_v31 = vsub.f32 %v3396_v51, %v3407_v8  ;;  %v3787_v51 = vld [vmem:[%s5518_s11 + $0xe0] sm:$0xff]  ;;  %v3781_v8 = vld [vmem:[%s5518_s11 + $0xb0] sm:$0xff] }
0x16b7   :  { %3501 = vmatpush.msra.mxu3 %v3787_v51 }
0x16b8   :  { %v3411_v59 = vmul.f32 %v3409_v31, %v3409_v31 }
0x16b9   :  { %3502 = vmatpush.msra.mxu3 %v3786_v63 }
0x16ba   :  { %v3413_v50 = vsel %vm65_vm0, %v3411_v59, 0.0  ;;  %v3779_v59 = vld [vmem:[%s5518_s11 + $0xa0] sm:$0xff] }
0x16bb   :  { %3414 = vadd.xlane.f32.xlu0 %v3413_v50  ;;  %v3406_v6 = vpop.xlane.xlu2 %3405  ;;  %3503 = vmatpush.msra.mxu3 %v3785_v18  ;;  %v3778_v50 = vld [vmem:[%s5518_s11 + $0x98] sm:$0xff] }
0x16bc   :  { %v3408_v52 = vmul.f32 %v3406_v6, %v4500_v34  ;;  %v3777_v6 = vld [vmem:[%s5518_s11 + $0x90] sm:$0xff] }
0x16be   :  { %v3410_v33 = vsub.f32 %v3399_v30, %v3408_v52  ;;  %v3784_v30 = vld [vmem:[%s5518_s11 + $0xc8] sm:$0xff] }
0x16bf   :  { %3504 = vmatpush.msra.mxu3 %v3784_v30  ;;  %v3776_v52 = vld [vmem:[%s5518_s11 + $0x88] sm:$0xff] }
0x16c0   :  { %v3412_v9 = vmul.f32 %v3410_v33, %v3410_v33 }
0x16c1   :  { %3505 = vmatpush.msra.mxu3 %v3783_v26 }
0x16c2   :  { %v3416_v16 = vsel %vm65_vm0, %v3412_v9, 0.0 }
0x16c3   :  { %3417 = vadd.xlane.f32.xlu1 %v3416_v16  ;;  %v2547_v44 = vpop.permute.xlu2 %2546  ;;  %3506 = vmatpush.msra.mxu3 %v3782_v53 }
0x16c4   :  { %v2563_v19 = vsel %vm162_vm1, %v4997_v46, %v2547_v44 }
0x16c5   :  { %3507 = vmatpush.msra.mxu3 %v3781_v8 }
0x16cb   :  { %v2553_v40 = vpop.permute.xlu2 %2552 }
0x16cc   :  { %v2565_v36 = vsel %vm811_vm6, %v2563_v19, %v2553_v40 }
0x16cf   :  { %1610 = vrot.lane.b32.xlu0 %v4637_v12, %s4058_s29  ;;  %v3771_v12 = vld [vmem:[%s5517_s10 + $0x30] sm:$0xff] }
0x16d7   :  { %1612 = vrot.lane.b32.xlu0 %v4654_v43, %s4058_s29  ;;  %v3770_v43 = vld [vmem:[%s5517_s10 + $0x28] sm:$0xff] }
0x16dc   :  { %2544 = vrot.lane.b32.xlu1 %v4943_v11, %s4058_s29 }
0x16df   :  { %1616 = vrot.lane.b32.xlu0 %v4632_v10, %s4059_s30  ;;  %v3772_v10 = vld [vmem:[%s5517_s10 + $0x38] sm:$0xff] }
0x16e0   :  { %3468 = vmatpush.msrb.mxu2 %v3772_v10 }
0x16e2   :  { %3469 = vmatpush.msrb.mxu2 %v3771_v12 }
0x16e4   :  { %2550 = vrot.lane.b32.xlu1 %v4978_v27, %s4059_s30  ;;  %3470 = vmatpush.msrb.mxu2 %v3770_v43 }
0x16e7   :  { %2558 = vrot.lane.b32.xlu0 %v5023_v21, %s4060_s1 }
0x16ec   :  { %1618 = vrot.lane.b32.xlu1 %v4664_v60, %s4059_s30 }
0x16ef   :  { %1622 = vrot.lane.b32.xlu0 %v4657_v42, %s4060_s1  ;;  %v3769_v42 = vld [vmem:[%s5517_s10 + $0x20] sm:$0xff] }
0x16f0   :  { %3471 = vmatpush.msrb.mxu2 %v3769_v42 }
0x16f4   :  { %3348 = vrot.lane.b32.xlu1 %v5186_v54, %s4058_s29 }
0x16f7   :  { %3356 = vrot.lane.b32.xlu0 %v5268_v45, %s4059_s30 }
0x16fc   :  { %1624 = vrot.lane.b32.xlu1 %v4669_v62, %s4060_s1 }
0x1704   :  { %3360 = vrot.lane.b32.xlu1 %v5256_v28, %s4060_s1 }
0x172e   :  { %v3415_v60 = vpop.xlane.xlu0 %3414 }
0x172f   :  { %v3419_v62 = vmul.f32 %v3415_v60, %v4500_v34 }
0x1731   :  { %v3421_v11 = vadd.f32 1e-05, %v3419_v62 }
0x1733   :  { %4015 = vrsqrt.f32 %v3421_v11  ;;  %vm3429_vm10 = vweird.f32 %v3421_v11 }
0x1736   :  { %v3418_v27 = vpop.xlane.xlu1 %3417 }
0x1737   :  { %v3420_v46 = vmul.f32 %v3418_v27, %v4500_v34 }
0x1739   :  { %v4016_v21 = vpop.eup %4015  ;;  %v3422_v54 = vadd.f32 1e-05, %v3420_v46  ;;  %v2557_v46 = vpop.permute.xlu2 %2556 }
0x173a   :  { %v3424_v28 = vmul.f32 %v4016_v21, %v3421_v11  ;;  %vm3430_vm9 = vweird.f32 %v4016_v21 }
0x173b   :  { %4017 = vrsqrt.f32 %v3422_v54  ;;  %vm3431_vm11 = vmor %vm3429_vm10, %vm3430_vm9  ;;  %vm3439_vm13 = vweird.f32 %v3422_v54 }
0x173c   :  { %v3425_v45 = vmul.f32 %v4016_v21, %v3424_v28 }
0x173e   :  { %v3426_v24 = vmul.f32 0.5, %v3425_v45 }
0x1740   :  { %v3427_v23 = vsub.f32 1.5, %v3426_v24 }
0x1741   :  { %v4018_v0 = vpop.eup %4017  ;;  %v5364_v32 = vpop.permute.xlu0 %1610 }
0x1742   :  { %v3428_v4 = vmul.f32 %v4016_v21, %v3427_v23  ;;  %v3434_v38 = vmul.f32 %v4018_v0, %v3422_v54  ;;  %vm3440_vm12 = vweird.f32 %v4018_v0  ;;  %v3351_v28 = vpop.permute.xlu2 %3350  ;;  %v1628_v24 = vsel %vm162_vm1, %v4615_v39, %v5364_v32 }
0x1743   :  { %vm3441_vm14 = vmor %vm3439_vm13, %vm3440_vm12  ;;  %v3367_v32 = vsel %vm162_vm1, %v5248_v14, %v3351_v28  ;;  %v3868_v28 = vld [vmem:[%s5520_s13 + $0x1] ss:$0 sm:$0xff] }
0x1744   :  { %v3432_v47 = vsel %vm3431_vm11, %v4016_v21, %v3428_v4  ;;  %v3435_v5 = vmul.f32 %v4018_v0, %v3434_v38 }
0x1745   :  { %v3443_v1 = vmul.f32 %v3432_v47, %v3409_v31  ;;  %v3780_v31 = vld [vmem:[%s5518_s11 + $0xa8] sm:$0xff] }
0x1746   :  { %v3436_v55 = vmul.f32 0.5, %v3435_v5  ;;  %3508 = vmatpush.msra.mxu3 %v3780_v31 }
0x1747   :  { %3773 = vmatmul.msk.f32.vlgmr.msrb.gmra.mxu2 %vm65_vm0, %v3443_v1 }
0x1748   :  { %v3437_v2 = vsub.f32 1.5, %v3436_v55  ;;  %3509 = vmatpush.msra.mxu3 %v3779_v59 }
0x1749   :  { %v5367_v25 = vpop.permute.xlu0 %1612 }
0x174a   :  { %v3438_v7 = vmul.f32 %v4018_v0, %v3437_v2  ;;  %3510 = vmatpush.msra.mxu3 %v3778_v50 }
0x174c   :  { %v3442_v49 = vsel %vm3441_vm14, %v4018_v0, %v3438_v7  ;;  %3511 = vmatpush.msra.mxu3 %v3777_v6  ;;  %v3355_v0 = vpop.permute.xlu2 %3354 }
0x174d   :  { %v3444_v13 = vmul.f32 %v3442_v49, %v3410_v33  ;;  %v3775_v33 = vld [vmem:[%s5518_s11 + $0x80] sm:$0xff] }
0x174e   :  { %3512 = vmatpush.msra.mxu3 %v3776_v52  ;;  %v2545_v60 = vpop.permute.xlu1 %2544 }
0x174f   :  { %3774 = vmatmul.msk.f32.gmra.mxu2 %vm65_vm0, %v3444_v13  ;;  %v2562_v11 = vsel %vm162_vm1, %v4936_v29, %v2545_v60 }
0x1750   :  { %3513 = vmatpush.msra.mxu3 %v3775_v33 }
0x1751   :  { %v5370_v17 = vpop.permute.xlu0 %1616 }
0x1754   :  { %v3363_v5 = vpop.permute.xlu2 %3362 }
0x1756   :  { %v2551_v62 = vpop.permute.xlu1 %2550 }
0x1757   :  { %v2564_v27 = vsel %vm811_vm6, %v2562_v11, %v2551_v62 }
0x1758   :  { %v2566_v21 = vsel %vm814_vm7, %v2564_v27, %v2557_v46  ;;  %v3867_v27 = vld [vmem:[%s5519_s12 + $0x1] ss:$0 sm:$0xff] }
0x1759   :  { %v2559_v22 = vpop.permute.xlu0 %2558 }
0x175a   :  { %v5382_v37 = vsel %vm814_vm7, %v2565_v36, %v2559_v22 }
0x175c   :  { %v818_v55 = vpop.permute.xlu2 %817 }
0x175e   :  { %v1619_v54 = vpop.permute.xlu1 %1618 }
0x1761   :  { %v1623_v29 = vpop.permute.xlu0 %1622 }
0x1764   :  { %v5454_v2 = vpop.permute.xlu2 %819 }
0x1766   :  { %v3349_v45 = vpop.permute.xlu1 %3348 }
0x1767   :  { %v3366_v51 = vsel %vm162_vm1, %v5181_v35, %v3349_v45 }
0x1768   :  { %v3368_v18 = vsel %vm811_vm6, %v3366_v51, %v3355_v0 }
0x1769   :  { %v3357_v39 = vpop.permute.xlu0 %3356 }
0x176a   :  { %v3369_v47 = vsel %vm811_vm6, %v3367_v32, %v3357_v39 }
0x176e   :  { %v1625_v4 = vpop.permute.xlu1 %1624 }
0x1776   :  { %v3361_v63 = vpop.permute.xlu1 %3360 }
0x1777   :  { %v3370_v30 = vsel %vm814_vm7, %v3368_v18, %v3361_v63 }
0x17ca   :  { %v3473_v9 = vpop.f32.mrf.mxu2 }
0x17cb   :  { %v3479_v16 = vmax.f32 %v3473_v9, 0.0 }
0x17cd   :  { %3514 = vmatmul.f32.vlgmr.msra.gmra.mxu3 %v3479_v16 }
0x17d2   :  { %v3476_v44 = vpop.f32.mrf.mxu2 }
0x17d3   :  { %v3480_v19 = vmax.f32 %v3476_v44, 0.0 }
0x17d5   :  { %3517 = vmatmul.f32.gmra.mxu3 %v3480_v19 }
0x1850   :  { %v3515_v40 = vpop.f32.mrf.mxu3 }
0x1851   :  { %v3516_v36 = vadd.f32 %v3515_v40, %v3443_v1  ;;  %v3371_v1 = vsel %vm814_vm7, %v3369_v47, %v3363_v5 }
0x1853   :  { %v3521_v10 = vsel %vm65_vm0, %v3516_v36, 0.0 }
0x1854   :  { %3522 = vadd.xlane.f32.xlu2 %v3521_v10 }
0x1858   :  { %v3518_v12 = vpop.f32.mrf.mxu3 }
0x1859   :  { %v3519_v43 = vadd.f32 %v3518_v12, %v3444_v13 }
0x185b   :  { %v3524_v42 = vsel %vm65_vm0, %v3519_v43, 0.0 }
0x185c   :  { %3525 = vadd.xlane.f32.xlu0 %v3524_v42 }
0x186c   :  { %825 = vrot.lane.b32.xlu2 %v4455_v58, %s4059_s30  ;;  %v1630_v58 = vsel %vm811_vm6, %v1628_v24, %v5370_v17 }
0x186d   :  { %v1632_v23 = vsel %vm814_vm7, %v1630_v58, %v1623_v29 }
0x1870   :  { %3583 = vrot.lane.b32.xlu0 %v2566_v21, %s4062_s4 }
0x1874   :  { %829 = vrot.lane.b32.xlu2 %v4435_v48, %s4060_s1  ;;  %v1629_v48 = vsel %vm162_vm1, %v4622_v56, %v5367_v25  ;;  %v824_v56 = vpop.permute.xlu2 %823 }
0x187c   :  { %831 = vrot.lane.b32.xlu2 %v4462_v61, %s4060_s1  ;;  %v1631_v61 = vsel %vm811_vm6, %v1629_v48, %v1619_v54 }
0x187d   :  { %v1633_v38 = vsel %vm814_vm7, %v1631_v61, %v1625_v4  ;;  %v836_v4 = vsel %vm162_vm1, %v4366_v57, %v5454_v2 }
0x1884   :  { %3591 = vrot.lane.b32.xlu2 %v1632_v23, %s4057_s20 }
0x188c   :  { %3593 = vrot.lane.b32.xlu2 %v1633_v38, %s4057_s20 }
0x1894   :  { %3601 = vrot.lane.b32.xlu2 %v3371_v1, %s4056_s0 }
0x18c7   :  { %v3523_v25 = vpop.xlane.xlu2 %3522 }
0x18c8   :  { %v3527_v7 = vmul.f32 %v3523_v25, %v4500_v34 }
0x18ca   :  { %v3529_v49 = vsub.f32 %v3516_v36, %v3527_v7 }
0x18cc   :  { %v3531_v13 = vmul.f32 %v3529_v49, %v3529_v49 }
0x18ce   :  { %v3533_v17 = vsel %vm65_vm0, %v3531_v13, 0.0 }
0x18cf   :  { %3534 = vadd.xlane.f32.xlu0 %v3533_v17  ;;  %v3526_v14 = vpop.xlane.xlu0 %3525  ;;  %v826_v26 = vpop.permute.xlu2 %825 }
0x18d0   :  { %v3528_v41 = vmul.f32 %v3526_v14, %v4500_v34  ;;  %v838_v61 = vsel %vm811_vm6, %v836_v4, %v826_v26 }
0x18d2   :  { %v5459_v15 = vsub.f32 %v3519_v43, %v3528_v41 }
0x18d4   :  { %v3532_v22 = vmul.f32 %v5459_v15, %v5459_v15 }
0x18d6   :  { %v3536_v20 = vsel %vm65_vm0, %v3532_v22, 0.0 }
0x18d7   :  { %3537 = vadd.xlane.f32.xlu1 %v3536_v20  ;;  %v830_v8 = vpop.permute.xlu2 %829 }
0x18df   :  { %v832_v6 = vpop.permute.xlu2 %831 }
0x18e0   :  { %v840_v39 = vsel %vm814_vm7, %v838_v61, %v832_v6 }
0x18e2   :  { %v3584_v53 = vpop.permute.xlu0 %3583 }
0x18e3   :  { %3599 = vrot.lane.b32.xlu0 %v3370_v30, %s4056_s0 }
0x18e7   :  { %v3592_v44 = vpop.permute.xlu2 %3591 }
0x18ef   :  { %v3594_v45 = vpop.permute.xlu2 %3593 }
0x18f0   :  { %3585 = vrot.lane.b32.xlu1 %v5382_v37, %s4062_s4  ;;  %v835_v37 = vsel %vm162_vm1, %v4319_v3, %v818_v55 }
0x18f1   :  { %v837_v40 = vsel %vm811_vm6, %v835_v37, %v824_v56 }
0x18f2   :  { %v839_v10 = vsel %vm814_vm7, %v837_v40, %v830_v8 }
0x18f3   :  { %v3605_v12 = vsel %vm65_vm0, %v839_v10, %v3584_v53 }
0x18f4   :  { %v3608_v42 = vsel %vm3607_vm15, %v3605_v12, %v3592_v44 }
0x18f7   :  { %v3602_v1 = vpop.permute.xlu2 %3601 }
0x1942   :  { %v3535_v31 = vpop.xlane.xlu0 %3534 }
0x1943   :  { %v3539_v59 = vmul.f32 %v3535_v31, %v4500_v34 }
0x1945   :  { %v3541_v50 = vadd.f32 1e-05, %v3539_v59 }
0x1947   :  { %4019 = vrsqrt.f32 %v3541_v50  ;;  %vm3549_vm4 = vweird.f32 %v3541_v50 }
0x194a   :  { %v3538_v35 = vpop.xlane.xlu1 %3537 }
0x194b   :  { %v3540_v52 = vmul.f32 %v3538_v35, %v4500_v34 }
0x194d   :  { %v4020_v33 = vpop.eup %4019  ;;  %v3542_v9 = vadd.f32 1e-05, %v3540_v52 }
0x194e   :  { %v3544_v16 = vmul.f32 %v4020_v33, %v3541_v50  ;;  %vm3550_vm3 = vweird.f32 %v4020_v33 }
0x194f   :  { %4021 = vrsqrt.f32 %v3542_v9  ;;  %vm3551_vm5 = vmor %vm3549_vm4, %vm3550_vm3  ;;  %vm3559_vm9 = vweird.f32 %v3542_v9 }
0x1950   :  { %v3545_v19 = vmul.f32 %v4020_v33, %v3544_v16 }
0x1952   :  { %v3546_v36 = vmul.f32 0.5, %v3545_v19 }
0x1954   :  { %v3547_v43 = vsub.f32 1.5, %v3546_v36 }
0x1955   :  { %v4022_v34 = vpop.eup %4021  ;;  %v3600_v60 = vpop.permute.xlu0 %3599 }
0x1956   :  { %v3548_v62 = vmul.f32 %v4020_v33, %v3547_v43  ;;  %v3554_v11 = vmul.f32 %v4022_v34, %v3542_v9  ;;  %v3611_v3 = vsel %vm3610_vm2, %v3608_v42, %v3600_v60  ;;  %vm3560_vm8 = vweird.f32 %v4022_v34 }
0x1957   :  { %3613 = vst [vmem:[%s5522_s15] sm:$0xff] %v3611_v3  ;;  %vm3561_vm10 = vmor %vm3559_vm9, %vm3560_vm8 }
0x1958   :  { %v3552_v46 = vsel %vm3551_vm5, %v4020_v33, %v3548_v62  ;;  %v3555_v21 = vmul.f32 %v4022_v34, %v3554_v11 }
0x1959   :  { %v3563_v54 = vmul.f32 %v3552_v46, %v3529_v49 }
0x195a   :  { %v3556_v29 = vmul.f32 0.5, %v3555_v21 }
0x195b   :  { %v3570_v24 = vmul.f32 %v3867_v27, %v3563_v54 }
0x195c   :  { %v3557_v58 = vsub.f32 1.5, %v3556_v29 }
0x195d   :  { %v3577_v23 = vadd.f32 %v3868_v28, %v3570_v24 }
0x195e   :  { %v3558_v0 = vmul.f32 %v4022_v34, %v3557_v58 }
0x195f   :  { %3579 = vst.msk [vmem:[#allocation2] sm:$0xff] %vm65_vm0, %v3577_v23 }
0x1960   :  { %v3562_v48 = vsel %vm3561_vm10, %v4022_v34, %v3558_v0 }
0x1961   :  { %v3564_v38 = vmul.f32 %v3562_v48, %v5459_v15 }
0x1962   :  { %v3586_v32 = vpop.permute.xlu1 %3585 }
0x1963   :  { %v3571_v47 = vmul.f32 %v3867_v27, %v3564_v38  ;;  %v3606_v5 = vsel %vm65_vm0, %v840_v39, %v3586_v32 }
0x1964   :  { %v3609_v57 = vsel %vm3607_vm15, %v3606_v5, %v3594_v45 }
0x1965   :  { %v3612_v55 = vsel %vm3610_vm2, %v3609_v57, %v3602_v1  ;;  %v3578_v2 = vadd.f32 %v3868_v28, %v3571_v47 }
0x1966   :  { %3614 = vst [vmem:[%s5522_s15 + $0x8] sm:$0xff] %v3612_v55 }
0x1967   :  { %3580 = vst.msk [vmem:[#allocation2 + $0x8] sm:$0xff] %vm65_vm0, %v3578_v2 }
0x1968   :  { %3627 = dma.vmem_to_hbm [thread:$0]  %s3620_s24, 256, %s3622_s9, [#allocation3], %s4064_s14, %s4064_s14, %s4058_s29  }
0x1969   :  { %4051 = dma.done.wait [#allocation3], 256  }
0x196a   :  { %4052 = vsyncadd [#allocation3], 4294967040 }
0x196b   :  { %3636 = vsyncpa [#allocation3], 1 }

</bundles_post_ra>
